<compile_context>
chip_gen: v6e
topology: v6e:2x2x1
jax: 0.10.0
libtpu: 0.0.40
codegen_flags: <defaults>
</compile_context>

<pallas_src>
import functools

import jax
import jax.numpy as jnp
from jax.experimental import pallas as pl
from jax.experimental.pallas import tpu as pltpu


# ------------------------------- helpers ------------------------------------

def _apply_act(x, activation):
    if activation == "relu":
        return jnp.maximum(x, 0.0)
    if activation == "sigmoid":
        return jax.nn.sigmoid(x)
    return x


def _choose_lane_tile(hw, per_lane_bytes, budget=8 << 20, min_tiles=1):
    """Largest lane tile that divides `hw`, is 128-aligned, fits a per-block
    VMEM byte budget (double buffered) and yields >= min_tiles grid steps.
    Falls back to the full extent (a full-dim block is always legal) when the
    spatial extent is not lane-aligned."""
    if hw % 128 != 0:
        return hw
    for tiles in range(max(min_tiles, 1), hw // 128 + 1):
        if hw % tiles:
            continue
        t = hw // tiles
        if t % 128 == 0 and 2 * t * per_lane_bytes <= budget:
            return t
    return 128


# --------------------------- Pallas conv GEMMs -------------------------------

def _gemm_kernel(x_ref, w_ref, b_ref, o_ref, *, activation):
    # x: [1, K, T] bf16, w: [Cout, K] bf16, b: [Cout, 1] f32, o: [1, Cout, T]
    acc = jnp.dot(w_ref[...], x_ref[0], preferred_element_type=jnp.float32)
    acc = _apply_act(acc + b_ref[...], activation)
    o_ref[0] = acc.astype(o_ref.dtype)


def pallas_gemm_cm(x, w, bias, activation=None, out_dtype=jnp.bfloat16):
    """Channel-major conv GEMM: x [B, K, P], w [Cout, K], bias [Cout]
    -> [B, Cout, P] with the spatial extent P on the lane axis."""
    B, K, P = x.shape
    Cout = w.shape[0]
    x = x.astype(jnp.bfloat16)
    w = w.astype(jnp.bfloat16)
    b2 = bias.astype(jnp.float32).reshape(Cout, 1)

    per_lane = 2 * K + jnp.dtype(out_dtype).itemsize * Cout
    T = _choose_lane_tile(P, per_lane, min_tiles=2 if B == 1 else 1)
    out = pl.pallas_call(
        functools.partial(_gemm_kernel, activation=activation),
        out_shape=jax.ShapeDtypeStruct((B, Cout, P), out_dtype),
        grid=(B, P // T),
        in_specs=[
            pl.BlockSpec((1, K, T), lambda b, t: (b, 0, t)),
            pl.BlockSpec((Cout, K), lambda b, t: (0, 0)),
            pl.BlockSpec((Cout, 1), lambda b, t: (0, 0)),
        ],
        out_specs=pl.BlockSpec((1, Cout, T), lambda b, t: (b, 0, t)),
        compiler_params=pltpu.CompilerParams(
            dimension_semantics=("parallel", "parallel")),
    )(x, w, b2)
    return out


def conv1x1(x, w, bias, activation=None):
    """1x1 conv, channel-major.  x: [B, Cin, H, W], w: [Cout, Cin]."""
    B, Cin, H, W = x.shape
    out = pallas_gemm_cm(x.reshape(B, Cin, H * W), w, bias, activation)
    return out.reshape(B, w.shape[0], H, W)


def _conv3x3_s1_kernel(x_ref, w_ref, b_ref, o_ref, *, Wp, L, activation):
    # x: [1, Cin, Hp*Wp + 2] bf16 (flattened zero-padded input)
    # w: [9, Cout, Cin] bf16, b: [Cout, 1] f32, o: [1, Cout, L] with L = H*Wp.
    cout = w_ref.shape[1]
    acc = jnp.zeros((cout, L), jnp.float32)
    for t in range(9):
        d = (t // 3) * Wp + (t % 3)          # flat shift of tap (i, j)
        acc = acc + jnp.dot(w_ref[t], x_ref[0, :, d:d + L],
                            preferred_element_type=jnp.float32)
    acc = _apply_act(acc + b_ref[...], activation)
    o_ref[0] = acc.astype(o_ref.dtype)


def conv3x3_s1(x, w9, bias, activation=None, out_dtype=jnp.bfloat16):
    """3x3 / stride 1 / pad 1 conv, channel-major, no HBM im2col.
    x: [B, Cin, H, W]; w9: [9, Cout, Cin] (tap-major); bias: [Cout]."""
    B, Cin, H, W = x.shape
    Cout = w9.shape[1]
    Hp, Wp = H + 2, W + 2
    L = H * Wp                               # padded-width rows of output
    xp = jnp.pad(x.astype(jnp.bfloat16), ((0, 0), (0, 0), (1, 1), (1, 1)))
    # 2 extra trailing zeros so the last tap's shifted slice stays in bounds.
    xf = jnp.pad(xp.reshape(B, Cin, Hp * Wp), ((0, 0), (0, 0), (0, 2)))

    out = pl.pallas_call(
        functools.partial(_conv3x3_s1_kernel, Wp=Wp, L=L, activation=activation),
        out_shape=jax.ShapeDtypeStruct((B, Cout, L), out_dtype),
        grid=(B,),
        in_specs=[
            pl.BlockSpec((1, Cin, Hp * Wp + 2), lambda b: (b, 0, 0)),
            pl.BlockSpec((9, Cout, Cin), lambda b: (0, 0, 0)),
            pl.BlockSpec((Cout, 1), lambda b: (0, 0)),
        ],
        out_specs=pl.BlockSpec((1, Cout, L), lambda b: (b, 0, 0)),
        compiler_params=pltpu.CompilerParams(dimension_semantics=("parallel",)),
    )(xf, w9.astype(jnp.bfloat16), bias.astype(jnp.float32).reshape(Cout, 1))
    # Keep the first W valid columns of every Wp-wide output row.
    return out.reshape(B, Cout, H, Wp)[:, :, :, :W]


def conv3x3_s2(x, wmat, bias, padding, activation=None):
    """3x3 / stride 2 conv, channel-major im2col GEMM (small tap stack).
    wmat: [Cout, 9*Cin], K ordered tap-major / Cin-minor."""
    # TODO(synk): the stride-2 tap stack is still materialized in HBM (~2.25x
    # input); fold it in-kernel with a parity space-to-depth decomposition if
    # these convs ever run at large feature-map sizes.
    B, Cin, H, W = x.shape
    xb = x.astype(jnp.bfloat16)
    if padding:
        xb = jnp.pad(xb, ((0, 0), (0, 0), (padding, padding), (padding, padding)))
    Hp, Wp = H + 2 * padding, W + 2 * padding
    Ho = (Hp - 3) // 2 + 1
    Wo = (Wp - 3) // 2 + 1
    taps = []
    for i in range(3):
        for j in range(3):
            taps.append(xb[:, :, i:i + 2 * (Ho - 1) + 1:2, j:j + 2 * (Wo - 1) + 1:2])
    pat = jnp.concatenate(taps, axis=1).reshape(B, 9 * Cin, Ho * Wo)
    out = pallas_gemm_cm(pat, wmat, bias, activation=activation)
    return out.reshape(B, wmat.shape[0], Ho, Wo)


# ------------------- deformable-conv reduce + final fuse ---------------------

def _dcn_reduce_kernel(s_ref, m_ref, a_ref, b_ref, o_ref):
    # s, m: [1, 9*C, P] f32; a: [C, 9*C] block-diagonal tap weights; b: [C, 1].
    prod = s_ref[0] * m_ref[0]
    acc = jnp.dot(a_ref[...], prod, preferred_element_type=jnp.float32)
    o_ref[0] = jnp.maximum(acc + b_ref[...], 0.0)      # fused F.relu after dcn


def pallas_dcn_reduce(sampled, mask, a_mat, bias):
    """Modulated depthwise deformable-conv accumulation.
    sampled, mask: [B, 9*C, P] (natural layout, no transposes);
    a_mat: [C, 9*C] block-diagonal per-channel tap weights; bias: [C].
    Returns [B, C, P] f32 with the trailing ReLU fused."""
    B, KC, P = sampled.shape
    C = a_mat.shape[0]
    return pl.pallas_call(
        _dcn_reduce_kernel,
        out_shape=jax.ShapeDtypeStruct((B, C, P), jnp.float32),
        grid=(B,),
        in_specs=[
            pl.BlockSpec((1, KC, P), lambda b: (b, 0, 0)),
            pl.BlockSpec((1, KC, P), lambda b: (b, 0, 0)),
            pl.BlockSpec((C, KC), lambda b: (0, 0)),
            pl.BlockSpec((C, 1), lambda b: (0, 0)),
        ],
        out_specs=pl.BlockSpec((1, C, P), lambda b: (b, 0, 0)),
        compiler_params=pltpu.CompilerParams(dimension_semantics=("parallel",)),
    )(sampled.astype(jnp.float32), mask.astype(jnp.float32),
      a_mat.astype(jnp.float32), bias.astype(jnp.float32).reshape(C, 1))


def _fuse_kernel(x_ref, c4_ref, y_ref, o_ref):
    gate = jax.nn.sigmoid(c4_ref[0].astype(jnp.float32))
    o_ref[0] = x_ref[0] * gate * y_ref[0]


def pallas_fuse(x, c4, y):
    """out = x * sigmoid(c4) * y; x: [B,C,H,W] f32, c4: [B,C,H,W] bf16,
    y: [B, C] channel gains.  Everything is already channel-major."""
    B, C, H, W = x.shape
    HW = H * W
    xf = x.reshape(B, C, HW).astype(jnp.float32)
    cf = c4.reshape(B, C, HW)
    yf = y.astype(jnp.float32).reshape(B, C, 1)
    T = _choose_lane_tile(HW, per_lane_bytes=10 * C,
                          min_tiles=2 if B == 1 else 1)
    out = pl.pallas_call(
        _fuse_kernel,
        out_shape=jax.ShapeDtypeStruct((B, C, HW), jnp.float32),
        grid=(B, HW // T),
        in_specs=[
            pl.BlockSpec((1, C, T), lambda b, t: (b, 0, t)),
            pl.BlockSpec((1, C, T), lambda b, t: (b, 0, t)),
            pl.BlockSpec((1, C, 1), lambda b, t: (b, 0, 0)),
        ],
        out_specs=pl.BlockSpec((1, C, T), lambda b, t: (b, 0, t)),
        compiler_params=pltpu.CompilerParams(
            dimension_semantics=("parallel", "parallel")),
    )(xf, cf, yf)
    return out.reshape(B, C, H, W)


# ------------------------------ JAX glue ops ---------------------------------

def max_pool2d(x, k, s):
    # TODO(synk): tiny glue op kept in plain JAX (reduce_window), NCHW.
    neg = jnp.array(-jnp.inf, dtype=x.dtype)
    return jax.lax.reduce_window(x, neg, jax.lax.max,
                                 (1, 1, k, k), (1, 1, s, s), "VALID")


def bilinear_resize_nchw(x, out_h, out_w):
    """F.interpolate(mode='bilinear', align_corners=False), NCHW, plain JAX."""
    B, C, H, W = x.shape
    x = x.astype(jnp.float32)
    scale_h = H / out_h
    scale_w = W / out_w
    src_h = jnp.maximum((jnp.arange(out_h, dtype=jnp.float32) + 0.5) * scale_h
                        - 0.5, 0.0)
    src_w = jnp.maximum((jnp.arange(out_w, dtype=jnp.float32) + 0.5) * scale_w
                        - 0.5, 0.0)
    h0 = jnp.floor(src_h).astype(jnp.int32)
    w0 = jnp.floor(src_w).astype(jnp.int32)
    h1 = jnp.minimum(h0 + 1, H - 1)
    w1 = jnp.minimum(w0 + 1, W - 1)
    lh = (src_h - h0.astype(jnp.float32))[None, None, :, None]
    lw = (src_w - w0.astype(jnp.float32))[None, None, None, :]
    top = x[:, :, h0, :]
    bot = x[:, :, h1, :]

    def gw(v):
        return v[:, :, :, w0] * (1.0 - lw) + v[:, :, :, w1] * lw

    return gw(top) * (1.0 - lh) + gw(bot) * lh


def dcn_sample(x, off):
    """Bilinear sampling for torchvision-style modulated deform conv (NCHW).
    x: [B, C, H, W] f32; off: [B, 2*C*9, H, W] (group-major, tap, (dy,dx)).
    Returns samples [B, C*9, H*W] (group-major, tap-minor rows)."""
    # TODO(synk): data-dependent bilinear gather kept in plain JAX; at real
    # feature-map sizes move it into a Pallas scalar-prefetch / one-hot MXU
    # gather kernel (it will dominate wall-clock otherwise).
    B, C, H, W = x.shape
    K = 9
    off = off.reshape(B, C, K, 2, H, W)
    off_y = off[:, :, :, 0]
    off_x = off[:, :, :, 1]

    ki = jnp.repeat(jnp.arange(3, dtype=jnp.float32), 3)     # tap row index
    kj = jnp.tile(jnp.arange(3, dtype=jnp.float32), 3)       # tap col index
    hh = jnp.arange(H, dtype=jnp.float32)
    ww = jnp.arange(W, dtype=jnp.float32)
    base_y = hh[None, :, None] - 1.0 + ki[:, None, None]     # [K, H, 1]
    base_x = ww[None, None, :] - 1.0 + kj[:, None, None]     # [K, 1, W]

    Y = base_y[None, None] + off_y                           # [B, C, K, H, W]
    X = base_x[None, None] + off_x

    valid = (Y > -1.0) & (Y < H) & (X > -1.0) & (X < W)
    y0 = jnp.floor(Y)
    x0 = jnp.floor(X)
    ly = Y - y0
    lx = X - x0
    y0i = y0.astype(jnp.int32)
    x0i = x0.astype(jnp.int32)

    b_idx = jnp.arange(B)[:, None, None, None, None]
    c_idx = jnp.arange(C)[None, :, None, None, None]

    def tap(yi, xi):
        inb = (yi >= 0) & (yi <= H - 1) & (xi >= 0) & (xi <= W - 1)
        yc = jnp.clip(yi, 0, H - 1)
        xc = jnp.clip(xi, 0, W - 1)
        v = x[b_idx, c_idx, yc, xc]
        return jnp.where(inb, v, 0.0)

    v00 = tap(y0i, x0i)
    v01 = tap(y0i, x0i + 1)
    v10 = tap(y0i + 1, x0i)
    v11 = tap(y0i + 1, x0i + 1)
    val = ((1.0 - ly) * (1.0 - lx) * v00 + (1.0 - ly) * lx * v01
           + ly * (1.0 - lx) * v10 + ly * lx * v11)
    val = jnp.where(valid, val, 0.0)
    return val.reshape(B, C * K, H * W)


# -------------------------------- DSTA model ---------------------------------

def init_params(key, n_feats):
    """Random parameters in PyTorch layout ([Cout, Cin, kh, kw] weights)."""
    f = n_feats // 4
    ks = jax.random.split(key, 32)

    def w(k, shape, scale=0.1):
        return scale * jax.random.normal(k, shape, dtype=jnp.float32)

    def b(k, n):
        return 0.01 * jax.random.normal(k, (n,), dtype=jnp.float32)

    return {
        "conv1_w": w(ks[0], (f, n_feats, 1, 1)), "conv1_b": b(ks[1], f),
        "conv_f_w": w(ks[2], (f, f, 1, 1)), "conv_f_b": b(ks[3], f),
        "conv_max_w": w(ks[4], (f, f, 3, 3)), "conv_max_b": b(ks[5], f),
        "conv2_w": w(ks[6], (f, f, 3, 3)), "conv2_b": b(ks[7], f),
        "conv3_w": w(ks[8], (f, f, 3, 3)), "conv3_b": b(ks[9], f),
        "conv3__w": w(ks[10], (f, f, 3, 3)), "conv3__b": b(ks[11], f),
        "conv4_w": w(ks[12], (n_feats, f, 1, 1)), "conv4_b": b(ks[13], n_feats),
        "dcn_w": w(ks[14], (f, 1, 3, 3)), "dcn_b": b(ks[15], f),
        "mask_w": w(ks[16], (f * 27, f, 3, 3)), "mask_b": b(ks[17], f * 27),
        "down_w": w(ks[18], (f, f, 3, 3)), "down_b": b(ks[19], f),
        "mask2_w": w(ks[20], (f * 27, f, 3, 3)), "mask2_b": b(ks[21], f * 27),
        "du1_w": w(ks[22], (2 * f, f, 1, 1)), "du1_b": b(ks[23], 2 * f),
        "du2_w": w(ks[24], (n_feats, 2 * f, 1, 1)), "du2_b": b(ks[25], n_feats),
    }


def prepare_params(raw):
    """PyTorch-layout weights -> channel-major GEMM layouts (done once,
    outside jit).  No int leaves, so `f` stays static under jit."""
    p = {}
    # 1x1 convs -> [Cout, Cin] bf16
    for name in ("conv1", "conv_f", "conv4"):
        w = raw[name + "_w"]
        p[name + "_w"] = w.reshape(w.shape[0], w.shape[1]).astype(jnp.bfloat16)
        p[name + "_b"] = raw[name + "_b"].astype(jnp.float32)
    # 3x3 stride-1 convs -> [9, Cout, Cin] bf16 (tap-major leading axis)
    for name in ("conv_max", "conv3", "conv3_", "mask", "mask2"):
        w = raw[name + "_w"]
        cout, cin = w.shape[0], w.shape[1]
        p[name + "_w"] = (jnp.transpose(w, (2, 3, 0, 1))
                          .reshape(9, cout, cin).astype(jnp.bfloat16))
        p[name + "_b"] = raw[name + "_b"].astype(jnp.float32)
    # 3x3 stride-2 convs (im2col GEMM) -> [Cout, 9*Cin], K tap-major / Cin-minor
    for name in ("conv2", "down"):
        w = raw[name + "_w"]
        cout, cin = w.shape[0], w.shape[1]
        p[name + "_w"] = (jnp.transpose(w, (0, 2, 3, 1))
                          .reshape(cout, 9 * cin).astype(jnp.bfloat16))
        p[name + "_b"] = raw[name + "_b"].astype(jnp.float32)
    # depthwise deformable conv taps -> block-diagonal [f, 9*f] f32 matrix
    f_ch = raw["dcn_w"].shape[0]
    dw = raw["dcn_w"].reshape(f_ch, 9).astype(jnp.float32)
    p["dcn_A"] = (jnp.eye(f_ch, dtype=jnp.float32)[:, :, None]
                  * dw[None, :, :]).reshape(f_ch, f_ch * 9)
    p["dcn_b"] = raw["dcn_b"].astype(jnp.float32)
    # squeeze-excite 1x1 convs on [B, f] -> plain jnp matrices (no Pallas)
    p["du1_w"] = raw["du1_w"].reshape(raw["du1_w"].shape[0], -1).T.astype(jnp.float32)
    p["du1_b"] = raw["du1_b"].astype(jnp.float32)
    p["du2_w"] = raw["du2_w"].reshape(raw["du2_w"].shape[0], -1).T.astype(jnp.float32)
    p["du2_b"] = raw["du2_b"].astype(jnp.float32)
    return p


def dsta_forward(params, x):
    """x: [B, n_feats, H, W] (NCHW, matching the PyTorch module interface)."""
    B, n_feats, H, W = x.shape
    f = params["dcn_A"].shape[0]                       # static under jit

    c1_ = conv1x1(x, params["conv1_w"], params["conv1_b"])
    c1 = conv3x3_s2(c1_, params["conv2_w"], params["conv2_b"], padding=0)
    v_max = max_pool2d(c1, 7, 3)
    v_range = conv3x3_s1(v_max, params["conv_max_w"], params["conv_max_b"],
                         activation="relu")
    c3 = conv3x3_s1(v_range, params["conv3_w"], params["conv3_b"],
                    activation="relu")
    c3 = conv3x3_s1(c3, params["conv3__w"], params["conv3__b"],
                    activation="relu")
    dc3 = conv3x3_s2(c3, params["down_w"], params["down_b"], padding=1,
                     activation="relu")
    off_mask2 = conv3x3_s1(dc3, params["mask2_w"], params["mask2_b"])
    off_msk = conv3x3_s1(c3, params["mask_w"], params["mask_b"])
    h, w = off_msk.shape[2], off_msk.shape[3]
    off_mask2 = bilinear_resize_nchw(off_mask2, h, w)
    off_msk = off_msk.astype(jnp.float32) + off_mask2

    off = off_msk[:, :f * 2 * 9]                       # [B, 2*f*9, h, w]
    msk = jax.nn.sigmoid(off_msk[:, f * 2 * 9:])       # [B, f*9, h, w]

    # modulated deformable conv (groups = offset_groups = f -> depthwise)
    sampled = dcn_sample(v_max.astype(jnp.float32), off)     # [B, f*9, h*w]
    msk_r = msk.reshape(B, f * 9, h * w)
    c3d = pallas_dcn_reduce(sampled, msk_r, params["dcn_A"], params["dcn_b"])
    c3d = c3d.reshape(B, f, h, w)                      # f32, ReLU already fused

    # squeeze-excite on [B, f]: tiny matmuls, plain jnp (no Pallas launch cost)
    y = jnp.mean(c3d, axis=(2, 3))
    y = jax.nn.relu(y @ params["du1_w"] + params["du1_b"])
    y = jax.nn.sigmoid(y @ params["du2_w"] + params["du2_b"])   # [B, n_feats]

    c3u = bilinear_resize_nchw(c3d, H, W)
    cf = conv1x1(c1_, params["conv_f_w"], params["conv_f_b"])
    c4 = conv1x1(c3u + cf.astype(jnp.float32),
                 params["conv4_w"], params["conv4_b"])
    return pallas_fuse(x, c4, y)                       # x * sigmoid(c4) * y


if __name__ == "__main__":
    B, n_feats, H, W = 2, 16, 32, 32
    key = jax.random.PRNGKey(0)
    x = jax.random.normal(key, (B, n_feats, H, W), dtype=jnp.float32)
    raw = init_params(jax.random.PRNGKey(42), n_feats)
    params = prepare_params(raw)

    out = jax.jit(dsta_forward)(params, x)
    out = jax.block_until_ready(out)
    assert out.shape == (B, n_feats, H, W)
    assert bool(jnp.isfinite(out).all())
    print("KERNEL_OK")
</pallas_src>

<mosaic_0001>
module attributes {stable_mosaic.version = 11 : i64} {
  func.func @_gemm_kernel(%arg0: i32, %arg1: i32, %arg2: memref<1x16x1024xbf16, #tpu.memory_space<vmem>>, %arg3: memref<4x16xbf16, #tpu.memory_space<vmem>>, %arg4: memref<4x1xf32, #tpu.memory_space<vmem>>, %arg5: memref<1x4x1024xbf16, #tpu.memory_space<vmem>>) attributes {dimension_semantics = [#tpu.dimension_semantics<parallel>, #tpu.dimension_semantics<parallel>], iteration_bounds = array<i64: 2, 1>, scalar_prefetch = 0 : i64, scratch_operands = 0 : i64, tpu.core_type = #tpu.core_type<tc>, window_params = [{transform_indices = @transform_0, window_bounds = array<i64: 1, 16, 1024>}, {pipeline_mode = #tpu.pipeline_mode<synchronous>, transform_indices = @transform_1, window_bounds = array<i64: 4, 16>}, {pipeline_mode = #tpu.pipeline_mode<synchronous>, transform_indices = @transform_2, window_bounds = array<i64: 4, 1>}, {transform_indices = @transform_3, window_bounds = array<i64: 1, 4, 1024>}]} {
    %c0 = arith.constant 0 : index
    %c0_0 = arith.constant 0 : index
    %0 = vector.load %arg3[%c0, %c0_0] : memref<4x16xbf16, #tpu.memory_space<vmem>>, vector<4x16xbf16>
    %c0_1 = arith.constant 0 : index
    %c0_2 = arith.constant 0 : index
    %c0_3 = arith.constant 0 : index
    %1 = vector.load %arg2[%c0_1, %c0_2, %c0_3] : memref<1x16x1024xbf16, #tpu.memory_space<vmem>>, vector<1x16x1024xbf16>
    %2 = vector.shape_cast %1 : vector<1x16x1024xbf16> to vector<16x1024xbf16>
    %cst = arith.constant dense<0.000000e+00> : vector<4x1024xf32>
    %3 = tpu.matmul %0, %2, %cst {dimension_numbers = #tpu.dot_dimension_numbers<[1], [0], [0], [1], [0, 0, 1, 1], [], []>} : vector<4x16xbf16>, vector<16x1024xbf16>, vector<4x1024xf32> -> vector<4x1024xf32>
    %c0_4 = arith.constant 0 : index
    %c0_5 = arith.constant 0 : index
    %4 = vector.load %arg4[%c0_4, %c0_5] : memref<4x1xf32, #tpu.memory_space<vmem>>, vector<4x1xf32>
    %5 = vector.broadcast %4 : vector<4x1xf32> to vector<4x1024xf32>
    %6 = arith.addf %3, %5 : vector<4x1024xf32>
    %7 = arith.truncf %6 : vector<4x1024xf32> to vector<4x1024xbf16>
    %c0_6 = arith.constant 0 : index
    %c0_7 = arith.constant 0 : index
    %c0_8 = arith.constant 0 : index
    %8 = vector.load %arg5[%c0_6, %c0_7, %c0_8] : memref<1x4x1024xbf16, #tpu.memory_space<vmem>>, vector<1x4x1024xbf16>
    %9 = vector.shape_cast %8 : vector<1x4x1024xbf16> to vector<4x1024xbf16>
    %10 = vector.shape_cast %7 : vector<4x1024xbf16> to vector<1x4x1024xbf16>
    tpu.vector_store %arg5[%c0_6, %c0_7, %c0_8], %10 {strides = array<i32>} : memref<1x4x1024xbf16, #tpu.memory_space<vmem>>, vector<1x4x1024xbf16>,
    return
  }
  func.func @transform_0(%arg0: i32, %arg1: i32) -> (i32, i32, i32) {
    %c0_i32 = arith.constant 0 : i32
    %c0_i32_0 = arith.constant 0 : i32
    return %arg0, %c0_i32, %arg1 : i32, i32, i32
  }
  func.func @transform_1(%arg0: i32, %arg1: i32) -> (i32, i32) {
    %c0_i32 = arith.constant 0 : i32
    %c0_i32_0 = arith.constant 0 : i32
    %c0_i32_1 = arith.constant 0 : i32
    return %c0_i32, %c0_i32_0 : i32, i32
  }
  func.func @transform_2(%arg0: i32, %arg1: i32) -> (i32, i32) {
    %c0_i32 = arith.constant 0 : i32
    %c0_i32_0 = arith.constant 0 : i32
    %c0_i32_1 = arith.constant 0 : i32
    return %c0_i32, %c0_i32_0 : i32, i32
  }
  func.func @transform_3(%arg0: i32, %arg1: i32) -> (i32, i32, i32) {
    %c0_i32 = arith.constant 0 : i32
    %c0_i32_0 = arith.constant 0 : i32
    return %arg0, %c0_i32, %arg1 : i32, i32, i32
  }
}

module attributes {stable_mosaic.version = 11 : i64} {
  func.func @_gemm_kernel(%arg0: i32, %arg1: i32, %arg2: memref<1x36x225xbf16, #tpu.memory_space<vmem>>, %arg3: memref<4x36xbf16, #tpu.memory_space<vmem>>, %arg4: memref<4x1xf32, #tpu.memory_space<vmem>>, %arg5: memref<1x4x225xbf16, #tpu.memory_space<vmem>>) attributes {dimension_semantics = [#tpu.dimension_semantics<parallel>, #tpu.dimension_semantics<parallel>], iteration_bounds = array<i64: 2, 1>, scalar_prefetch = 0 : i64, scratch_operands = 0 : i64, tpu.core_type = #tpu.core_type<tc>, window_params = [{transform_indices = @transform_0, window_bounds = array<i64: 1, 36, 225>}, {pipeline_mode = #tpu.pipeline_mode<synchronous>, transform_indices = @transform_1, window_bounds = array<i64: 4, 36>}, {pipeline_mode = #tpu.pipeline_mode<synchronous>, transform_indices = @transform_2, window_bounds = array<i64: 4, 1>}, {transform_indices = @transform_3, window_bounds = array<i64: 1, 4, 225>}]} {
    %c0 = arith.constant 0 : index
    %c0_0 = arith.constant 0 : index
    %0 = vector.load %arg3[%c0, %c0_0] : memref<4x36xbf16, #tpu.memory_space<vmem>>, vector<4x36xbf16>
    %c0_1 = arith.constant 0 : index
    %c0_2 = arith.constant 0 : index
    %c0_3 = arith.constant 0 : index
    %1 = vector.load %arg2[%c0_1, %c0_2, %c0_3] : memref<1x36x225xbf16, #tpu.memory_space<vmem>>, vector<1x36x225xbf16>
    %2 = vector.shape_cast %1 : vector<1x36x225xbf16> to vector<36x225xbf16>
    %cst = arith.constant dense<0.000000e+00> : vector<4x225xf32>
    %3 = tpu.matmul %0, %2, %cst {dimension_numbers = #tpu.dot_dimension_numbers<[1], [0], [0], [1], [0, 0, 1, 1], [], []>} : vector<4x36xbf16>, vector<36x225xbf16>, vector<4x225xf32> -> vector<4x225xf32>
    %c0_4 = arith.constant 0 : index
    %c0_5 = arith.constant 0 : index
    %4 = vector.load %arg4[%c0_4, %c0_5] : memref<4x1xf32, #tpu.memory_space<vmem>>, vector<4x1xf32>
    %5 = vector.broadcast %4 : vector<4x1xf32> to vector<4x225xf32>
    %6 = arith.addf %3, %5 : vector<4x225xf32>
    %7 = arith.truncf %6 : vector<4x225xf32> to vector<4x225xbf16>
    %c0_6 = arith.constant 0 : index
    %c0_7 = arith.constant 0 : index
    %c0_8 = arith.constant 0 : index
    %8 = vector.load %arg5[%c0_6, %c0_7, %c0_8] : memref<1x4x225xbf16, #tpu.memory_space<vmem>>, vector<1x4x225xbf16>
    %9 = vector.shape_cast %8 : vector<1x4x225xbf16> to vector<4x225xbf16>
    %10 = vector.shape_cast %7 : vector<4x225xbf16> to vector<1x4x225xbf16>
    tpu.vector_store %arg5[%c0_6, %c0_7, %c0_8], %10 {strides = array<i32>} : memref<1x4x225xbf16, #tpu.memory_space<vmem>>, vector<1x4x225xbf16>,
    return
  }
  func.func @transform_0(%arg0: i32, %arg1: i32) -> (i32, i32, i32) {
    %c0_i32 = arith.constant 0 : i32
    %c0_i32_0 = arith.constant 0 : i32
    return %arg0, %c0_i32, %arg1 : i32, i32, i32
  }
  func.func @transform_1(%arg0: i32, %arg1: i32) -> (i32, i32) {
    %c0_i32 = arith.constant 0 : i32
    %c0_i32_0 = arith.constant 0 : i32
    %c0_i32_1 = arith.constant 0 : i32
    return %c0_i32, %c0_i32_0 : i32, i32
  }
  func.func @transform_2(%arg0: i32, %arg1: i32) -> (i32, i32) {
    %c0_i32 = arith.constant 0 : i32
    %c0_i32_0 = arith.constant 0 : i32
    %c0_i32_1 = arith.constant 0 : i32
    return %c0_i32, %c0_i32_0 : i32, i32
  }
  func.func @transform_3(%arg0: i32, %arg1: i32) -> (i32, i32, i32) {
    %c0_i32 = arith.constant 0 : i32
    %c0_i32_0 = arith.constant 0 : i32
    return %arg0, %c0_i32, %arg1 : i32, i32, i32
  }
}

module attributes {stable_mosaic.version = 11 : i64} {
  func.func @_conv3x3_s1_kernel(%arg0: i32, %arg1: memref<1x4x27xbf16, #tpu.memory_space<vmem>>, %arg2: memref<9x4x4xbf16, #tpu.memory_space<vmem>>, %arg3: memref<4x1xf32, #tpu.memory_space<vmem>>, %arg4: memref<1x4x15xbf16, #tpu.memory_space<vmem>>) attributes {dimension_semantics = [#tpu.dimension_semantics<parallel>], iteration_bounds = array<i64: 2>, scalar_prefetch = 0 : i64, scratch_operands = 0 : i64, tpu.core_type = #tpu.core_type<tc>, window_params = [{transform_indices = @transform_0, window_bounds = array<i64: 1, 4, 27>}, {pipeline_mode = #tpu.pipeline_mode<synchronous>, transform_indices = @transform_1, window_bounds = array<i64: 9, 4, 4>}, {pipeline_mode = #tpu.pipeline_mode<synchronous>, transform_indices = @transform_2, window_bounds = array<i64: 4, 1>}, {transform_indices = @transform_3, window_bounds = array<i64: 1, 4, 15>}]} {
    %cst = arith.constant 0.000000e+00 : f32
    %0 = vector.broadcast %cst : f32 to vector<4x15xf32>
    %c0 = arith.constant 0 : index
    %c0_0 = arith.constant 0 : index
    %c0_1 = arith.constant 0 : index
    %1 = vector.load %arg2[%c0, %c0_0, %c0_1] : memref<9x4x4xbf16, #tpu.memory_space<vmem>>, vector<1x4x4xbf16>
    %2 = vector.shape_cast %1 : vector<1x4x4xbf16> to vector<4x4xbf16>
    %c0_2 = arith.constant 0 : index
    %c0_3 = arith.constant 0 : index
    %c0_4 = arith.constant 0 : index
    %3 = vector.load %arg1[%c0_2, %c0_3, %c0_4] : memref<1x4x27xbf16, #tpu.memory_space<vmem>>, vector<1x4x15xbf16>
    %4 = vector.shape_cast %3 : vector<1x4x15xbf16> to vector<4x15xbf16>
    %cst_5 = arith.constant dense<0.000000e+00> : vector<4x15xf32>
    %5 = tpu.matmul %2, %4, %cst_5 {dimension_numbers = #tpu.dot_dimension_numbers<[1], [0], [0], [1], [0, 0, 1, 1], [], []>} : vector<4x4xbf16>, vector<4x15xbf16>, vector<4x15xf32> -> vector<4x15xf32>
    %6 = arith.addf %0, %5 : vector<4x15xf32>
    %c1 = arith.constant 1 : index
    %c0_6 = arith.constant 0 : index
    %c0_7 = arith.constant 0 : index
    %7 = vector.load %arg2[%c1, %c0_6, %c0_7] : memref<9x4x4xbf16, #tpu.memory_space<vmem>>, vector<1x4x4xbf16>
    %8 = vector.shape_cast %7 : vector<1x4x4xbf16> to vector<4x4xbf16>
    %c0_8 = arith.constant 0 : index
    %c0_9 = arith.constant 0 : index
    %c1_10 = arith.constant 1 : index
    %9 = vector.load %arg1[%c0_8, %c0_9, %c1_10] : memref<1x4x27xbf16, #tpu.memory_space<vmem>>, vector<1x4x15xbf16>
    %10 = vector.shape_cast %9 : vector<1x4x15xbf16> to vector<4x15xbf16>
    %cst_11 = arith.constant dense<0.000000e+00> : vector<4x15xf32>
    %11 = tpu.matmul %8, %10, %cst_11 {dimension_numbers = #tpu.dot_dimension_numbers<[1], [0], [0], [1], [0, 0, 1, 1], [], []>} : vector<4x4xbf16>, vector<4x15xbf16>, vector<4x15xf32> -> vector<4x15xf32>
    %12 = arith.addf %6, %11 : vector<4x15xf32>
    %c2 = arith.constant 2 : index
    %c0_12 = arith.constant 0 : index
    %c0_13 = arith.constant 0 : index
    %13 = vector.load %arg2[%c2, %c0_12, %c0_13] : memref<9x4x4xbf16, #tpu.memory_space<vmem>>, vector<1x4x4xbf16>
    %14 = vector.shape_cast %13 : vector<1x4x4xbf16> to vector<4x4xbf16>
    %c0_14 = arith.constant 0 : index
    %c0_15 = arith.constant 0 : index
    %c2_16 = arith.constant 2 : index
    %15 = vector.load %arg1[%c0_14, %c0_15, %c2_16] : memref<1x4x27xbf16, #tpu.memory_space<vmem>>, vector<1x4x15xbf16>
    %16 = vector.shape_cast %15 : vector<1x4x15xbf16> to vector<4x15xbf16>
    %cst_17 = arith.constant dense<0.000000e+00> : vector<4x15xf32>
    %17 = tpu.matmul %14, %16, %cst_17 {dimension_numbers = #tpu.dot_dimension_numbers<[1], [0], [0], [1], [0, 0, 1, 1], [], []>} : vector<4x4xbf16>, vector<4x15xbf16>, vector<4x15xf32> -> vector<4x15xf32>
    %18 = arith.addf %12, %17 : vector<4x15xf32>
    %c3 = arith.constant 3 : index
    %c0_18 = arith.constant 0 : index
    %c0_19 = arith.constant 0 : index
    %19 = vector.load %arg2[%c3, %c0_18, %c0_19] : memref<9x4x4xbf16, #tpu.memory_space<vmem>>, vector<1x4x4xbf16>
    %20 = vector.shape_cast %19 : vector<1x4x4xbf16> to vector<4x4xbf16>
    %c0_20 = arith.constant 0 : index
    %c0_21 = arith.constant 0 : index
    %c5 = arith.constant 5 : index
    %21 = vector.load %arg1[%c0_20, %c0_21, %c5] : memref<1x4x27xbf16, #tpu.memory_space<vmem>>, vector<1x4x15xbf16>
    %22 = vector.shape_cast %21 : vector<1x4x15xbf16> to vector<4x15xbf16>
    %cst_22 = arith.constant dense<0.000000e+00> : vector<4x15xf32>
    %23 = tpu.matmul %20, %22, %cst_22 {dimension_numbers = #tpu.dot_dimension_numbers<[1], [0], [0], [1], [0, 0, 1, 1], [], []>} : vector<4x4xbf16>, vector<4x15xbf16>, vector<4x15xf32> -> vector<4x15xf32>
    %24 = arith.addf %18, %23 : vector<4x15xf32>
    %c4 = arith.constant 4 : index
    %c0_23 = arith.constant 0 : index
    %c0_24 = arith.constant 0 : index
    %25 = vector.load %arg2[%c4, %c0_23, %c0_24] : memref<9x4x4xbf16, #tpu.memory_space<vmem>>, vector<1x4x4xbf16>
    %26 = vector.shape_cast %25 : vector<1x4x4xbf16> to vector<4x4xbf16>
    %c0_25 = arith.constant 0 : index
    %c0_26 = arith.constant 0 : index
    %c6 = arith.constant 6 : index
    %27 = vector.load %arg1[%c0_25, %c0_26, %c6] : memref<1x4x27xbf16, #tpu.memory_space<vmem>>, vector<1x4x15xbf16>
    %28 = vector.shape_cast %27 : vector<1x4x15xbf16> to vector<4x15xbf16>
    %cst_27 = arith.constant dense<0.000000e+00> : vector<4x15xf32>
    %29 = tpu.matmul %26, %28, %cst_27 {dimension_numbers = #tpu.dot_dimension_numbers<[1], [0], [0], [1], [0, 0, 1, 1], [], []>} : vector<4x4xbf16>, vector<4x15xbf16>, vector<4x15xf32> -> vector<4x15xf32>
    %30 = arith.addf %24, %29 : vector<4x15xf32>
    %c5_28 = arith.constant 5 : index
    %c0_29 = arith.constant 0 : index
    %c0_30 = arith.constant 0 : index
    %31 = vector.load %arg2[%c5_28, %c0_29, %c0_30] : memref<9x4x4xbf16, #tpu.memory_space<vmem>>, vector<1x4x4xbf16>
    %32 = vector.shape_cast %31 : vector<1x4x4xbf16> to vector<4x4xbf16>
    %c0_31 = arith.constant 0 : index
    %c0_32 = arith.constant 0 : index
    %c7 = arith.constant 7 : index
    %33 = vector.load %arg1[%c0_31, %c0_32, %c7] : memref<1x4x27xbf16, #tpu.memory_space<vmem>>, vector<1x4x15xbf16>
    %34 = vector.shape_cast %33 : vector<1x4x15xbf16> to vector<4x15xbf16>
    %cst_33 = arith.constant dense<0.000000e+00> : vector<4x15xf32>
    %35 = tpu.matmul %32, %34, %cst_33 {dimension_numbers = #tpu.dot_dimension_numbers<[1], [0], [0], [1], [0, 0, 1, 1], [], []>} : vector<4x4xbf16>, vector<4x15xbf16>, vector<4x15xf32> -> vector<4x15xf32>
    %36 = arith.addf %30, %35 : vector<4x15xf32>
    %c6_34 = arith.constant 6 : index
    %c0_35 = arith.constant 0 : index
    %c0_36 = arith.constant 0 : index
    %37 = vector.load %arg2[%c6_34, %c0_35, %c0_36] : memref<9x4x4xbf16, #tpu.memory_space<vmem>>, vector<1x4x4xbf16>
    %38 = vector.shape_cast %37 : vector<1x4x4xbf16> to vector<4x4xbf16>
    %c0_37 = arith.constant 0 : index
    %c0_38 = arith.constant 0 : index
    %c10 = arith.constant 10 : index
    %39 = vector.load %arg1[%c0_37, %c0_38, %c10] : memref<1x4x27xbf16, #tpu.memory_space<vmem>>, vector<1x4x15xbf16>
    %40 = vector.shape_cast %39 : vector<1x4x15xbf16> to vector<4x15xbf16>
    %cst_39 = arith.constant dense<0.000000e+00> : vector<4x15xf32>
    %41 = tpu.matmul %38, %40, %cst_39 {dimension_numbers = #tpu.dot_dimension_numbers<[1], [0], [0], [1], [0, 0, 1, 1], [], []>} : vector<4x4xbf16>, vector<4x15xbf16>, vector<4x15xf32> -> vector<4x15xf32>
    %42 = arith.addf %36, %41 : vector<4x15xf32>
    %c7_40 = arith.constant 7 : index
    %c0_41 = arith.constant 0 : index
    %c0_42 = arith.constant 0 : index
    %43 = vector.load %arg2[%c7_40, %c0_41, %c0_42] : memref<9x4x4xbf16, #tpu.memory_space<vmem>>, vector<1x4x4xbf16>
    %44 = vector.shape_cast %43 : vector<1x4x4xbf16> to vector<4x4xbf16>
    %c0_43 = arith.constant 0 : index
    %c0_44 = arith.constant 0 : index
    %c11 = arith.constant 11 : index
    %45 = vector.load %arg1[%c0_43, %c0_44, %c11] : memref<1x4x27xbf16, #tpu.memory_space<vmem>>, vector<1x4x15xbf16>
    %46 = vector.shape_cast %45 : vector<1x4x15xbf16> to vector<4x15xbf16>
    %cst_45 = arith.constant dense<0.000000e+00> : vector<4x15xf32>
    %47 = tpu.matmul %44, %46, %cst_45 {dimension_numbers = #tpu.dot_dimension_numbers<[1], [0], [0], [1], [0, 0, 1, 1], [], []>} : vector<4x4xbf16>, vector<4x15xbf16>, vector<4x15xf32> -> vector<4x15xf32>
    %48 = arith.addf %42, %47 : vector<4x15xf32>
    %c8 = arith.constant 8 : index
    %c0_46 = arith.constant 0 : index
    %c0_47 = arith.constant 0 : index
    %49 = vector.load %arg2[%c8, %c0_46, %c0_47] : memref<9x4x4xbf16, #tpu.memory_space<vmem>>, vector<1x4x4xbf16>
    %50 = vector.shape_cast %49 : vector<1x4x4xbf16> to vector<4x4xbf16>
    %c0_48 = arith.constant 0 : index
    %c0_49 = arith.constant 0 : index
    %c12 = arith.constant 12 : index
    %51 = vector.load %arg1[%c0_48, %c0_49, %c12] : memref<1x4x27xbf16, #tpu.memory_space<vmem>>, vector<1x4x15xbf16>
    %52 = vector.shape_cast %51 : vector<1x4x15xbf16> to vector<4x15xbf16>
    %cst_50 = arith.constant dense<0.000000e+00> : vector<4x15xf32>
    %53 = tpu.matmul %50, %52, %cst_50 {dimension_numbers = #tpu.dot_dimension_numbers<[1], [0], [0], [1], [0, 0, 1, 1], [], []>} : vector<4x4xbf16>, vector<4x15xbf16>, vector<4x15xf32> -> vector<4x15xf32>
    %54 = arith.addf %48, %53 : vector<4x15xf32>
    %c0_51 = arith.constant 0 : index
    %c0_52 = arith.constant 0 : index
    %55 = vector.load %arg3[%c0_51, %c0_52] : memref<4x1xf32, #tpu.memory_space<vmem>>, vector<4x1xf32>
    %56 = vector.broadcast %55 : vector<4x1xf32> to vector<4x15xf32>
    %57 = arith.addf %54, %56 : vector<4x15xf32>
    %cst_53 = arith.constant 0.000000e+00 : f32
    %58 = vector.broadcast %cst_53 : f32 to vector<4x15xf32>
    %59 = arith.maximumf %57, %58 : vector<4x15xf32>
    %60 = arith.truncf %59 : vector<4x15xf32> to vector<4x15xbf16>
    %c0_54 = arith.constant 0 : index
    %c0_55 = arith.constant 0 : index
    %c0_56 = arith.constant 0 : index
    %61 = vector.load %arg4[%c0_54, %c0_55, %c0_56] : memref<1x4x15xbf16, #tpu.memory_space<vmem>>, vector<1x4x15xbf16>
    %62 = vector.shape_cast %61 : vector<1x4x15xbf16> to vector<4x15xbf16>
    %63 = vector.shape_cast %60 : vector<4x15xbf16> to vector<1x4x15xbf16>
    tpu.vector_store %arg4[%c0_54, %c0_55, %c0_56], %63 {strides = array<i32>} : memref<1x4x15xbf16, #tpu.memory_space<vmem>>, vector<1x4x15xbf16>,
    return
  }
  func.func @transform_0(%arg0: i32) -> (i32, i32, i32) {
    %c0_i32 = arith.constant 0 : i32
    %c0_i32_0 = arith.constant 0 : i32
    %c0_i32_1 = arith.constant 0 : i32
    return %arg0, %c0_i32, %c0_i32_0 : i32, i32, i32
  }
  func.func @transform_1(%arg0: i32) -> (i32, i32, i32) {
    %c0_i32 = arith.constant 0 : i32
    %c0_i32_0 = arith.constant 0 : i32
    %c0_i32_1 = arith.constant 0 : i32
    %c0_i32_2 = arith.constant 0 : i32
    return %c0_i32, %c0_i32_0, %c0_i32_1 : i32, i32, i32
  }
  func.func @transform_2(%arg0: i32) -> (i32, i32) {
    %c0_i32 = arith.constant 0 : i32
    %c0_i32_0 = arith.constant 0 : i32
    %c0_i32_1 = arith.constant 0 : i32
    return %c0_i32, %c0_i32_0 : i32, i32
  }
  func.func @transform_3(%arg0: i32) -> (i32, i32, i32) {
    %c0_i32 = arith.constant 0 : i32
    %c0_i32_0 = arith.constant 0 : i32
    %c0_i32_1 = arith.constant 0 : i32
    return %arg0, %c0_i32, %c0_i32_0 : i32, i32, i32
  }
}

module attributes {stable_mosaic.version = 11 : i64} {
  func.func @_gemm_kernel(%arg0: i32, %arg1: i32, %arg2: memref<1x36x4xbf16, #tpu.memory_space<vmem>>, %arg3: memref<4x36xbf16, #tpu.memory_space<vmem>>, %arg4: memref<4x1xf32, #tpu.memory_space<vmem>>, %arg5: memref<1x4x4xbf16, #tpu.memory_space<vmem>>) attributes {dimension_semantics = [#tpu.dimension_semantics<parallel>, #tpu.dimension_semantics<parallel>], iteration_bounds = array<i64: 2, 1>, scalar_prefetch = 0 : i64, scratch_operands = 0 : i64, tpu.core_type = #tpu.core_type<tc>, window_params = [{transform_indices = @transform_0, window_bounds = array<i64: 1, 36, 4>}, {pipeline_mode = #tpu.pipeline_mode<synchronous>, transform_indices = @transform_1, window_bounds = array<i64: 4, 36>}, {pipeline_mode = #tpu.pipeline_mode<synchronous>, transform_indices = @transform_2, window_bounds = array<i64: 4, 1>}, {transform_indices = @transform_3, window_bounds = array<i64: 1, 4, 4>}]} {
    %c0 = arith.constant 0 : index
    %c0_0 = arith.constant 0 : index
    %0 = vector.load %arg3[%c0, %c0_0] : memref<4x36xbf16, #tpu.memory_space<vmem>>, vector<4x36xbf16>
    %c0_1 = arith.constant 0 : index
    %c0_2 = arith.constant 0 : index
    %c0_3 = arith.constant 0 : index
    %1 = vector.load %arg2[%c0_1, %c0_2, %c0_3] : memref<1x36x4xbf16, #tpu.memory_space<vmem>>, vector<1x36x4xbf16>
    %2 = vector.shape_cast %1 : vector<1x36x4xbf16> to vector<36x4xbf16>
    %cst = arith.constant dense<0.000000e+00> : vector<4x4xf32>
    %3 = tpu.matmul %0, %2, %cst {dimension_numbers = #tpu.dot_dimension_numbers<[1], [0], [0], [1], [0, 0, 1, 1], [], []>} : vector<4x36xbf16>, vector<36x4xbf16>, vector<4x4xf32> -> vector<4x4xf32>
    %c0_4 = arith.constant 0 : index
    %c0_5 = arith.constant 0 : index
    %4 = vector.load %arg4[%c0_4, %c0_5] : memref<4x1xf32, #tpu.memory_space<vmem>>, vector<4x1xf32>
    %5 = vector.broadcast %4 : vector<4x1xf32> to vector<4x4xf32>
    %6 = arith.addf %3, %5 : vector<4x4xf32>
    %cst_6 = arith.constant 0.000000e+00 : f32
    %7 = vector.broadcast %cst_6 : f32 to vector<4x4xf32>
    %8 = arith.maximumf %6, %7 : vector<4x4xf32>
    %9 = arith.truncf %8 : vector<4x4xf32> to vector<4x4xbf16>
    %c0_7 = arith.constant 0 : index
    %c0_8 = arith.constant 0 : index
    %c0_9 = arith.constant 0 : index
    %10 = vector.load %arg5[%c0_7, %c0_8, %c0_9] : memref<1x4x4xbf16, #tpu.memory_space<vmem>>, vector<1x4x4xbf16>
    %11 = vector.shape_cast %10 : vector<1x4x4xbf16> to vector<4x4xbf16>
    %12 = vector.shape_cast %9 : vector<4x4xbf16> to vector<1x4x4xbf16>
    tpu.vector_store %arg5[%c0_7, %c0_8, %c0_9], %12 {strides = array<i32>} : memref<1x4x4xbf16, #tpu.memory_space<vmem>>, vector<1x4x4xbf16>,
    return
  }
  func.func @transform_0(%arg0: i32, %arg1: i32) -> (i32, i32, i32) {
    %c0_i32 = arith.constant 0 : i32
    %c0_i32_0 = arith.constant 0 : i32
    return %arg0, %c0_i32, %arg1 : i32, i32, i32
  }
  func.func @transform_1(%arg0: i32, %arg1: i32) -> (i32, i32) {
    %c0_i32 = arith.constant 0 : i32
    %c0_i32_0 = arith.constant 0 : i32
    %c0_i32_1 = arith.constant 0 : i32
    return %c0_i32, %c0_i32_0 : i32, i32
  }
  func.func @transform_2(%arg0: i32, %arg1: i32) -> (i32, i32) {
    %c0_i32 = arith.constant 0 : i32
    %c0_i32_0 = arith.constant 0 : i32
    %c0_i32_1 = arith.constant 0 : i32
    return %c0_i32, %c0_i32_0 : i32, i32
  }
  func.func @transform_3(%arg0: i32, %arg1: i32) -> (i32, i32, i32) {
    %c0_i32 = arith.constant 0 : i32
    %c0_i32_0 = arith.constant 0 : i32
    return %arg0, %c0_i32, %arg1 : i32, i32, i32
  }
}

module attributes {stable_mosaic.version = 11 : i64} {
  func.func @_conv3x3_s1_kernel(%arg0: i32, %arg1: memref<1x4x18xbf16, #tpu.memory_space<vmem>>, %arg2: memref<9x108x4xbf16, #tpu.memory_space<vmem>>, %arg3: memref<108x1xf32, #tpu.memory_space<vmem>>, %arg4: memref<1x108x8xbf16, #tpu.memory_space<vmem>>) attributes {dimension_semantics = [#tpu.dimension_semantics<parallel>], iteration_bounds = array<i64: 2>, scalar_prefetch = 0 : i64, scratch_operands = 0 : i64, tpu.core_type = #tpu.core_type<tc>, window_params = [{transform_indices = @transform_0, window_bounds = array<i64: 1, 4, 18>}, {pipeline_mode = #tpu.pipeline_mode<synchronous>, transform_indices = @transform_1, window_bounds = array<i64: 9, 108, 4>}, {pipeline_mode = #tpu.pipeline_mode<synchronous>, transform_indices = @transform_2, window_bounds = array<i64: 108, 1>}, {transform_indices = @transform_3, window_bounds = array<i64: 1, 108, 8>}]} {
    %cst = arith.constant 0.000000e+00 : f32
    %0 = vector.broadcast %cst : f32 to vector<108x8xf32>
    %c0 = arith.constant 0 : index
    %c0_0 = arith.constant 0 : index
    %c0_1 = arith.constant 0 : index
    %1 = vector.load %arg2[%c0, %c0_0, %c0_1] : memref<9x108x4xbf16, #tpu.memory_space<vmem>>, vector<1x108x4xbf16>
    %2 = vector.shape_cast %1 : vector<1x108x4xbf16> to vector<108x4xbf16>
    %c0_2 = arith.constant 0 : index
    %c0_3 = arith.constant 0 : index
    %c0_4 = arith.constant 0 : index
    %3 = vector.load %arg1[%c0_2, %c0_3, %c0_4] : memref<1x4x18xbf16, #tpu.memory_space<vmem>>, vector<1x4x8xbf16>
    %4 = vector.shape_cast %3 : vector<1x4x8xbf16> to vector<4x8xbf16>
    %cst_5 = arith.constant dense<0.000000e+00> : vector<108x8xf32>
    %5 = tpu.matmul %2, %4, %cst_5 {dimension_numbers = #tpu.dot_dimension_numbers<[1], [0], [0], [1], [0, 0, 1, 1], [], []>} : vector<108x4xbf16>, vector<4x8xbf16>, vector<108x8xf32> -> vector<108x8xf32>
    %6 = arith.addf %0, %5 : vector<108x8xf32>
    %c1 = arith.constant 1 : index
    %c0_6 = arith.constant 0 : index
    %c0_7 = arith.constant 0 : index
    %7 = vector.load %arg2[%c1, %c0_6, %c0_7] : memref<9x108x4xbf16, #tpu.memory_space<vmem>>, vector<1x108x4xbf16>
    %8 = vector.shape_cast %7 : vector<1x108x4xbf16> to vector<108x4xbf16>
    %c0_8 = arith.constant 0 : index
    %c0_9 = arith.constant 0 : index
    %c1_10 = arith.constant 1 : index
    %9 = vector.load %arg1[%c0_8, %c0_9, %c1_10] : memref<1x4x18xbf16, #tpu.memory_space<vmem>>, vector<1x4x8xbf16>
    %10 = vector.shape_cast %9 : vector<1x4x8xbf16> to vector<4x8xbf16>
    %cst_11 = arith.constant dense<0.000000e+00> : vector<108x8xf32>
    %11 = tpu.matmul %8, %10, %cst_11 {dimension_numbers = #tpu.dot_dimension_numbers<[1], [0], [0], [1], [0, 0, 1, 1], [], []>} : vector<108x4xbf16>, vector<4x8xbf16>, vector<108x8xf32> -> vector<108x8xf32>
    %12 = arith.addf %6, %11 : vector<108x8xf32>
    %c2 = arith.constant 2 : index
    %c0_12 = arith.constant 0 : index
    %c0_13 = arith.constant 0 : index
    %13 = vector.load %arg2[%c2, %c0_12, %c0_13] : memref<9x108x4xbf16, #tpu.memory_space<vmem>>, vector<1x108x4xbf16>
    %14 = vector.shape_cast %13 : vector<1x108x4xbf16> to vector<108x4xbf16>
    %c0_14 = arith.constant 0 : index
    %c0_15 = arith.constant 0 : index
    %c2_16 = arith.constant 2 : index
    %15 = vector.load %arg1[%c0_14, %c0_15, %c2_16] : memref<1x4x18xbf16, #tpu.memory_space<vmem>>, vector<1x4x8xbf16>
    %16 = vector.shape_cast %15 : vector<1x4x8xbf16> to vector<4x8xbf16>
    %cst_17 = arith.constant dense<0.000000e+00> : vector<108x8xf32>
    %17 = tpu.matmul %14, %16, %cst_17 {dimension_numbers = #tpu.dot_dimension_numbers<[1], [0], [0], [1], [0, 0, 1, 1], [], []>} : vector<108x4xbf16>, vector<4x8xbf16>, vector<108x8xf32> -> vector<108x8xf32>
    %18 = arith.addf %12, %17 : vector<108x8xf32>
    %c3 = arith.constant 3 : index
    %c0_18 = arith.constant 0 : index
    %c0_19 = arith.constant 0 : index
    %19 = vector.load %arg2[%c3, %c0_18, %c0_19] : memref<9x108x4xbf16, #tpu.memory_space<vmem>>, vector<1x108x4xbf16>
    %20 = vector.shape_cast %19 : vector<1x108x4xbf16> to vector<108x4xbf16>
    %c0_20 = arith.constant 0 : index
    %c0_21 = arith.constant 0 : index
    %c4 = arith.constant 4 : index
    %21 = vector.load %arg1[%c0_20, %c0_21, %c4] : memref<1x4x18xbf16, #tpu.memory_space<vmem>>, vector<1x4x8xbf16>
    %22 = vector.shape_cast %21 : vector<1x4x8xbf16> to vector<4x8xbf16>
    %cst_22 = arith.constant dense<0.000000e+00> : vector<108x8xf32>
    %23 = tpu.matmul %20, %22, %cst_22 {dimension_numbers = #tpu.dot_dimension_numbers<[1], [0], [0], [1], [0, 0, 1, 1], [], []>} : vector<108x4xbf16>, vector<4x8xbf16>, vector<108x8xf32> -> vector<108x8xf32>
    %24 = arith.addf %18, %23 : vector<108x8xf32>
    %c4_23 = arith.constant 4 : index
    %c0_24 = arith.constant 0 : index
    %c0_25 = arith.constant 0 : index
    %25 = vector.load %arg2[%c4_23, %c0_24, %c0_25] : memref<9x108x4xbf16, #tpu.memory_space<vmem>>, vector<1x108x4xbf16>
    %26 = vector.shape_cast %25 : vector<1x108x4xbf16> to vector<108x4xbf16>
    %c0_26 = arith.constant 0 : index
    %c0_27 = arith.constant 0 : index
    %c5 = arith.constant 5 : index
    %27 = vector.load %arg1[%c0_26, %c0_27, %c5] : memref<1x4x18xbf16, #tpu.memory_space<vmem>>, vector<1x4x8xbf16>
    %28 = vector.shape_cast %27 : vector<1x4x8xbf16> to vector<4x8xbf16>
    %cst_28 = arith.constant dense<0.000000e+00> : vector<108x8xf32>
    %29 = tpu.matmul %26, %28, %cst_28 {dimension_numbers = #tpu.dot_dimension_numbers<[1], [0], [0], [1], [0, 0, 1, 1], [], []>} : vector<108x4xbf16>, vector<4x8xbf16>, vector<108x8xf32> -> vector<108x8xf32>
    %30 = arith.addf %24, %29 : vector<108x8xf32>
    %c5_29 = arith.constant 5 : index
    %c0_30 = arith.constant 0 : index
    %c0_31 = arith.constant 0 : index
    %31 = vector.load %arg2[%c5_29, %c0_30, %c0_31] : memref<9x108x4xbf16, #tpu.memory_space<vmem>>, vector<1x108x4xbf16>
    %32 = vector.shape_cast %31 : vector<1x108x4xbf16> to vector<108x4xbf16>
    %c0_32 = arith.constant 0 : index
    %c0_33 = arith.constant 0 : index
    %c6 = arith.constant 6 : index
    %33 = vector.load %arg1[%c0_32, %c0_33, %c6] : memref<1x4x18xbf16, #tpu.memory_space<vmem>>, vector<1x4x8xbf16>
    %34 = vector.shape_cast %33 : vector<1x4x8xbf16> to vector<4x8xbf16>
    %cst_34 = arith.constant dense<0.000000e+00> : vector<108x8xf32>
    %35 = tpu.matmul %32, %34, %cst_34 {dimension_numbers = #tpu.dot_dimension_numbers<[1], [0], [0], [1], [0, 0, 1, 1], [], []>} : vector<108x4xbf16>, vector<4x8xbf16>, vector<108x8xf32> -> vector<108x8xf32>
    %36 = arith.addf %30, %35 : vector<108x8xf32>
    %c6_35 = arith.constant 6 : index
    %c0_36 = arith.constant 0 : index
    %c0_37 = arith.constant 0 : index
    %37 = vector.load %arg2[%c6_35, %c0_36, %c0_37] : memref<9x108x4xbf16, #tpu.memory_space<vmem>>, vector<1x108x4xbf16>
    %38 = vector.shape_cast %37 : vector<1x108x4xbf16> to vector<108x4xbf16>
    %c0_38 = arith.constant 0 : index
    %c0_39 = arith.constant 0 : index
    %c8 = arith.constant 8 : index
    %39 = vector.load %arg1[%c0_38, %c0_39, %c8] : memref<1x4x18xbf16, #tpu.memory_space<vmem>>, vector<1x4x8xbf16>
    %40 = vector.shape_cast %39 : vector<1x4x8xbf16> to vector<4x8xbf16>
    %cst_40 = arith.constant dense<0.000000e+00> : vector<108x8xf32>
    %41 = tpu.matmul %38, %40, %cst_40 {dimension_numbers = #tpu.dot_dimension_numbers<[1], [0], [0], [1], [0, 0, 1, 1], [], []>} : vector<108x4xbf16>, vector<4x8xbf16>, vector<108x8xf32> -> vector<108x8xf32>
    %42 = arith.addf %36, %41 : vector<108x8xf32>
    %c7 = arith.constant 7 : index
    %c0_41 = arith.constant 0 : index
    %c0_42 = arith.constant 0 : index
    %43 = vector.load %arg2[%c7, %c0_41, %c0_42] : memref<9x108x4xbf16, #tpu.memory_space<vmem>>, vector<1x108x4xbf16>
    %44 = vector.shape_cast %43 : vector<1x108x4xbf16> to vector<108x4xbf16>
    %c0_43 = arith.constant 0 : index
    %c0_44 = arith.constant 0 : index
    %c9 = arith.constant 9 : index
    %45 = vector.load %arg1[%c0_43, %c0_44, %c9] : memref<1x4x18xbf16, #tpu.memory_space<vmem>>, vector<1x4x8xbf16>
    %46 = vector.shape_cast %45 : vector<1x4x8xbf16> to vector<4x8xbf16>
    %cst_45 = arith.constant dense<0.000000e+00> : vector<108x8xf32>
    %47 = tpu.matmul %44, %46, %cst_45 {dimension_numbers = #tpu.dot_dimension_numbers<[1], [0], [0], [1], [0, 0, 1, 1], [], []>} : vector<108x4xbf16>, vector<4x8xbf16>, vector<108x8xf32> -> vector<108x8xf32>
    %48 = arith.addf %42, %47 : vector<108x8xf32>
    %c8_46 = arith.constant 8 : index
    %c0_47 = arith.constant 0 : index
    %c0_48 = arith.constant 0 : index
    %49 = vector.load %arg2[%c8_46, %c0_47, %c0_48] : memref<9x108x4xbf16, #tpu.memory_space<vmem>>, vector<1x108x4xbf16>
    %50 = vector.shape_cast %49 : vector<1x108x4xbf16> to vector<108x4xbf16>
    %c0_49 = arith.constant 0 : index
    %c0_50 = arith.constant 0 : index
    %c10 = arith.constant 10 : index
    %51 = vector.load %arg1[%c0_49, %c0_50, %c10] : memref<1x4x18xbf16, #tpu.memory_space<vmem>>, vector<1x4x8xbf16>
    %52 = vector.shape_cast %51 : vector<1x4x8xbf16> to vector<4x8xbf16>
    %cst_51 = arith.constant dense<0.000000e+00> : vector<108x8xf32>
    %53 = tpu.matmul %50, %52, %cst_51 {dimension_numbers = #tpu.dot_dimension_numbers<[1], [0], [0], [1], [0, 0, 1, 1], [], []>} : vector<108x4xbf16>, vector<4x8xbf16>, vector<108x8xf32> -> vector<108x8xf32>
    %54 = arith.addf %48, %53 : vector<108x8xf32>
    %c0_52 = arith.constant 0 : index
    %c0_53 = arith.constant 0 : index
    %55 = vector.load %arg3[%c0_52, %c0_53] : memref<108x1xf32, #tpu.memory_space<vmem>>, vector<108x1xf32>
    %56 = vector.broadcast %55 : vector<108x1xf32> to vector<108x8xf32>
    %57 = arith.addf %54, %56 : vector<108x8xf32>
    %58 = arith.truncf %57 : vector<108x8xf32> to vector<108x8xbf16>
    %c0_54 = arith.constant 0 : index
    %c0_55 = arith.constant 0 : index
    %c0_56 = arith.constant 0 : index
    %59 = vector.load %arg4[%c0_54, %c0_55, %c0_56] : memref<1x108x8xbf16, #tpu.memory_space<vmem>>, vector<1x108x8xbf16>
    %60 = vector.shape_cast %59 : vector<1x108x8xbf16> to vector<108x8xbf16>
    %61 = vector.shape_cast %58 : vector<108x8xbf16> to vector<1x108x8xbf16>
    tpu.vector_store %arg4[%c0_54, %c0_55, %c0_56], %61 {strides = array<i32>} : memref<1x108x8xbf16, #tpu.memory_space<vmem>>, vector<1x108x8xbf16>,
    return
  }
  func.func @transform_0(%arg0: i32) -> (i32, i32, i32) {
    %c0_i32 = arith.constant 0 : i32
    %c0_i32_0 = arith.constant 0 : i32
    %c0_i32_1 = arith.constant 0 : i32
    return %arg0, %c0_i32, %c0_i32_0 : i32, i32, i32
  }
  func.func @transform_1(%arg0: i32) -> (i32, i32, i32) {
    %c0_i32 = arith.constant 0 : i32
    %c0_i32_0 = arith.constant 0 : i32
    %c0_i32_1 = arith.constant 0 : i32
    %c0_i32_2 = arith.constant 0 : i32
    return %c0_i32, %c0_i32_0, %c0_i32_1 : i32, i32, i32
  }
  func.func @transform_2(%arg0: i32) -> (i32, i32) {
    %c0_i32 = arith.constant 0 : i32
    %c0_i32_0 = arith.constant 0 : i32
    %c0_i32_1 = arith.constant 0 : i32
    return %c0_i32, %c0_i32_0 : i32, i32
  }
  func.func @transform_3(%arg0: i32) -> (i32, i32, i32) {
    %c0_i32 = arith.constant 0 : i32
    %c0_i32_0 = arith.constant 0 : i32
    %c0_i32_1 = arith.constant 0 : i32
    return %arg0, %c0_i32, %c0_i32_0 : i32, i32, i32
  }
}

module attributes {stable_mosaic.version = 11 : i64} {
  func.func @_conv3x3_s1_kernel(%arg0: i32, %arg1: memref<1x4x27xbf16, #tpu.memory_space<vmem>>, %arg2: memref<9x108x4xbf16, #tpu.memory_space<vmem>>, %arg3: memref<108x1xf32, #tpu.memory_space<vmem>>, %arg4: memref<1x108x15xbf16, #tpu.memory_space<vmem>>) attributes {dimension_semantics = [#tpu.dimension_semantics<parallel>], iteration_bounds = array<i64: 2>, scalar_prefetch = 0 : i64, scratch_operands = 0 : i64, tpu.core_type = #tpu.core_type<tc>, window_params = [{transform_indices = @transform_0, window_bounds = array<i64: 1, 4, 27>}, {pipeline_mode = #tpu.pipeline_mode<synchronous>, transform_indices = @transform_1, window_bounds = array<i64: 9, 108, 4>}, {pipeline_mode = #tpu.pipeline_mode<synchronous>, transform_indices = @transform_2, window_bounds = array<i64: 108, 1>}, {transform_indices = @transform_3, window_bounds = array<i64: 1, 108, 15>}]} {
    %cst = arith.constant 0.000000e+00 : f32
    %0 = vector.broadcast %cst : f32 to vector<108x15xf32>
    %c0 = arith.constant 0 : index
    %c0_0 = arith.constant 0 : index
    %c0_1 = arith.constant 0 : index
    %1 = vector.load %arg2[%c0, %c0_0, %c0_1] : memref<9x108x4xbf16, #tpu.memory_space<vmem>>, vector<1x108x4xbf16>
    %2 = vector.shape_cast %1 : vector<1x108x4xbf16> to vector<108x4xbf16>
    %c0_2 = arith.constant 0 : index
    %c0_3 = arith.constant 0 : index
    %c0_4 = arith.constant 0 : index
    %3 = vector.load %arg1[%c0_2, %c0_3, %c0_4] : memref<1x4x27xbf16, #tpu.memory_space<vmem>>, vector<1x4x15xbf16>
    %4 = vector.shape_cast %3 : vector<1x4x15xbf16> to vector<4x15xbf16>
    %cst_5 = arith.constant dense<0.000000e+00> : vector<108x15xf32>
    %5 = tpu.matmul %2, %4, %cst_5 {dimension_numbers = #tpu.dot_dimension_numbers<[1], [0], [0], [1], [0, 0, 1, 1], [], []>} : vector<108x4xbf16>, vector<4x15xbf16>, vector<108x15xf32> -> vector<108x15xf32>
    %6 = arith.addf %0, %5 : vector<108x15xf32>
    %c1 = arith.constant 1 : index
    %c0_6 = arith.constant 0 : index
    %c0_7 = arith.constant 0 : index
    %7 = vector.load %arg2[%c1, %c0_6, %c0_7] : memref<9x108x4xbf16, #tpu.memory_space<vmem>>, vector<1x108x4xbf16>
    %8 = vector.shape_cast %7 : vector<1x108x4xbf16> to vector<108x4xbf16>
    %c0_8 = arith.constant 0 : index
    %c0_9 = arith.constant 0 : index
    %c1_10 = arith.constant 1 : index
    %9 = vector.load %arg1[%c0_8, %c0_9, %c1_10] : memref<1x4x27xbf16, #tpu.memory_space<vmem>>, vector<1x4x15xbf16>
    %10 = vector.shape_cast %9 : vector<1x4x15xbf16> to vector<4x15xbf16>
    %cst_11 = arith.constant dense<0.000000e+00> : vector<108x15xf32>
    %11 = tpu.matmul %8, %10, %cst_11 {dimension_numbers = #tpu.dot_dimension_numbers<[1], [0], [0], [1], [0, 0, 1, 1], [], []>} : vector<108x4xbf16>, vector<4x15xbf16>, vector<108x15xf32> -> vector<108x15xf32>
    %12 = arith.addf %6, %11 : vector<108x15xf32>
    %c2 = arith.constant 2 : index
    %c0_12 = arith.constant 0 : index
    %c0_13 = arith.constant 0 : index
    %13 = vector.load %arg2[%c2, %c0_12, %c0_13] : memref<9x108x4xbf16, #tpu.memory_space<vmem>>, vector<1x108x4xbf16>
    %14 = vector.shape_cast %13 : vector<1x108x4xbf16> to vector<108x4xbf16>
    %c0_14 = arith.constant 0 : index
    %c0_15 = arith.constant 0 : index
    %c2_16 = arith.constant 2 : index
    %15 = vector.load %arg1[%c0_14, %c0_15, %c2_16] : memref<1x4x27xbf16, #tpu.memory_space<vmem>>, vector<1x4x15xbf16>
    %16 = vector.shape_cast %15 : vector<1x4x15xbf16> to vector<4x15xbf16>
    %cst_17 = arith.constant dense<0.000000e+00> : vector<108x15xf32>
    %17 = tpu.matmul %14, %16, %cst_17 {dimension_numbers = #tpu.dot_dimension_numbers<[1], [0], [0], [1], [0, 0, 1, 1], [], []>} : vector<108x4xbf16>, vector<4x15xbf16>, vector<108x15xf32> -> vector<108x15xf32>
    %18 = arith.addf %12, %17 : vector<108x15xf32>
    %c3 = arith.constant 3 : index
    %c0_18 = arith.constant 0 : index
    %c0_19 = arith.constant 0 : index
    %19 = vector.load %arg2[%c3, %c0_18, %c0_19] : memref<9x108x4xbf16, #tpu.memory_space<vmem>>, vector<1x108x4xbf16>
    %20 = vector.shape_cast %19 : vector<1x108x4xbf16> to vector<108x4xbf16>
    %c0_20 = arith.constant 0 : index
    %c0_21 = arith.constant 0 : index
    %c5 = arith.constant 5 : index
    %21 = vector.load %arg1[%c0_20, %c0_21, %c5] : memref<1x4x27xbf16, #tpu.memory_space<vmem>>, vector<1x4x15xbf16>
    %22 = vector.shape_cast %21 : vector<1x4x15xbf16> to vector<4x15xbf16>
    %cst_22 = arith.constant dense<0.000000e+00> : vector<108x15xf32>
    %23 = tpu.matmul %20, %22, %cst_22 {dimension_numbers = #tpu.dot_dimension_numbers<[1], [0], [0], [1], [0, 0, 1, 1], [], []>} : vector<108x4xbf16>, vector<4x15xbf16>, vector<108x15xf32> -> vector<108x15xf32>
    %24 = arith.addf %18, %23 : vector<108x15xf32>
    %c4 = arith.constant 4 : index
    %c0_23 = arith.constant 0 : index
    %c0_24 = arith.constant 0 : index
    %25 = vector.load %arg2[%c4, %c0_23, %c0_24] : memref<9x108x4xbf16, #tpu.memory_space<vmem>>, vector<1x108x4xbf16>
    %26 = vector.shape_cast %25 : vector<1x108x4xbf16> to vector<108x4xbf16>
    %c0_25 = arith.constant 0 : index
    %c0_26 = arith.constant 0 : index
    %c6 = arith.constant 6 : index
    %27 = vector.load %arg1[%c0_25, %c0_26, %c6] : memref<1x4x27xbf16, #tpu.memory_space<vmem>>, vector<1x4x15xbf16>
    %28 = vector.shape_cast %27 : vector<1x4x15xbf16> to vector<4x15xbf16>
    %cst_27 = arith.constant dense<0.000000e+00> : vector<108x15xf32>
    %29 = tpu.matmul %26, %28, %cst_27 {dimension_numbers = #tpu.dot_dimension_numbers<[1], [0], [0], [1], [0, 0, 1, 1], [], []>} : vector<108x4xbf16>, vector<4x15xbf16>, vector<108x15xf32> -> vector<108x15xf32>
    %30 = arith.addf %24, %29 : vector<108x15xf32>
    %c5_28 = arith.constant 5 : index
    %c0_29 = arith.constant 0 : index
    %c0_30 = arith.constant 0 : index
    %31 = vector.load %arg2[%c5_28, %c0_29, %c0_30] : memref<9x108x4xbf16, #tpu.memory_space<vmem>>, vector<1x108x4xbf16>
    %32 = vector.shape_cast %31 : vector<1x108x4xbf16> to vector<108x4xbf16>
    %c0_31 = arith.constant 0 : index
    %c0_32 = arith.constant 0 : index
    %c7 = arith.constant 7 : index
    %33 = vector.load %arg1[%c0_31, %c0_32, %c7] : memref<1x4x27xbf16, #tpu.memory_space<vmem>>, vector<1x4x15xbf16>
    %34 = vector.shape_cast %33 : vector<1x4x15xbf16> to vector<4x15xbf16>
    %cst_33 = arith.constant dense<0.000000e+00> : vector<108x15xf32>
    %35 = tpu.matmul %32, %34, %cst_33 {dimension_numbers = #tpu.dot_dimension_numbers<[1], [0], [0], [1], [0, 0, 1, 1], [], []>} : vector<108x4xbf16>, vector<4x15xbf16>, vector<108x15xf32> -> vector<108x15xf32>
    %36 = arith.addf %30, %35 : vector<108x15xf32>
    %c6_34 = arith.constant 6 : index
    %c0_35 = arith.constant 0 : index
    %c0_36 = arith.constant 0 : index
    %37 = vector.load %arg2[%c6_34, %c0_35, %c0_36] : memref<9x108x4xbf16, #tpu.memory_space<vmem>>, vector<1x108x4xbf16>
    %38 = vector.shape_cast %37 : vector<1x108x4xbf16> to vector<108x4xbf16>
    %c0_37 = arith.constant 0 : index
    %c0_38 = arith.constant 0 : index
    %c10 = arith.constant 10 : index
    %39 = vector.load %arg1[%c0_37, %c0_38, %c10] : memref<1x4x27xbf16, #tpu.memory_space<vmem>>, vector<1x4x15xbf16>
    %40 = vector.shape_cast %39 : vector<1x4x15xbf16> to vector<4x15xbf16>
    %cst_39 = arith.constant dense<0.000000e+00> : vector<108x15xf32>
    %41 = tpu.matmul %38, %40, %cst_39 {dimension_numbers = #tpu.dot_dimension_numbers<[1], [0], [0], [1], [0, 0, 1, 1], [], []>} : vector<108x4xbf16>, vector<4x15xbf16>, vector<108x15xf32> -> vector<108x15xf32>
    %42 = arith.addf %36, %41 : vector<108x15xf32>
    %c7_40 = arith.constant 7 : index
    %c0_41 = arith.constant 0 : index
    %c0_42 = arith.constant 0 : index
    %43 = vector.load %arg2[%c7_40, %c0_41, %c0_42] : memref<9x108x4xbf16, #tpu.memory_space<vmem>>, vector<1x108x4xbf16>
    %44 = vector.shape_cast %43 : vector<1x108x4xbf16> to vector<108x4xbf16>
    %c0_43 = arith.constant 0 : index
    %c0_44 = arith.constant 0 : index
    %c11 = arith.constant 11 : index
    %45 = vector.load %arg1[%c0_43, %c0_44, %c11] : memref<1x4x27xbf16, #tpu.memory_space<vmem>>, vector<1x4x15xbf16>
    %46 = vector.shape_cast %45 : vector<1x4x15xbf16> to vector<4x15xbf16>
    %cst_45 = arith.constant dense<0.000000e+00> : vector<108x15xf32>
    %47 = tpu.matmul %44, %46, %cst_45 {dimension_numbers = #tpu.dot_dimension_numbers<[1], [0], [0], [1], [0, 0, 1, 1], [], []>} : vector<108x4xbf16>, vector<4x15xbf16>, vector<108x15xf32> -> vector<108x15xf32>
    %48 = arith.addf %42, %47 : vector<108x15xf32>
    %c8 = arith.constant 8 : index
    %c0_46 = arith.constant 0 : index
    %c0_47 = arith.constant 0 : index
    %49 = vector.load %arg2[%c8, %c0_46, %c0_47] : memref<9x108x4xbf16, #tpu.memory_space<vmem>>, vector<1x108x4xbf16>
    %50 = vector.shape_cast %49 : vector<1x108x4xbf16> to vector<108x4xbf16>
    %c0_48 = arith.constant 0 : index
    %c0_49 = arith.constant 0 : index
    %c12 = arith.constant 12 : index
    %51 = vector.load %arg1[%c0_48, %c0_49, %c12] : memref<1x4x27xbf16, #tpu.memory_space<vmem>>, vector<1x4x15xbf16>
    %52 = vector.shape_cast %51 : vector<1x4x15xbf16> to vector<4x15xbf16>
    %cst_50 = arith.constant dense<0.000000e+00> : vector<108x15xf32>
    %53 = tpu.matmul %50, %52, %cst_50 {dimension_numbers = #tpu.dot_dimension_numbers<[1], [0], [0], [1], [0, 0, 1, 1], [], []>} : vector<108x4xbf16>, vector<4x15xbf16>, vector<108x15xf32> -> vector<108x15xf32>
    %54 = arith.addf %48, %53 : vector<108x15xf32>
    %c0_51 = arith.constant 0 : index
    %c0_52 = arith.constant 0 : index
    %55 = vector.load %arg3[%c0_51, %c0_52] : memref<108x1xf32, #tpu.memory_space<vmem>>, vector<108x1xf32>
    %56 = vector.broadcast %55 : vector<108x1xf32> to vector<108x15xf32>
    %57 = arith.addf %54, %56 : vector<108x15xf32>
    %58 = arith.truncf %57 : vector<108x15xf32> to vector<108x15xbf16>
    %c0_53 = arith.constant 0 : index
    %c0_54 = arith.constant 0 : index
    %c0_55 = arith.constant 0 : index
    %59 = vector.load %arg4[%c0_53, %c0_54, %c0_55] : memref<1x108x15xbf16, #tpu.memory_space<vmem>>, vector<1x108x15xbf16>
    %60 = vector.shape_cast %59 : vector<1x108x15xbf16> to vector<108x15xbf16>
    %61 = vector.shape_cast %58 : vector<108x15xbf16> to vector<1x108x15xbf16>
    tpu.vector_store %arg4[%c0_53, %c0_54, %c0_55], %61 {strides = array<i32>} : memref<1x108x15xbf16, #tpu.memory_space<vmem>>, vector<1x108x15xbf16>,
    return
  }
  func.func @transform_0(%arg0: i32) -> (i32, i32, i32) {
    %c0_i32 = arith.constant 0 : i32
    %c0_i32_0 = arith.constant 0 : i32
    %c0_i32_1 = arith.constant 0 : i32
    return %arg0, %c0_i32, %c0_i32_0 : i32, i32, i32
  }
  func.func @transform_1(%arg0: i32) -> (i32, i32, i32) {
    %c0_i32 = arith.constant 0 : i32
    %c0_i32_0 = arith.constant 0 : i32
    %c0_i32_1 = arith.constant 0 : i32
    %c0_i32_2 = arith.constant 0 : i32
    return %c0_i32, %c0_i32_0, %c0_i32_1 : i32, i32, i32
  }
  func.func @transform_2(%arg0: i32) -> (i32, i32) {
    %c0_i32 = arith.constant 0 : i32
    %c0_i32_0 = arith.constant 0 : i32
    %c0_i32_1 = arith.constant 0 : i32
    return %c0_i32, %c0_i32_0 : i32, i32
  }
  func.func @transform_3(%arg0: i32) -> (i32, i32, i32) {
    %c0_i32 = arith.constant 0 : i32
    %c0_i32_0 = arith.constant 0 : i32
    %c0_i32_1 = arith.constant 0 : i32
    return %arg0, %c0_i32, %c0_i32_0 : i32, i32, i32
  }
}

module attributes {stable_mosaic.version = 11 : i64} {
  func.func @_dcn_reduce_kernel(%arg0: i32, %arg1: memref<1x36x9xf32, #tpu.memory_space<vmem>>, %arg2: memref<1x36x9xf32, #tpu.memory_space<vmem>>, %arg3: memref<4x36xf32, #tpu.memory_space<vmem>>, %arg4: memref<4x1xf32, #tpu.memory_space<vmem>>, %arg5: memref<1x4x9xf32, #tpu.memory_space<vmem>>) attributes {dimension_semantics = [#tpu.dimension_semantics<parallel>], iteration_bounds = array<i64: 2>, scalar_prefetch = 0 : i64, scratch_operands = 0 : i64, tpu.core_type = #tpu.core_type<tc>, window_params = [{transform_indices = @transform_0, window_bounds = array<i64: 1, 36, 9>}, {transform_indices = @transform_1, window_bounds = array<i64: 1, 36, 9>}, {pipeline_mode = #tpu.pipeline_mode<synchronous>, transform_indices = @transform_2, window_bounds = array<i64: 4, 36>}, {pipeline_mode = #tpu.pipeline_mode<synchronous>, transform_indices = @transform_3, window_bounds = array<i64: 4, 1>}, {transform_indices = @transform_4, window_bounds = array<i64: 1, 4, 9>}]} {
    %c0 = arith.constant 0 : index
    %c0_0 = arith.constant 0 : index
    %c0_1 = arith.constant 0 : index
    %0 = vector.load %arg1[%c0, %c0_0, %c0_1] : memref<1x36x9xf32, #tpu.memory_space<vmem>>, vector<1x36x9xf32>
    %1 = vector.shape_cast %0 : vector<1x36x9xf32> to vector<36x9xf32>
    %c0_2 = arith.constant 0 : index
    %c0_3 = arith.constant 0 : index
    %c0_4 = arith.constant 0 : index
    %2 = vector.load %arg2[%c0_2, %c0_3, %c0_4] : memref<1x36x9xf32, #tpu.memory_space<vmem>>, vector<1x36x9xf32>
    %3 = vector.shape_cast %2 : vector<1x36x9xf32> to vector<36x9xf32>
    %4 = arith.mulf %1, %3 : vector<36x9xf32>
    %c0_5 = arith.constant 0 : index
    %c0_6 = arith.constant 0 : index
    %5 = vector.load %arg3[%c0_5, %c0_6] : memref<4x36xf32, #tpu.memory_space<vmem>>, vector<4x36xf32>
    %cst = arith.constant dense<0.000000e+00> : vector<4x9xf32>
    %6 = tpu.matmul %5, %4, %cst {dimension_numbers = #tpu.dot_dimension_numbers<[1], [0], [0], [1], [0, 0, 1, 1], [], []>} : vector<4x36xf32>, vector<36x9xf32>, vector<4x9xf32> -> vector<4x9xf32>
    %c0_7 = arith.constant 0 : index
    %c0_8 = arith.constant 0 : index
    %7 = vector.load %arg4[%c0_7, %c0_8] : memref<4x1xf32, #tpu.memory_space<vmem>>, vector<4x1xf32>
    %8 = vector.broadcast %7 : vector<4x1xf32> to vector<4x9xf32>
    %9 = arith.addf %6, %8 : vector<4x9xf32>
    %cst_9 = arith.constant 0.000000e+00 : f32
    %10 = vector.broadcast %cst_9 : f32 to vector<4x9xf32>
    %11 = arith.maximumf %9, %10 : vector<4x9xf32>
    %c0_10 = arith.constant 0 : index
    %c0_11 = arith.constant 0 : index
    %c0_12 = arith.constant 0 : index
    %12 = vector.load %arg5[%c0_10, %c0_11, %c0_12] : memref<1x4x9xf32, #tpu.memory_space<vmem>>, vector<1x4x9xf32>
    %13 = vector.shape_cast %12 : vector<1x4x9xf32> to vector<4x9xf32>
    %14 = vector.shape_cast %11 : vector<4x9xf32> to vector<1x4x9xf32>
    tpu.vector_store %arg5[%c0_10, %c0_11, %c0_12], %14 {strides = array<i32>} : memref<1x4x9xf32, #tpu.memory_space<vmem>>, vector<1x4x9xf32>,
    return
  }
  func.func @transform_0(%arg0: i32) -> (i32, i32, i32) {
    %c0_i32 = arith.constant 0 : i32
    %c0_i32_0 = arith.constant 0 : i32
    %c0_i32_1 = arith.constant 0 : i32
    return %arg0, %c0_i32, %c0_i32_0 : i32, i32, i32
  }
  func.func @transform_1(%arg0: i32) -> (i32, i32, i32) {
    %c0_i32 = arith.constant 0 : i32
    %c0_i32_0 = arith.constant 0 : i32
    %c0_i32_1 = arith.constant 0 : i32
    return %arg0, %c0_i32, %c0_i32_0 : i32, i32, i32
  }
  func.func @transform_2(%arg0: i32) -> (i32, i32) {
    %c0_i32 = arith.constant 0 : i32
    %c0_i32_0 = arith.constant 0 : i32
    %c0_i32_1 = arith.constant 0 : i32
    return %c0_i32, %c0_i32_0 : i32, i32
  }
  func.func @transform_3(%arg0: i32) -> (i32, i32) {
    %c0_i32 = arith.constant 0 : i32
    %c0_i32_0 = arith.constant 0 : i32
    %c0_i32_1 = arith.constant 0 : i32
    return %c0_i32, %c0_i32_0 : i32, i32
  }
  func.func @transform_4(%arg0: i32) -> (i32, i32, i32) {
    %c0_i32 = arith.constant 0 : i32
    %c0_i32_0 = arith.constant 0 : i32
    %c0_i32_1 = arith.constant 0 : i32
    return %arg0, %c0_i32, %c0_i32_0 : i32, i32, i32
  }
}

module attributes {stable_mosaic.version = 11 : i64} {
  func.func @_gemm_kernel(%arg0: i32, %arg1: i32, %arg2: memref<1x4x1024xbf16, #tpu.memory_space<vmem>>, %arg3: memref<4x4xbf16, #tpu.memory_space<vmem>>, %arg4: memref<4x1xf32, #tpu.memory_space<vmem>>, %arg5: memref<1x4x1024xbf16, #tpu.memory_space<vmem>>) attributes {dimension_semantics = [#tpu.dimension_semantics<parallel>, #tpu.dimension_semantics<parallel>], iteration_bounds = array<i64: 2, 1>, scalar_prefetch = 0 : i64, scratch_operands = 0 : i64, tpu.core_type = #tpu.core_type<tc>, window_params = [{transform_indices = @transform_0, window_bounds = array<i64: 1, 4, 1024>}, {pipeline_mode = #tpu.pipeline_mode<synchronous>, transform_indices = @transform_1, window_bounds = array<i64: 4, 4>}, {pipeline_mode = #tpu.pipeline_mode<synchronous>, transform_indices = @transform_2, window_bounds = array<i64: 4, 1>}, {transform_indices = @transform_3, window_bounds = array<i64: 1, 4, 1024>}]} {
    %c0 = arith.constant 0 : index
    %c0_0 = arith.constant 0 : index
    %0 = vector.load %arg3[%c0, %c0_0] : memref<4x4xbf16, #tpu.memory_space<vmem>>, vector<4x4xbf16>
    %c0_1 = arith.constant 0 : index
    %c0_2 = arith.constant 0 : index
    %c0_3 = arith.constant 0 : index
    %1 = vector.load %arg2[%c0_1, %c0_2, %c0_3] : memref<1x4x1024xbf16, #tpu.memory_space<vmem>>, vector<1x4x1024xbf16>
    %2 = vector.shape_cast %1 : vector<1x4x1024xbf16> to vector<4x1024xbf16>
    %cst = arith.constant dense<0.000000e+00> : vector<4x1024xf32>
    %3 = tpu.matmul %0, %2, %cst {dimension_numbers = #tpu.dot_dimension_numbers<[1], [0], [0], [1], [0, 0, 1, 1], [], []>} : vector<4x4xbf16>, vector<4x1024xbf16>, vector<4x1024xf32> -> vector<4x1024xf32>
    %c0_4 = arith.constant 0 : index
    %c0_5 = arith.constant 0 : index
    %4 = vector.load %arg4[%c0_4, %c0_5] : memref<4x1xf32, #tpu.memory_space<vmem>>, vector<4x1xf32>
    %5 = vector.broadcast %4 : vector<4x1xf32> to vector<4x1024xf32>
    %6 = arith.addf %3, %5 : vector<4x1024xf32>
    %7 = arith.truncf %6 : vector<4x1024xf32> to vector<4x1024xbf16>
    %c0_6 = arith.constant 0 : index
    %c0_7 = arith.constant 0 : index
    %c0_8 = arith.constant 0 : index
    %8 = vector.load %arg5[%c0_6, %c0_7, %c0_8] : memref<1x4x1024xbf16, #tpu.memory_space<vmem>>, vector<1x4x1024xbf16>
    %9 = vector.shape_cast %8 : vector<1x4x1024xbf16> to vector<4x1024xbf16>
    %10 = vector.shape_cast %7 : vector<4x1024xbf16> to vector<1x4x1024xbf16>
    tpu.vector_store %arg5[%c0_6, %c0_7, %c0_8], %10 {strides = array<i32>} : memref<1x4x1024xbf16, #tpu.memory_space<vmem>>, vector<1x4x1024xbf16>,
    return
  }
  func.func @transform_0(%arg0: i32, %arg1: i32) -> (i32, i32, i32) {
    %c0_i32 = arith.constant 0 : i32
    %c0_i32_0 = arith.constant 0 : i32
    return %arg0, %c0_i32, %arg1 : i32, i32, i32
  }
  func.func @transform_1(%arg0: i32, %arg1: i32) -> (i32, i32) {
    %c0_i32 = arith.constant 0 : i32
    %c0_i32_0 = arith.constant 0 : i32
    %c0_i32_1 = arith.constant 0 : i32
    return %c0_i32, %c0_i32_0 : i32, i32
  }
  func.func @transform_2(%arg0: i32, %arg1: i32) -> (i32, i32) {
    %c0_i32 = arith.constant 0 : i32
    %c0_i32_0 = arith.constant 0 : i32
    %c0_i32_1 = arith.constant 0 : i32
    return %c0_i32, %c0_i32_0 : i32, i32
  }
  func.func @transform_3(%arg0: i32, %arg1: i32) -> (i32, i32, i32) {
    %c0_i32 = arith.constant 0 : i32
    %c0_i32_0 = arith.constant 0 : i32
    return %arg0, %c0_i32, %arg1 : i32, i32, i32
  }
}

module attributes {stable_mosaic.version = 11 : i64} {
  func.func @_gemm_kernel(%arg0: i32, %arg1: i32, %arg2: memref<1x4x1024xbf16, #tpu.memory_space<vmem>>, %arg3: memref<16x4xbf16, #tpu.memory_space<vmem>>, %arg4: memref<16x1xf32, #tpu.memory_space<vmem>>, %arg5: memref<1x16x1024xbf16, #tpu.memory_space<vmem>>) attributes {dimension_semantics = [#tpu.dimension_semantics<parallel>, #tpu.dimension_semantics<parallel>], iteration_bounds = array<i64: 2, 1>, scalar_prefetch = 0 : i64, scratch_operands = 0 : i64, tpu.core_type = #tpu.core_type<tc>, window_params = [{transform_indices = @transform_0, window_bounds = array<i64: 1, 4, 1024>}, {pipeline_mode = #tpu.pipeline_mode<synchronous>, transform_indices = @transform_1, window_bounds = array<i64: 16, 4>}, {pipeline_mode = #tpu.pipeline_mode<synchronous>, transform_indices = @transform_2, window_bounds = array<i64: 16, 1>}, {transform_indices = @transform_3, window_bounds = array<i64: 1, 16, 1024>}]} {
    %c0 = arith.constant 0 : index
    %c0_0 = arith.constant 0 : index
    %0 = vector.load %arg3[%c0, %c0_0] : memref<16x4xbf16, #tpu.memory_space<vmem>>, vector<16x4xbf16>
    %c0_1 = arith.constant 0 : index
    %c0_2 = arith.constant 0 : index
    %c0_3 = arith.constant 0 : index
    %1 = vector.load %arg2[%c0_1, %c0_2, %c0_3] : memref<1x4x1024xbf16, #tpu.memory_space<vmem>>, vector<1x4x1024xbf16>
    %2 = vector.shape_cast %1 : vector<1x4x1024xbf16> to vector<4x1024xbf16>
    %cst = arith.constant dense<0.000000e+00> : vector<16x1024xf32>
    %3 = tpu.matmul %0, %2, %cst {dimension_numbers = #tpu.dot_dimension_numbers<[1], [0], [0], [1], [0, 0, 1, 1], [], []>} : vector<16x4xbf16>, vector<4x1024xbf16>, vector<16x1024xf32> -> vector<16x1024xf32>
    %c0_4 = arith.constant 0 : index
    %c0_5 = arith.constant 0 : index
    %4 = vector.load %arg4[%c0_4, %c0_5] : memref<16x1xf32, #tpu.memory_space<vmem>>, vector<16x1xf32>
    %5 = vector.broadcast %4 : vector<16x1xf32> to vector<16x1024xf32>
    %6 = arith.addf %3, %5 : vector<16x1024xf32>
    %7 = arith.truncf %6 : vector<16x1024xf32> to vector<16x1024xbf16>
    %c0_6 = arith.constant 0 : index
    %c0_7 = arith.constant 0 : index
    %c0_8 = arith.constant 0 : index
    %8 = vector.load %arg5[%c0_6, %c0_7, %c0_8] : memref<1x16x1024xbf16, #tpu.memory_space<vmem>>, vector<1x16x1024xbf16>
    %9 = vector.shape_cast %8 : vector<1x16x1024xbf16> to vector<16x1024xbf16>
    %10 = vector.shape_cast %7 : vector<16x1024xbf16> to vector<1x16x1024xbf16>
    tpu.vector_store %arg5[%c0_6, %c0_7, %c0_8], %10 {strides = array<i32>} : memref<1x16x1024xbf16, #tpu.memory_space<vmem>>, vector<1x16x1024xbf16>,
    return
  }
  func.func @transform_0(%arg0: i32, %arg1: i32) -> (i32, i32, i32) {
    %c0_i32 = arith.constant 0 : i32
    %c0_i32_0 = arith.constant 0 : i32
    return %arg0, %c0_i32, %arg1 : i32, i32, i32
  }
  func.func @transform_1(%arg0: i32, %arg1: i32) -> (i32, i32) {
    %c0_i32 = arith.constant 0 : i32
    %c0_i32_0 = arith.constant 0 : i32
    %c0_i32_1 = arith.constant 0 : i32
    return %c0_i32, %c0_i32_0 : i32, i32
  }
  func.func @transform_2(%arg0: i32, %arg1: i32) -> (i32, i32) {
    %c0_i32 = arith.constant 0 : i32
    %c0_i32_0 = arith.constant 0 : i32
    %c0_i32_1 = arith.constant 0 : i32
    return %c0_i32, %c0_i32_0 : i32, i32
  }
  func.func @transform_3(%arg0: i32, %arg1: i32) -> (i32, i32, i32) {
    %c0_i32 = arith.constant 0 : i32
    %c0_i32_0 = arith.constant 0 : i32
    return %arg0, %c0_i32, %arg1 : i32, i32, i32
  }
}

module attributes {stable_mosaic.version = 11 : i64} {
  func.func @_fuse_kernel(%arg0: i32, %arg1: i32, %arg2: memref<1x16x1024xf32, #tpu.memory_space<vmem>>, %arg3: memref<1x16x1024xbf16, #tpu.memory_space<vmem>>, %arg4: memref<1x16x1xf32, #tpu.memory_space<vmem>>, %arg5: memref<1x16x1024xf32, #tpu.memory_space<vmem>>) attributes {dimension_semantics = [#tpu.dimension_semantics<parallel>, #tpu.dimension_semantics<parallel>], iteration_bounds = array<i64: 2, 1>, scalar_prefetch = 0 : i64, scratch_operands = 0 : i64, tpu.core_type = #tpu.core_type<tc>, window_params = [{transform_indices = @transform_0, window_bounds = array<i64: 1, 16, 1024>}, {transform_indices = @transform_1, window_bounds = array<i64: 1, 16, 1024>}, {transform_indices = @transform_2, window_bounds = array<i64: 1, 16, 1>}, {transform_indices = @transform_3, window_bounds = array<i64: 1, 16, 1024>}]} {
    %c0 = arith.constant 0 : index
    %c0_0 = arith.constant 0 : index
    %c0_1 = arith.constant 0 : index
    %0 = vector.load %arg3[%c0, %c0_0, %c0_1] : memref<1x16x1024xbf16, #tpu.memory_space<vmem>>, vector<1x16x1024xbf16>
    %1 = vector.shape_cast %0 : vector<1x16x1024xbf16> to vector<16x1024xbf16>
    %2 = arith.extf %1 : vector<16x1024xbf16> to vector<16x1024xf32>
    %3 = arith.negf %2 : vector<16x1024xf32>
    %4 = math.exp %3 : vector<16x1024xf32>
    %cst = arith.constant 1.000000e+00 : f32
    %5 = vector.broadcast %cst : f32 to vector<16x1024xf32>
    %6 = arith.addf %5, %4 : vector<16x1024xf32>
    %7 = arith.divf %5, %6 : vector<16x1024xf32>
    %c0_2 = arith.constant 0 : index
    %c0_3 = arith.constant 0 : index
    %c0_4 = arith.constant 0 : index
    %8 = vector.load %arg2[%c0_2, %c0_3, %c0_4] : memref<1x16x1024xf32, #tpu.memory_space<vmem>>, vector<1x16x1024xf32>
    %9 = vector.shape_cast %8 : vector<1x16x1024xf32> to vector<16x1024xf32>
    %10 = arith.mulf %9, %7 : vector<16x1024xf32>
    %c0_5 = arith.constant 0 : index
    %c0_6 = arith.constant 0 : index
    %c0_7 = arith.constant 0 : index
    %11 = vector.load %arg4[%c0_5, %c0_6, %c0_7] : memref<1x16x1xf32, #tpu.memory_space<vmem>>, vector<1x16x1xf32>
    %12 = vector.shape_cast %11 : vector<1x16x1xf32> to vector<16x1xf32>
    %13 = vector.broadcast %12 : vector<16x1xf32> to vector<16x1024xf32>
    %14 = arith.mulf %10, %13 : vector<16x1024xf32>
    %c0_8 = arith.constant 0 : index
    %c0_9 = arith.constant 0 : index
    %c0_10 = arith.constant 0 : index
    %15 = vector.load %arg5[%c0_8, %c0_9, %c0_10] : memref<1x16x1024xf32, #tpu.memory_space<vmem>>, vector<1x16x1024xf32>
    %16 = vector.shape_cast %15 : vector<1x16x1024xf32> to vector<16x1024xf32>
    %17 = vector.shape_cast %14 : vector<16x1024xf32> to vector<1x16x1024xf32>
    tpu.vector_store %arg5[%c0_8, %c0_9, %c0_10], %17 {strides = array<i32>} : memref<1x16x1024xf32, #tpu.memory_space<vmem>>, vector<1x16x1024xf32>,
    return
  }
  func.func @transform_0(%arg0: i32, %arg1: i32) -> (i32, i32, i32) {
    %c0_i32 = arith.constant 0 : i32
    %c0_i32_0 = arith.constant 0 : i32
    return %arg0, %c0_i32, %arg1 : i32, i32, i32
  }
  func.func @transform_1(%arg0: i32, %arg1: i32) -> (i32, i32, i32) {
    %c0_i32 = arith.constant 0 : i32
    %c0_i32_0 = arith.constant 0 : i32
    return %arg0, %c0_i32, %arg1 : i32, i32, i32
  }
  func.func @transform_2(%arg0: i32, %arg1: i32) -> (i32, i32, i32) {
    %c0_i32 = arith.constant 0 : i32
    %c0_i32_0 = arith.constant 0 : i32
    %c0_i32_1 = arith.constant 0 : i32
    return %arg0, %c0_i32, %c0_i32_0 : i32, i32, i32
  }
  func.func @transform_3(%arg0: i32, %arg1: i32) -> (i32, i32, i32) {
    %c0_i32 = arith.constant 0 : i32
    %c0_i32_0 = arith.constant 0 : i32
    return %arg0, %c0_i32, %arg1 : i32, i32, i32
  }
}

</mosaic_0001>

<bundles_post_ra>
// kernel: dsta_forward.12
= control target key start
LH: loop header
LB: loop body
LE: loop exit
PB: predicated region body
PF: predicated region fallthrough
CT: control target
= control target key end

     0   :  { %s677_s12 = smov 0   ;;  %s679_s13 = smov 0   ;;  %s720_s0 = inlined_call_operand.vmem [shape: bf16[2,16,1024], index: 0, kind: input, shape index: {}]   ;;  %s721_s1 = inlined_call_operand.vmem [shape: bf16[4,16], index: 1, kind: input, shape index: {}]   ;;  %s722_s2 = inlined_call_operand.vmem [shape: f32[4,1], index: 2, kind: input, shape index: {}]   ;;  %s723_s3 = inlined_call_operand.vmem [shape: bf16[2,4,1024], index: 3, kind: output, shape index: {}]  }
   0x1   :  { %s681_s14 = smov 0  }
   0x2 LB: > { %s25_s15 = sadd.s32 1, %s649_s13  ;;  %p579_p0 = scmp.ge.s32.totalorder %s653_s14, 1  ;;  %s653_s14 = sphi %s681_s14, %s13_s14   ;;  %s649_s13 = sphi %s679_s13, %s725_s13   ;;  %s645_s12 = sphi %s677_s12, %s724_s12  }
   0x3   : > { %p27_p1 = scmp.ge.s32.totalorder %s25_s15, 2  ;;  %p158_p2 = scmp.lt.s32.totalorder %s653_s14, 3 }
   0x5   : > { %s727_s15 = smov (%p27_p1, %s25_s15), 0  ;;  %p159_p3 = pnand %p579_p0, %p158_p2 }
   0x6   : > { %p191_p4 = scmp.lt.s32.totalorder (!%p159_p3), %s645_s12, 1 }
   0x7   : > { %162 = sbr.rel (%p159_p3) target bundleno = 235 (0xeb), region = 32 }
   0xc   : > { %v655_v0 = vmov 0   ;;  %v220_v1 = vld [vmem:[%s722_s2] sm:$0xf]  ;;  %s729_s12 = smov (!%p191_p4, %s645_s12), 1  ;;  %vm266_vm0 = vcmask 130048   ;;  %v455_v21 = vlaneseq }
   0xd   : > { %302 = vmatprep.mubr.bf16.mxu0 %v655_v0  ;;  %343 = vmatprep.mubr.bf16.mxu1 %v655_v0  ;;  %s602_s18 = sshll.u32 %s729_s12, 6  ;;  %v211_v16 = vld [vmem:[%s721_s1] sm:$0x3]  ;;  %v656_v19 = vmov 1983009808   ;;  %s603_s24 = sshll.u32 %s729_s12, 4 }
   0xe   : > { %630 = vset.pattern.permute.xlu0 %v655_v0  ;;  %s198_s21 = scalar_lea.vmem %s720_s0, %s602_s18  ;;  %v453_v20 = vunpack.c.l.s4 %v656_v19  ;;  %v456_v23 = vshrl.u32 %v455_v21, 7  ;;  %s208_s27 = scalar_lea.vmem %s723_s3, %s603_s24 }
   0xf   : > { %223 = vperm.xlu0 %630, %v220_v1   ;;  %v212_v2 = vld [vmem:[%s198_s21] sm:$0xff]  ;;  %v213_v4 = vld [vmem:[%s198_s21 + $0x8] sm:$0xff]  ;;  %v214_v8 = vld [vmem:[%s198_s21 + $0x10] sm:$0xff] }
  0x10   : > { %v216_v3 = vld [vmem:[%s198_s21 + $0x20] sm:$0xff]  ;;  %v217_v6 = vld [vmem:[%s198_s21 + $0x28] sm:$0xff]  ;;  %v218_v9 = vld [vmem:[%s198_s21 + $0x30] sm:$0xff]  ;;  %v454_v22 = vunpack.c.0.s8 %v453_v20 }
  0x11   : > { %v585_v5 = vcombine.high %v212_v2, %v216_v3  ;;  %v584_v7 = vcombine.low %v212_v2, %v216_v3  ;;  %v587_v10 = vcombine.high %v213_v4, %v217_v6  ;;  %v586_v11 = vcombine.low %v213_v4, %v217_v6  ;;  %v215_v13 = vld [vmem:[%s198_s21 + $0x18] sm:$0xff] }
  0x12   : > { %v589_v12 = vcombine.high %v214_v8, %v218_v9  ;;  %v219_v14 = vld [vmem:[%s198_s21 + $0x38] sm:$0xff]  ;;  %v588_v17 = vcombine.low %v214_v8, %v218_v9  ;;  %v457_v30 = vsub.s32 %v454_v22, %v456_v23 }
  0x13   : > { %284 = vmatprep.subr.bf16.mxu0 %v585_v5  ;;  %v591_v15 = vcombine.high %v215_v13, %v219_v14  ;;  %325 = vmatprep.subr.bf16.mxu1 %v587_v10  ;;  %v590_v18 = vcombine.low %v215_v13, %v219_v14 }
  0x14   : > { %285 = vmatpush1.bf16.msra.mxu0 %v584_v7  ;;  %326 = vmatpush1.bf16.msra.mxu1 %v586_v11 }
  0x15   : > { %366 = vmatprep.subr.bf16.mxu0 %v589_v12  ;;  %407 = vmatprep.subr.bf16.mxu1 %v591_v15 }
  0x17   : > { %592 = vmatmul.mubr.msk.bf16.vlgmr.msra.gmra.mxu0 %vm266_vm0, %v211_v16  ;;  %593 = vmatmul.mubr.msk.bf16.vlgmr.msra.gmra.mxu1 %vm266_vm0, %v211_v16 }
  0x18   : > { %367 = vmatpush1.bf16.msra.mxu0 %v588_v17  ;;  %408 = vmatpush1.bf16.msra.mxu1 %v590_v18 }
  0x19   : > { %384 = vmatprep.mubr.bf16.mxu0 %v655_v0  ;;  %425 = vmatprep.mubr.bf16.mxu1 %v655_v0 }
  0x1f   : > { %594 = vmatmul.mubr.msk.bf16.vlgmr.msra.gmra.mxu0 %vm266_vm0, %v211_v16  ;;  %595 = vmatmul.mubr.msk.bf16.vlgmr.msra.gmra.mxu1 %vm266_vm0, %v211_v16 }
  0x8a   : > { %v224_v25 = vpop.permute.xlu0 %223 }
  0xd7   : > { %v304_v24 = vpop.f32.mrf.mxu0  ;;  %v345_v26 = vpop.f32.mrf.mxu1 }
  0xd8   : > { %v305_v28 = vadd.f32 %v304_v24, %v224_v25  ;;  %v346_v32 = vadd.f32 %v345_v26, %v224_v25 }
  0xd9   : > { %v306_v27 = vpop.f32.mrf.mxu0  ;;  %v347_v31 = vpop.f32.mrf.mxu1 }
  0xda   : > { %v307_v29 = vadd.f32 %v306_v27, %v224_v25  ;;  %v348_v33 = vadd.f32 %v347_v31, %v224_v25 }
  0xdb   : > { %v308_v34 = vpop.f32.mrf.mxu0  ;;  %v349_v36 = vpop.f32.mrf.mxu1 }
  0xdc   : > { %v596_v35 = vpack.c.bf16 %v307_v29, %v305_v28  ;;  %v597_v37 = vpack.c.bf16 %v348_v33, %v346_v32 }
  0xdd   : > { %v309_v38 = vpop.f32.mrf.mxu0  ;;  %v350_v40 = vpop.f32.mrf.mxu1 }
  0xde   : > { %v458_v39 = vrot.slane %v596_v35, %v457_v30  ;;  %v465_v41 = vrot.slane %v597_v37, %v457_v30 }
  0xdf   : > { %v386_v42 = vpop.f32.mrf.mxu0  ;;  %v427_v43 = vpop.f32.mrf.mxu1 }
  0xe0   : > { %v466_v44 = vcombine.low %v458_v39, %v465_v41  ;;  %v387_v46 = vadd.f32 %v386_v42, %v224_v25  ;;  %v428_v49 = vadd.f32 %v427_v43, %v224_v25 }
  0xe1   : > { %v388_v45 = vpop.f32.mrf.mxu0  ;;  %v429_v48 = vpop.f32.mrf.mxu1 }
  0xe2   : > { %v389_v47 = vadd.f32 %v388_v45, %v224_v25  ;;  %486 = vst [vmem:[%s208_s27] sm:$0xff] %v466_v44  ;;  %v430_v50 = vadd.f32 %v429_v48, %v224_v25 }
  0xe3   : > { %v390_v51 = vpop.f32.mrf.mxu0  ;;  %v431_v53 = vpop.f32.mrf.mxu1 }
  0xe4   : > { %v598_v52 = vpack.c.bf16 %v389_v47, %v387_v46  ;;  %v599_v54 = vpack.c.bf16 %v430_v50, %v428_v49 }
  0xe5   : > { %v391_v55 = vpop.f32.mrf.mxu0  ;;  %v432_v57 = vpop.f32.mrf.mxu1 }
  0xe6   : > { %v475_v56 = vrot.slane %v598_v52, %v457_v30  ;;  %v482_v58 = vrot.slane %v599_v54, %v457_v30 }
  0xe8   : > { %v483_v59 = vcombine.low %v475_v56, %v482_v58 }
  0xea   : > { %487 = vst [vmem:[%s208_s27 + $0x8] sm:$0xff] %v483_v59 }
  0xeb PF: > { %s13_s14 = sadd.s32 1, %s653_s14   ;;  %s724_s12 = smov %s649_s13 }
  0xec   : > { %p10_p5 = scmp.ge.s32.totalorder %s13_s14, 4   ;;  %s725_s13 = smov %s727_s15 }
  0xee   :  { %12 = sbr.rel (!%p10_p5) target bundleno = 2 (0x2), region = 62 }

// kernel: dsta_forward.13
= control target key start
LH: loop header
LB: loop body
LE: loop exit
PB: predicated region body
PF: predicated region fallthrough
CT: control target
= control target key end

     0   :  { %s505_s12 = smov 0   ;;  %s507_s13 = smov 0   ;;  %s551_s0 = inlined_call_operand.vmem [shape: bf16[2,36,225], index: 0, kind: input, shape index: {}]   ;;  %s552_s1 = inlined_call_operand.vmem [shape: bf16[4,36], index: 1, kind: input, shape index: {}]   ;;  %s553_s2 = inlined_call_operand.vmem [shape: f32[4,1], index: 2, kind: input, shape index: {}]   ;;  %s554_s3 = inlined_call_operand.vmem [shape: bf16[2,4,225], index: 3, kind: output, shape index: {}]  }
   0x1   :  { %s509_s14 = smov 0  }
   0x2 LB: > { %s25_s15 = sadd.s32 1, %s477_s13  ;;  %p407_p0 = scmp.ge.s32.totalorder %s481_s14, 1  ;;  %s481_s14 = sphi %s509_s14, %s13_s14   ;;  %s477_s13 = sphi %s507_s13, %s556_s13   ;;  %s473_s12 = sphi %s505_s12, %s555_s12  }
   0x3   : > { %p27_p1 = scmp.ge.s32.totalorder %s25_s15, 2  ;;  %p158_p2 = scmp.lt.s32.totalorder %s481_s14, 3 }
   0x5   : > { %s558_s15 = smov (%p27_p1, %s25_s15), 0  ;;  %p159_p3 = pnand %p407_p0, %p158_p2 }
   0x6   : > { %p191_p4 = scmp.lt.s32.totalorder (!%p159_p3), %s473_s12, 1 }
   0x7   : > { %162 = sbr.rel (%p159_p3) target bundleno = 233 (0xe9), region = 32 }
   0xc   : > { %v483_v0 = vmov 0   ;;  %v217_v1 = vld [vmem:[%s553_s2] sm:$0xf]  ;;  %s560_s12 = smov (!%p191_p4, %s473_s12), 1  ;;  %vm252_vm0 = vcmask 1041408   ;;  %vm248_vm1 = vcmask 293888   ;;  %v308_v13 = vlaneseq }
   0xd   : > { %291 = vmatprep.mubr.bf16.mxu0 %v483_v0  ;;  %450 = vset.pattern.permute.xlu0 %v483_v0  ;;  %s423_s18 = smul.u32 40, %s560_s12  ;;  %v211_v10 = vld [vmem:[%s552_s1] sm:$0x3]  ;;  %v484_v11 = vmov 1983009808   ;;  %vm313_vm2 = vcmask 789506  }
   0xe   : > { %220 = vperm.xlu0 %450, %v217_v1   ;;  %v306_v12 = vunpack.c.l.s4 %v484_v11  ;;  %v309_v15 = vshrl.u32 %v308_v13, 7  ;;  %s422_s24 = sshll.u32 %s560_s12, 2  ;;  %vm314_vm3 = vmor %vm313_vm2, %vm252_vm0 }
   0xf   : > { %s198_s21 = scalar_lea.vmem %s551_s0, %s423_s18  ;;  %s208_s27 = scalar_lea.vmem %s554_s3, %s422_s24 }
  0x10   : > { %v216_v2 = vld [vmem:[%s198_s21 + $0x20] sm:$0x33]  ;;  %v453_v5 = vld [vmem:[%s198_s21 + $0x14] ss:$8 sps:$4 sm:$0xff]   ;;  %v455_v7 = vld [vmem:[%s198_s21 + $0x10] ss:$8 sps:$4 sm:$0xff]   ;;  %v307_v14 = vunpack.c.0.s8 %v306_v12 }
  0x11   : > { %v416_v3 = vcombine.high %v216_v2, %v216_v2  ;;  %v415_v4 = vcombine.low %v216_v2, %v216_v2  ;;  %v456_v8 = vld [vmem:[%s198_s21 + $0x4] ss:$8 sps:$4 sm:$0xff]   ;;  %v458_v9 = vld [vmem:[%s198_s21] ss:$8 sps:$4 sm:$0xff]  }
  0x12   : > { %v310_v21 = vsub.s32 %v307_v14, %v309_v15 }
  0x13   : > { %417 = vmatprep.subr.msk.bf16.mxu0 %vm252_vm0, %v416_v3  ;;  %v254_v6 = vsel %vm252_vm0, %v415_v4, 0 }
  0x14   : > { %270 = vmatpush1.bf16.msra.mxu0 %v254_v6 }
  0x15   : > { %271 = vmatprep.subr.bf16.mxu0 %v453_v5 }
  0x18   : > { %272 = vmatpush1.bf16.msra.mxu0 %v455_v7 }
  0x19   : > { %273 = vmatprep.subr.bf16.mxu0 %v456_v8 }
  0x1c   : > { %274 = vmatpush1.bf16.msra.mxu0 %v458_v9 }
  0x1f   : > { %418 = vmatmul.mubr.msk.bf16.vlgmr.msra.gmra.mxu0 %vm248_vm1, %v211_v10 }
  0x89   : > { %v221_v16 = vpop.permute.xlu0 %220 }
  0xdf   : > { %v293_v17 = vpop.f32.mrf.mxu0 }
  0xe0   : > { %v294_v19 = vadd.f32 %v293_v17, %v221_v16 }
  0xe1   : > { %v295_v18 = vpop.f32.mrf.mxu0 }
  0xe2   : > { %v296_v20 = vadd.f32 %v295_v18, %v221_v16 }
  0xe3   : > { %v297_v22 = vpop.f32.mrf.mxu0 }
  0xe4   : > { %v419_v23 = vpack.c.bf16 %v296_v20, %v294_v19 }
  0xe5   : > { %v298_v24 = vpop.f32.mrf.mxu0 }
  0xe6   : > { %v311_v25 = vrot.slane %v419_v23, %v310_v21 }
  0xe8   : > { %315 = vst.msk [vmem:[%s208_s27] sm:$0xf] %vm314_vm3, %v311_v25 }
  0xe9 PF: > { %s13_s14 = sadd.s32 1, %s481_s14   ;;  %s555_s12 = smov %s477_s13 }
  0xea   : > { %p10_p5 = scmp.ge.s32.totalorder %s13_s14, 4   ;;  %s556_s13 = smov %s558_s15 }
  0xec   :  { %12 = sbr.rel (!%p10_p5) target bundleno = 2 (0x2), region = 62 }

// kernel: dsta_forward.14
= control target key start
LH: loop header
LB: loop body
LE: loop exit
PB: predicated region body
PF: predicated region fallthrough
CT: control target
= control target key end

     0   :  { %s925_s12 = smov 0   ;;  %s1024_s0 = inlined_call_operand.vmem [shape: bf16[2,4,27], index: 0, kind: input, shape index: {}]   ;;  %s1025_s1 = inlined_call_operand.vmem [shape: bf16[9,4,4], index: 1, kind: input, shape index: {}]   ;;  %s1026_s2 = inlined_call_operand.vmem [shape: f32[4,1], index: 2, kind: input, shape index: {}]   ;;  %s1027_s3 = inlined_call_operand.vmem [shape: bf16[2,4,15], index: 3, kind: output, shape index: {}]  }
   0x1 LB: > { %s759_s13 = sadd.s32 4294967295, %s891_s12   ;;  %p763_p0 = scmp.ge.s32.totalorder %s891_s12, 1  ;;  %s891_s12 = sphi %s925_s12, %s13_s12  }
   0x2   : > { %p136_p1 = scmp.lt.s32.totalorder %s891_s12, 3 }
   0x4   : > { %p137_p2 = pnand %p763_p0, %p136_p1 }
   0x5   : > { %p158_p3 = scmp.lt.s32.totalorder (!%p137_p2), %s759_s13, 1  ;;  %s896_s18 = smov (!%p137_p2), 123  }
   0x6   : > { %140 = sbr.rel (%p137_p2) target bundleno = 373 (0x175), region = 32  ;;  %s897_s21 = smov (!%p137_p2), 127  }
   0x7   : > { %s898_s22 = smov (!%p137_p2), 122   ;;  %s899_s23 = smov (!%p137_p2), 126  }
   0x8   : > { %s900_s24 = smov (!%p137_p2), 118   ;;  %s901_s25 = smov (!%p137_p2), 121  }
   0x9   : > { %s902_s26 = smov (!%p137_p2), 116   ;;  %s903_s27 = smov (!%p137_p2), 117  }
   0xb   : > { %v175_v0 = vlaneseq  ;;  %v893_v1 = vmov 1983009808   ;;  %v894_v3 = vmov 0.0   ;;  %s1029_s13 = smov (!%p158_p3, %s759_s13), 1  ;;  %vm895_vm0 = vmmov 0  }
   0xc   : > { %v173_v2 = vunpack.c.l.s4 %v893_v1  ;;  %810 = vmatprep.subr.bf16.mxu0 %v894_v3  ;;  %816 = vmatprep.subr.bf16.mxu1 %v894_v3  ;;  %s764_s14 = sshll.u32 %s1029_s13, 1  ;;  %vm185_vm1 = vcmask 1041408   ;;  %vm181_vm2 = vcmask 31744   ;;  %v167_v11 = vld [vmem:[%s1025_s1] sm:$0x3]  ;;  %v904_v13 = vmov 0  }
   0xd   : > { %v176_v4 = vshrl.u32 %v175_v0, 7  ;;  %812 = vmatprep.mubr.msk.bf16.mxu0 %vm895_vm0, %v894_v3  ;;  %818 = vmatprep.mubr.msk.bf16.mxu1 %vm895_vm0, %v894_v3  ;;  %s161_s17 = scalar_lea.vmem %s1024_s0, %s764_s14  ;;  %v695_v12 = vld [vmem:[%s1026_s2] sm:$0xf]  ;;  %v772_v17 = vld [vmem:[%s1025_s1 + $0x6] sm:$0x3]  ;;  %vm704_vm3 = vcmask 115712  }
   0xe   : > { %v174_v5 = vunpack.c.0.s8 %v173_v2  ;;  %v168_v7 = vld [vmem:[%s161_s17] sm:$0x3]  ;;  %884 = vset.pattern.permute.xlu0 %v904_v13  ;;  %v766_v19 = vld [vmem:[%s1025_s1 + $0x2] sm:$0x3]  ;;  %v769_v25 = vld [vmem:[%s1025_s1 + $0x4] sm:$0x3] }
   0xf   : > { %v770_v8 = vld.sshfl [vmem:[%s161_s17] sm:$0x3 pattern:$0x76325410]  ;;  %v233_v10 = vsel %vm185_vm1, %v168_v7, 0 }
  0x10   : > { %v177_v6 = vsub.s32 %v174_v5, %v176_v4  ;;  %346 = vrot.lane.b32.xlu1 %v770_v8, %s896_s18  ;;  %817 = vmatpush3.bf16.msra.mxu1 %v233_v10  ;;  %v778_v26 = vld [vmem:[%s1025_s1 + $0xa] sm:$0x3]  ;;  %v775_v31 = vld [vmem:[%s1025_s1 + $0x8] sm:$0x3]  ;;  %v784_v32 = vld [vmem:[%s1025_s1 + $0xe] sm:$0x3] }
  0x11   : > { %828 = vmatprep.subr.bf16.mxu1 %v894_v3  ;;  %v781_v35 = vld [vmem:[%s1025_s1 + $0xc] sm:$0x3]  ;;  %v787_v37 = vld [vmem:[%s1025_s1 + $0x10] sm:$0x3] }
  0x12   : > { %v178_v9 = vrot.slane %v168_v7, %v177_v6 }
  0x13   : > { %819 = vmatmul.mubr.msk.bf16.vlgmr.msra.gmra.mxu1 %vm181_vm2, %v167_v11 }
  0x14   : > { %179 = vrot.lane.b32.xlu0 %v178_v9, %s897_s21  ;;  %406 = vrot.lane.b32.xlu1 %v770_v8, %s898_s22 }
  0x15   : > { %830 = vmatprep.mubr.msk.bf16.mxu1 %vm895_vm0, %v894_v3 }
  0x18   : > { %286 = vrot.lane.b32.xlu0 %v770_v8, %s899_s23  ;;  %526 = vrot.lane.b32.xlu1 %v770_v8, %s900_s24  ;;  %s165_s24 = scalar_lea.vmem %s1027_s3, %s764_s14 }
  0x1c   : > { %466 = vrot.lane.b32.xlu0 %v770_v8, %s901_s25  ;;  %646 = vrot.lane.b32.xlu1 %v770_v8, %s902_s26 }
  0x20   : > { %586 = vrot.lane.b32.xlu0 %v770_v8, %s903_s27 }
  0x24   : > { %698 = vperm.xlu0 %884, %v695_v12  }
  0x82   : > { %v347_v14 = vpop.permute.xlu1 %346 }
  0x83   : > { %v352_v15 = vsel %vm185_vm1, %v347_v14, 0 }
  0x84   : > { %829 = vmatpush3.bf16.msra.mxu1 %v352_v15 }
  0x85   : > { %840 = vmatprep.subr.bf16.mxu1 %v894_v3 }
  0x86   : > { %v180_v16 = vpop.permute.xlu0 %179  ;;  %v407_v22 = vpop.permute.xlu1 %406 }
  0x87   : > { %v187_v18 = vsel %vm185_vm1, %v180_v16, 0  ;;  %831 = vmatmul.mubr.msk.bf16.vlgmr.msra.gmra.mxu1 %vm181_vm2, %v772_v17  ;;  %v412_v27 = vsel %vm185_vm1, %v407_v22, 0 }
  0x88   : > { %811 = vmatpush3.bf16.msra.mxu0 %v187_v18  ;;  %842 = vmatprep.mubr.msk.bf16.mxu1 %vm895_vm0, %v894_v3 }
  0x89   : > { %822 = vmatprep.subr.bf16.mxu0 %v894_v3 }
  0x8a   : > { %v287_v20 = vpop.permute.xlu0 %286  ;;  %v527_v30 = vpop.permute.xlu1 %526 }
  0x8b   : > { %v292_v21 = vsel %vm185_vm1, %v287_v20, 0  ;;  %813 = vmatmul.mubr.msk.bf16.vlgmr.msra.gmra.mxu0 %vm181_vm2, %v766_v19  ;;  %v532_v33 = vsel %vm185_vm1, %v527_v30, 0 }
  0x8c   : > { %823 = vmatpush3.bf16.msra.mxu0 %v292_v21  ;;  %824 = vmatprep.mubr.msk.bf16.mxu0 %vm895_vm0, %v894_v3 }
  0x8d   : > { %834 = vmatprep.subr.bf16.mxu0 %v894_v3 }
  0x8e   : > { %v467_v23 = vpop.permute.xlu0 %466  ;;  %v647_v34 = vpop.permute.xlu1 %646 }
  0x8f   : > { %v472_v24 = vsel %vm185_vm1, %v467_v23, 0  ;;  %v652_v36 = vsel %vm185_vm1, %v647_v34, 0 }
  0x90   : > { %841 = vmatpush3.bf16.msra.mxu1 %v472_v24 }
  0x91   : > { %852 = vmatprep.subr.bf16.mxu1 %v894_v3 }
  0x92   : > { %v587_v28 = vpop.permute.xlu0 %586 }
  0x93   : > { %825 = vmatmul.mubr.msk.bf16.vlgmr.msra.gmra.mxu0 %vm181_vm2, %v769_v25  ;;  %843 = vmatmul.mubr.msk.bf16.vlgmr.msra.gmra.mxu1 %vm181_vm2, %v778_v26  ;;  %v592_v29 = vsel %vm185_vm1, %v587_v28, 0 }
  0x94   : > { %835 = vmatpush3.bf16.msra.mxu0 %v412_v27  ;;  %836 = vmatprep.mubr.msk.bf16.mxu0 %vm895_vm0, %v894_v3 }
  0x95   : > { %846 = vmatprep.subr.bf16.mxu0 %v894_v3  ;;  %853 = vmatpush3.bf16.msra.mxu1 %v592_v29 }
  0x96   : > { %854 = vmatprep.mubr.msk.bf16.mxu1 %vm895_vm0, %v894_v3 }
  0x9b   : > { %837 = vmatmul.mubr.msk.bf16.vlgmr.msra.gmra.mxu0 %vm181_vm2, %v775_v31  ;;  %855 = vmatmul.mubr.msk.bf16.vlgmr.msra.gmra.mxu1 %vm181_vm2, %v784_v32 }
  0x9c   : > { %847 = vmatpush3.bf16.msra.mxu0 %v532_v33  ;;  %848 = vmatprep.mubr.msk.bf16.mxu0 %vm895_vm0, %v894_v3 }
  0x9d   : > { %858 = vmatprep.subr.bf16.mxu0 %v894_v3 }
  0x9f   : > { %v699_v14 = vpop.permute.xlu0 %698 }
  0xa3   : > { %849 = vmatmul.mubr.msk.bf16.vlgmr.msra.gmra.mxu0 %vm181_vm2, %v781_v35 }
  0xa4   : > { %859 = vmatpush3.bf16.msra.mxu0 %v652_v36  ;;  %860 = vmatprep.mubr.msk.bf16.mxu0 %vm895_vm0, %v894_v3 }
  0xab   : > { %861 = vmatmul.mubr.msk.bf16.vlgmr.msra.gmra.mxu0 %vm181_vm2, %v787_v37 }
  0xd3   : > { %v269_v38 = vpop.f32.mrf.mxu1 }
  0xd5   : > { %v820_v39 = vpop.f32.mrf.mxu1 }
  0xd7   : > { %v272_v40 = vpop.f32.mrf.mxu1 }
  0xd9   : > { %v821_v41 = vpop.f32.mrf.mxu1 }
 0x147   : > { %v388_v42 = vpop.f32.mrf.mxu1 }
 0x149   : > { %v832_v44 = vpop.f32.mrf.mxu1 }
 0x14b   : > { %v223_v43 = vpop.f32.mrf.mxu0  ;;  %v391_v46 = vpop.f32.mrf.mxu1 }
 0x14c   : > { %v270_v56 = vadd.f32 %v269_v38, %v223_v43 }
 0x14d   : > { %v814_v45 = vpop.f32.mrf.mxu0  ;;  %v833_v48 = vpop.f32.mrf.mxu1 }
 0x14f   : > { %v226_v47 = vpop.f32.mrf.mxu0 }
 0x151   : > { %v815_v49 = vpop.f32.mrf.mxu0 }
 0x153   : > { %v328_v50 = vpop.f32.mrf.mxu0  ;;  %v508_v51 = vpop.f32.mrf.mxu1 }
 0x154   : > { %v334_v59 = vadd.f32 %v328_v50, %v270_v56 }
 0x155   : > { %v826_v52 = vpop.f32.mrf.mxu0  ;;  %v844_v53 = vpop.f32.mrf.mxu1 }
 0x156   : > { %v394_v0 = vadd.f32 %v388_v42, %v334_v59 }
 0x157   : > { %v331_v54 = vpop.f32.mrf.mxu0  ;;  %v511_v55 = vpop.f32.mrf.mxu1 }
 0x159   : > { %v827_v57 = vpop.f32.mrf.mxu0  ;;  %v845_v58 = vpop.f32.mrf.mxu1 }
 0x15b   : > { %v448_v60 = vpop.f32.mrf.mxu0  ;;  %v628_v61 = vpop.f32.mrf.mxu1 }
 0x15c   : > { %v454_v3 = vadd.f32 %v448_v60, %v394_v0 }
 0x15d   : > { %v838_v62 = vpop.f32.mrf.mxu0  ;;  %v856_v63 = vpop.f32.mrf.mxu1 }
 0x15e   : > { %v514_v7 = vadd.f32 %v508_v51, %v454_v3 }
 0x15f   : > { %v451_v1 = vpop.f32.mrf.mxu0  ;;  %v631_v2 = vpop.f32.mrf.mxu1 }
 0x161   : > { %v839_v4 = vpop.f32.mrf.mxu0  ;;  %v857_v5 = vpop.f32.mrf.mxu1 }
 0x163   : > { %v568_v6 = vpop.f32.mrf.mxu0 }
 0x164   : > { %v574_v9 = vadd.f32 %v568_v6, %v514_v7 }
 0x165   : > { %v850_v8 = vpop.f32.mrf.mxu0 }
 0x166   : > { %v634_v12 = vadd.f32 %v628_v61, %v574_v9 }
 0x167   : > { %v571_v10 = vpop.f32.mrf.mxu0 }
 0x169   : > { %v851_v11 = vpop.f32.mrf.mxu0 }
 0x16b   : > { %v688_v13 = vpop.f32.mrf.mxu0 }
 0x16c   : > { %v694_v15 = vadd.f32 %v688_v13, %v634_v12 }
 0x16d   : > { %v862_v16 = vpop.f32.mrf.mxu0 }
 0x16e   : > { %v701_v17 = vadd.f32 %v699_v14, %v694_v15 }
 0x16f   : > { %v691_v18 = vpop.f32.mrf.mxu0 }
 0x170   : > { %v702_v19 = vmax.f32 %v701_v17, 0.0 }
 0x171   : > { %v863_v20 = vpop.f32.mrf.mxu0 }
 0x172   : > { %v703_v21 = vpack.c.bf16 %v702_v19, %v702_v19 }
 0x174   : > { %705 = vst.msk [vmem:[%s165_s24] sm:$0x3] %vm704_vm3, %v703_v21 }
 0x175 PF: > { %s13_s12 = sadd.s32 1, %s891_s12  }
 0x176   : > { %p10_p4 = scmp.ge.s32.totalorder %s13_s12, 4  }
 0x178   :  { %12 = sbr.rel (!%p10_p4) target bundleno = 1 (0x1), region = 70 }

// kernel: dsta_forward.17
= control target key start
LH: loop header
LB: loop body
LE: loop exit
PB: predicated region body
PF: predicated region fallthrough
CT: control target
= control target key end

     0   :  { %s463_s12 = smov 0   ;;  %s465_s13 = smov 0   ;;  %s502_s0 = inlined_call_operand.vmem [shape: bf16[2,36,4], index: 0, kind: input, shape index: {}]   ;;  %s503_s1 = inlined_call_operand.vmem [shape: bf16[4,36], index: 1, kind: input, shape index: {}]   ;;  %s504_s2 = inlined_call_operand.vmem [shape: f32[4,1], index: 2, kind: input, shape index: {}]   ;;  %s505_s3 = inlined_call_operand.vmem [shape: bf16[2,4,4], index: 3, kind: output, shape index: {}]  }
   0x1   :  { %s467_s14 = smov 0  }
   0x2 LB: > { %s25_s15 = sadd.s32 1, %s434_s13  ;;  %p361_p0 = scmp.ge.s32.totalorder %s438_s14, 1  ;;  %s438_s14 = sphi %s467_s14, %s13_s14   ;;  %s434_s13 = sphi %s465_s13, %s507_s13   ;;  %s430_s12 = sphi %s463_s12, %s506_s12  }
   0x3   : > { %p27_p1 = scmp.ge.s32.totalorder %s25_s15, 2  ;;  %p156_p2 = scmp.lt.s32.totalorder %s438_s14, 3 }
   0x5   : > { %s509_s15 = smov (%p27_p1, %s25_s15), 0  ;;  %p157_p3 = pnand %p361_p0, %p156_p2 }
   0x6   : > { %p185_p4 = scmp.lt.s32.totalorder (!%p157_p3), %s430_s12, 1 }
   0x7   : > { %160 = sbr.rel (%p157_p3) target bundleno = 229 (0xe5), region = 32 }
   0xc   : > { %v440_v0 = vmov 0.0   ;;  %vm441_vm0 = vmmov 0   ;;  %v207_v1 = vld [vmem:[%s504_s2] sm:$0xf]  ;;  %s511_s12 = smov (!%p185_p4, %s430_s12), 1  ;;  %v442_v2 = vmov 0  }
   0xd   : > { %374 = vmatprep.subr.bf16.mxu0 %v440_v0  ;;  %380 = vmatprep.mubr.msk.bf16.mxu0 %vm441_vm0, %v440_v0  ;;  %s384_s18 = smul.u32 20, %s511_s12  ;;  %vm232_vm1 = vcmask 1041408   ;;  %v201_v7 = vld [vmem:[%s503_s1] sm:$0x3]  ;;  %vm228_vm2 = vcmask 293888   ;;  %s363_s24 = sshll.u32 %s511_s12, 1 }
   0xe   : > { %412 = vset.pattern.permute.xlu0 %v442_v2  ;;  %s199_s27 = scalar_lea.vmem %s505_s3, %s363_s24  ;;  %vm278_vm3 = vcmask 25600  }
   0xf   : > { %210 = vperm.xlu0 %412, %v207_v1   ;;  %s192_s21 = scalar_lea.vmem %s502_s0, %s384_s18 }
  0x10   : > { %v413_v3 = vld [vmem:[%s192_s21 + $0x10] ss:$0 sps:$4 sm:$0x33]   ;;  %v414_v5 = vld [vmem:[%s192_s21 + $0x8] sm:$0xff]   ;;  %v415_v6 = vld [vmem:[%s192_s21] sm:$0xff]  }
  0x11   : > { %v234_v4 = vsel %vm232_vm1, %v413_v3, 0 }
  0x12   : > { %375 = vmatpush3.bf16.msra.mxu0 %v234_v4 }
  0x13   : > { %376 = vmatprep.subr.bf16.mxu0 %v440_v0 }
  0x16   : > { %377 = vmatpush3.bf16.msra.mxu0 %v414_v5 }
  0x17   : > { %378 = vmatprep.subr.bf16.mxu0 %v440_v0 }
  0x1a   : > { %379 = vmatpush3.bf16.msra.mxu0 %v415_v6 }
  0x1d   : > { %381 = vmatmul.mubr.msk.bf16.vlgmr.msra.gmra.mxu0 %vm228_vm2, %v201_v7 }
  0x8a   : > { %v211_v8 = vpop.permute.xlu0 %210 }
  0xdd   : > { %v270_v9 = vpop.f32.mrf.mxu0 }
  0xde   : > { %v271_v10 = vadd.f32 %v270_v9, %v211_v8 }
  0xdf   : > { %v382_v11 = vpop.f32.mrf.mxu0 }
  0xe0   : > { %v276_v12 = vmax.f32 %v271_v10, 0.0 }
  0xe1   : > { %v273_v13 = vpop.f32.mrf.mxu0 }
  0xe2   : > { %v277_v14 = vpack.c.bf16 %v276_v12, %v276_v12 }
  0xe3   : > { %v383_v15 = vpop.f32.mrf.mxu0 }
  0xe4   : > { %279 = vst.msk [vmem:[%s199_s27] sm:$0x3] %vm278_vm3, %v277_v14 }
  0xe5 PF: > { %s13_s14 = sadd.s32 1, %s438_s14   ;;  %s506_s12 = smov %s434_s13 }
  0xe6   : > { %p10_p5 = scmp.ge.s32.totalorder %s13_s14, 4   ;;  %s507_s13 = smov %s509_s15 }
  0xe8   :  { %12 = sbr.rel (!%p10_p5) target bundleno = 2 (0x2), region = 62 }

// kernel: dsta_forward.18
= control target key start
LH: loop header
LB: loop body
LE: loop exit
PB: predicated region body
PF: predicated region fallthrough
CT: control target
= control target key end

     0   :  { %s2800_s12 = smov 0   ;;  %s3463_s0 = inlined_call_operand.vmem [shape: bf16[2,4,18], index: 0, kind: input, shape index: {}]   ;;  %s3464_s1 = inlined_call_operand.vmem [shape: bf16[9,108,4], index: 1, kind: input, shape index: {}]   ;;  %s3465_s2 = inlined_call_operand.vmem [shape: f32[108,1], index: 2, kind: input, shape index: {}]   ;;  %s3466_s3 = inlined_call_operand.vmem [shape: bf16[2,108,8], index: 3, kind: output, shape index: {}]  }
   0x1 LB: > { %s2048_s13 = sadd.s32 4294967295, %s2766_s12   ;;  %p2052_p0 = scmp.ge.s32.totalorder %s2766_s12, 1  ;;  %s2766_s12 = sphi %s2800_s12, %s13_s12  }
   0x2   : > { %p136_p1 = scmp.lt.s32.totalorder %s2766_s12, 3 }
   0x4   : > { %p137_p2 = pnand %p2052_p0, %p136_p1 }
   0x5   : > { %p159_p3 = scmp.lt.s32.totalorder (!%p137_p2), %s2048_s13, 1  ;;  %s2771_s18 = smov (!%p137_p2), 124  }
   0x6   : > { %140 = sbr.rel (%p137_p2) target bundleno = 591 (0x24f), region = 32  ;;  %s2772_s19 = smov (!%p137_p2), 127  }
   0x7   : > { %s2773_s20 = smov (!%p137_p2), 123   ;;  %s2774_s21 = smov (!%p137_p2), 126  }
   0x8   : > { %s2775_s22 = smov (!%p137_p2), 120   ;;  %s2776_s23 = smov (!%p137_p2), 122  }
   0x9   : > { %s2777_s24 = smov (!%p137_p2), 119   ;;  %s2778_s25 = smov (!%p137_p2), 118  }
   0xb   : > { %v238_v0 = vlaneseq  ;;  %v2768_v1 = vmov 1983009808   ;;  %v2769_v3 = vmov 0.0   ;;  %s3468_s13 = smov (!%p159_p3, %s2048_s13), 1  ;;  %vm2770_vm0 = vmmov 0   ;;  %v2697_v12 = vld [vmem:[%s3464_s1 + $0x38] sm:$0xff]  }
   0xc   : > { %v236_v2 = vunpack.c.l.s4 %v2768_v1  ;;  %2402 = vmatprep.subr.bf16.mxu0 %v2769_v3  ;;  %2672 = vmatprep.subr.bf16.mxu1 %v2769_v3  ;;  %s2053_s14 = sshll.u32 %s3468_s13, 1  ;;  %vm266_vm1 = vcmask 1041408   ;;  %v2698_v13 = vld [vmem:[%s3464_s1 + $0x58] sm:$0xff]   ;;  %vm244_vm2 = vcmask 31744   ;;  %v2699_v17 = vld [vmem:[%s3464_s1 + $0x40] sm:$0xff]   ;;  %v2701_v19 = vld [vmem:[%s3464_s1 + $0x48] sm:$0xff]  }
   0xd   : > { %v239_v4 = vshrl.u32 %v238_v0, 7  ;;  %2404 = vmatprep.mubr.msk.bf16.mxu0 %vm2770_vm0, %v2769_v3  ;;  %2420 = vmatprep.mubr.msk.bf16.mxu1 %vm2770_vm0, %v2769_v3  ;;  %s162_s17 = scalar_lea.vmem %s3463_s0, %s2053_s14  ;;  %v2700_v18 = vld [vmem:[%s3464_s1 + $0x60] sm:$0xff]   ;;  %v2702_v20 = vld [vmem:[%s3464_s1 + $0x68] sm:$0x3f]   ;;  %v2703_v22 = vld [vmem:[%s3464_s1 + $0x50] sm:$0xff]   ;;  %v2779_v1 = vmov 0  }
   0xe   : > { %v237_v5 = vunpack.c.0.s8 %v236_v2  ;;  %v183_v7 = vld [vmem:[%s162_s17] sm:$0x3]  ;;  %v2705_v26 = vld [vmem:[%s3464_s1 + $0x8] sm:$0xff]   ;;  %v2706_v27 = vld [vmem:[%s3464_s1 + $0x70] sm:$0xff]   ;;  %2695 = vset.pattern.permute.xlu0 %v2779_v1  ;;  %2696 = vset.pattern.permute.xlu1 %v2779_v1  ;;  %s2674_s30 = smul.u32 56, %s3468_s13  ;;  %vm1977_vm3 = vcmask 60416  }
   0xf   : > { %v2118_v8 = vld.sshfl [vmem:[%s162_s17] sm:$0x3 pattern:$0x76325410]  ;;  %v416_v15 = vsel %vm266_vm1, %v183_v7, 0  ;;  %v2707_v29 = vld [vmem:[%s3464_s1 + $0x10] sm:$0xff]  }
  0x10   : > { %v240_v6 = vsub.s32 %v237_v5, %v239_v4  ;;  %754 = vrot.lane.b32.xlu1 %v2118_v8, %s2771_s18  ;;  %v2704_v23 = vld [vmem:[%s3464_s1] sm:$0xff]   ;;  %v2708_v30 = vld [vmem:[%s3464_s1 + $0x78] sm:$0xff]   ;;  %v2712_v34 = vld [vmem:[%s3464_s1 + $0x88] sm:$0xff]   ;;  %s3397_s6 = scalar_lea.vmem %s3466_s3, %s2674_s30  ;;  %vm1991_vm4 = vcmask 58368  }
  0x11   : > { %v2709_v31 = vld [vmem:[%s3464_s1 + $0x18] sm:$0xff]   ;;  %v2710_v32 = vld [vmem:[%s3464_s1 + $0x80] sm:$0xff]   ;;  %v2713_v35 = vld [vmem:[%s3464_s1 + $0x28] sm:$0xff]  }
  0x12   : > { %v241_v9 = vrot.slane %v183_v7, %v240_v6  ;;  %v2711_v33 = vld [vmem:[%s3464_s1 + $0x20] sm:$0xff]   ;;  %v2714_v36 = vld [vmem:[%s3464_s1 + $0x90] sm:$0xff]   ;;  %v2716_v38 = vld [vmem:[%s3464_s1 + $0x98] sm:$0xff]  }
  0x13   : > { %v2715_v37 = vld [vmem:[%s3464_s1 + $0x30] sm:$0x3f]   ;;  %v2717_v39 = vld [vmem:[%s3464_s1 + $0xa0] sm:$0x3f]   ;;  %v2718_v40 = vld [vmem:[%s3464_s1 + $0xa8] sm:$0xff]  }
  0x14   : > { %242 = vrot.lane.b32.xlu0 %v241_v9, %s2772_s19  ;;  %942 = vrot.lane.b32.xlu1 %v2118_v8, %s2773_s20  ;;  %v2719_v44 = vld [vmem:[%s3464_s1 + $0xb0] sm:$0xff]   ;;  %v2720_v45 = vld [vmem:[%s3464_s1 + $0xe0] sm:$0xff]  }
  0x15   : > { %v2721_v47 = vld [vmem:[%s3464_s1 + $0xb8] sm:$0xff]   ;;  %v2722_v48 = vld [vmem:[%s3464_s1 + $0xe8] sm:$0xff]   ;;  %v2723_v49 = vld [vmem:[%s3464_s1 + $0xc0] sm:$0xff]  }
  0x16   : > { %v2724_v50 = vld [vmem:[%s3464_s1 + $0xf0] sm:$0xff]   ;;  %v2725_v51 = vld [vmem:[%s3464_s1 + $0xc8] sm:$0xff]   ;;  %v2726_v52 = vld [vmem:[%s3464_s1 + $0xf8] sm:$0xff]  }
  0x17   : > { %v2727_v53 = vld [vmem:[%s3464_s1 + $0xd0] sm:$0xff]   ;;  %v2728_v54 = vld [vmem:[%s3464_s1 + $0x100] sm:$0xff]   ;;  %v2729_v55 = vld [vmem:[%s3464_s1 + $0xd8] sm:$0x3f]  }
  0x18   : > { %566 = vrot.lane.b32.xlu0 %v2118_v8, %s2774_s21  ;;  %1318 = vrot.lane.b32.xlu1 %v2118_v8, %s2775_s22  ;;  %v2730_v56 = vld [vmem:[%s3464_s1 + $0x108] sm:$0xff]   ;;  %v2731_v57 = vld [vmem:[%s3464_s1 + $0x110] sm:$0x3f]  }
  0x19   : > { %v2732_v58 = vld [vmem:[%s3464_s1 + $0x118] sm:$0xff]   ;;  %v2733_v62 = vld [vmem:[%s3464_s1 + $0x120] sm:$0xff]   ;;  %v2734_v63 = vld [vmem:[%s3464_s1 + $0x150] sm:$0xff]  }
  0x1a   : > { %v1823_v2 = vld [vmem:[%s3465_s2] sm:$0xff]  ;;  %v1824_v4 = vld [vmem:[%s3465_s2 + $0x8] sm:$0xff]  ;;  %v2736_v6 = vld [vmem:[%s3464_s1 + $0x158] sm:$0xff]  }
  0x1b   : > { %v2735_v5 = vld [vmem:[%s3464_s1 + $0x128] sm:$0xff]   ;;  %v1825_v7 = vld [vmem:[%s3465_s2 + $0x10] sm:$0xff]  ;;  %v1827_v9 = vld [vmem:[%s3465_s2 + $0x20] sm:$0xff] }
  0x1c   : > { %1130 = vrot.lane.b32.xlu0 %v2118_v8, %s2776_s23  ;;  %1694 = vrot.lane.b32.xlu1 %v2118_v8, %s2778_s25 }
  0x20   : > { %1506 = vrot.lane.b32.xlu0 %v2118_v8, %s2777_s24  ;;  %1844 = vperm.xlu1 %2696, %v1824_v4   ;;  %v1826_v8 = vld [vmem:[%s3465_s2 + $0x18] sm:$0xff] }
  0x21   : > { %v2754_v4 = vld [vmem:[%s3464_s1 + $0x1d8] sm:$0xff]  }
  0x24   : > { %1839 = vperm.xlu0 %2695, %v1823_v2   ;;  %1849 = vperm.xlu1 %2696, %v1825_v7   ;;  %v2753_v2 = vld [vmem:[%s3464_s1 + $0x1a8] sm:$0xff]  }
  0x28   : > { %1854 = vperm.xlu0 %2695, %v1826_v8   ;;  %1859 = vperm.xlu1 %2696, %v1827_v9  }
  0x82   : > { %v755_v21 = vpop.permute.xlu1 %754 }
  0x83   : > { %v778_v24 = vsel %vm266_vm1, %v755_v21, 0  ;;  %v1835_v21 = vld [vmem:[%s3465_s2 + $0x60] sm:$0xff] }
  0x86   : > { %v243_v10 = vpop.permute.xlu0 %242  ;;  %v943_v25 = vpop.permute.xlu1 %942 }
  0x87   : > { %v268_v11 = vsel %vm266_vm1, %v243_v10, 0  ;;  %v966_v28 = vsel %vm266_vm1, %v943_v25, 0  ;;  %v1828_v10 = vld [vmem:[%s3465_s2 + $0x28] sm:$0xff] }
  0x88   : > { %2403 = vmatpush3.bf16.msra.mxu0 %v268_v11  ;;  %2673 = vmatpush3.bf16.msra.mxu1 %v268_v11  ;;  %v2737_v11 = vld [vmem:[%s3464_s1 + $0x130] sm:$0xff]   ;;  %v2743_v25 = vld [vmem:[%s3464_s1 + $0x148] sm:$0x3f]  }
  0x89   : > { %2462 = vmatprep.subr.bf16.mxu0 %v2769_v3  ;;  %2432 = vmatprep.subr.bf16.mxu1 %v2769_v3 }
  0x8a   : > { %v567_v14 = vpop.permute.xlu0 %566  ;;  %v1319_v43 = vpop.permute.xlu1 %1318  ;;  %1864 = vperm.xlu0 %2695, %v1828_v10  }
  0x8b   : > { %v590_v16 = vsel %vm266_vm1, %v567_v14, 0  ;;  %2405 = vmatmul.mubr.msk.bf16.vlgmr.msra.gmra.mxu0 %vm244_vm2, %v2697_v12  ;;  %2421 = vmatmul.mubr.msk.bf16.vlgmr.msra.gmra.mxu1 %vm244_vm2, %v2698_v13  ;;  %v1342_v46 = vsel %vm266_vm1, %v1319_v43, 0  ;;  %v2738_v12 = vld [vmem:[%s3464_s1 + $0x160] sm:$0xff]   ;;  %v1829_v13 = vld [vmem:[%s3465_s2 + $0x30] sm:$0xff]  ;;  %v1830_v14 = vld [vmem:[%s3465_s2 + $0x38] sm:$0xff] }
  0x8c   : > { %2463 = vmatpush3.bf16.msra.mxu0 %v590_v16  ;;  %2408 = vmatprep.mubr.msk.bf16.mxu0 %vm2770_vm0, %v2769_v3  ;;  %v1832_v16 = vld [vmem:[%s3465_s2 + $0x48] sm:$0xff] }
  0x8d   : > { %2424 = vmatprep.mubr.msk.bf16.mxu1 %vm2770_vm0, %v2769_v3  ;;  %2433 = vmatpush3.bf16.msra.mxu1 %v416_v15  ;;  %v1831_v15 = vld [vmem:[%s3465_s2 + $0x40] sm:$0xff] }
  0x8e   : > { %2492 = vmatprep.subr.bf16.mxu1 %v2769_v3  ;;  %2522 = vmatprep.subr.bf16.mxu0 %v2769_v3  ;;  %v1131_v41 = vpop.permute.xlu0 %1130  ;;  %v1695_v61 = vpop.permute.xlu1 %1694 }
  0x8f   : > { %v1154_v42 = vsel %vm266_vm1, %v1131_v41, 0  ;;  %v1718_v0 = vsel %vm266_vm1, %v1695_v61, 0  ;;  %1869 = vperm.xlu1 %2696, %v1829_v13   ;;  %1874 = vperm.xlu0 %2695, %v1830_v14  }
  0x92   : > { %v1507_v59 = vpop.permute.xlu0 %1506 }
  0x93   : > { %2409 = vmatmul.mubr.msk.bf16.gmra.mxu0 %vm244_vm2, %v2699_v17  ;;  %2425 = vmatmul.mubr.msk.bf16.gmra.mxu1 %vm244_vm2, %v2700_v18  ;;  %v1530_v60 = vsel %vm266_vm1, %v1507_v59, 0  ;;  %v2739_v17 = vld [vmem:[%s3464_s1 + $0x138] sm:$0xff]   ;;  %v2740_v18 = vld [vmem:[%s3464_s1 + $0x168] sm:$0xff]  }
  0x94   : > { %2412 = vmatprep.mubr.msk.bf16.mxu0 %vm2770_vm0, %v2769_v3  ;;  %2428 = vmatprep.mubr.msk.bf16.mxu1 %vm2770_vm0, %v2769_v3 }
  0x95   : > { %1879 = vperm.xlu1 %2696, %v1831_v15   ;;  %1884 = vperm.xlu0 %2695, %v1832_v16   ;;  %v2755_v16 = vld [vmem:[%s3464_s1 + $0x1b0] sm:$0xff]  }
  0x9b   : > { %2413 = vmatmul.mubr.msk.bf16.gmra.mxu0 %vm244_vm2, %v2701_v19  ;;  %2429 = vmatmul.mubr.msk.bf16.gmra.mxu1 %vm244_vm2, %v2702_v20  ;;  %v1833_v19 = vld [vmem:[%s3465_s2 + $0x50] sm:$0xff]  ;;  %v1834_v20 = vld [vmem:[%s3465_s2 + $0x58] sm:$0xff] }
  0x9c   : > { %2416 = vmatprep.mubr.msk.bf16.mxu0 %vm2770_vm0, %v2769_v3  ;;  %2434 = vmatprep.mubr.msk.bf16.mxu1 %vm2770_vm0, %v2769_v3 }
  0x9d   : > { %1889 = vperm.xlu1 %2696, %v1833_v19   ;;  %1894 = vperm.xlu0 %2695, %v1834_v20  }
  0xa1   : > { %1899 = vperm.xlu1 %2696, %v1835_v21  }
  0xa3   : > { %2417 = vmatmul.mubr.msk.bf16.gmra.mxu0 %vm244_vm2, %v2703_v22  ;;  %2435 = vmatmul.mubr.msk.bf16.vlgmr.msra.gmra.mxu1 %vm244_vm2, %v2704_v23  ;;  %v1836_v22 = vld [vmem:[%s3465_s2 + $0x68] sm:$0xf]  ;;  %v2741_v23 = vld [vmem:[%s3464_s1 + $0x140] sm:$0xff]  }
  0xa4   : > { %2493 = vmatpush3.bf16.msra.mxu1 %v778_v24  ;;  %2438 = vmatprep.mubr.msk.bf16.mxu1 %vm2770_vm0, %v2769_v3  ;;  %v2742_v24 = vld [vmem:[%s3464_s1 + $0x170] sm:$0xff]  }
  0xa5   : > { %2464 = vmatprep.mubr.msk.bf16.mxu0 %vm2770_vm0, %v2769_v3  ;;  %2552 = vmatprep.subr.bf16.mxu1 %v2769_v3 }
  0xa6   : > { %1904 = vperm.xlu0 %2695, %v1836_v22  }
  0xab   : > { %2439 = vmatmul.mubr.msk.bf16.gmra.mxu1 %vm244_vm2, %v2705_v26  ;;  %2465 = vmatmul.mubr.msk.bf16.vlgmr.msra.gmra.mxu0 %vm244_vm2, %v2706_v27  ;;  %v2744_v26 = vld [vmem:[%s3464_s1 + $0x178] sm:$0xff]   ;;  %v2745_v27 = vld [vmem:[%s3464_s1 + $0x180] sm:$0x3f]  }
  0xac   : > { %2523 = vmatpush3.bf16.msra.mxu0 %v966_v28  ;;  %2442 = vmatprep.mubr.msk.bf16.mxu1 %vm2770_vm0, %v2769_v3  ;;  %v2746_v28 = vld [vmem:[%s3464_s1 + $0x188] sm:$0xff]  }
  0xad   : > { %2468 = vmatprep.mubr.msk.bf16.mxu0 %vm2770_vm0, %v2769_v3  ;;  %2582 = vmatprep.subr.bf16.mxu0 %v2769_v3 }
  0xb3   : > { %2443 = vmatmul.mubr.msk.bf16.gmra.mxu1 %vm244_vm2, %v2707_v29  ;;  %2469 = vmatmul.mubr.msk.bf16.gmra.mxu0 %vm244_vm2, %v2708_v30 }
  0xb4   : > { %2446 = vmatprep.mubr.msk.bf16.mxu1 %vm2770_vm0, %v2769_v3  ;;  %2472 = vmatprep.mubr.msk.bf16.mxu0 %vm2770_vm0, %v2769_v3 }
  0xbb   : > { %2447 = vmatmul.mubr.msk.bf16.gmra.mxu1 %vm244_vm2, %v2709_v31  ;;  %2473 = vmatmul.mubr.msk.bf16.gmra.mxu0 %vm244_vm2, %v2710_v32 }
  0xbc   : > { %2450 = vmatprep.mubr.msk.bf16.mxu1 %vm2770_vm0, %v2769_v3  ;;  %2476 = vmatprep.mubr.msk.bf16.mxu0 %vm2770_vm0, %v2769_v3 }
  0xc3   : > { %2451 = vmatmul.mubr.msk.bf16.gmra.mxu1 %vm244_vm2, %v2711_v33  ;;  %2477 = vmatmul.mubr.msk.bf16.gmra.mxu0 %vm244_vm2, %v2712_v34 }
  0xc4   : > { %2454 = vmatprep.mubr.msk.bf16.mxu1 %vm2770_vm0, %v2769_v3  ;;  %2480 = vmatprep.mubr.msk.bf16.mxu0 %vm2770_vm0, %v2769_v3 }
  0xcb   : > { %2455 = vmatmul.mubr.msk.bf16.gmra.mxu1 %vm244_vm2, %v2713_v35  ;;  %2481 = vmatmul.mubr.msk.bf16.gmra.mxu0 %vm244_vm2, %v2714_v36  ;;  %v2747_v35 = vld [vmem:[%s3464_s1 + $0x190] sm:$0xff]   ;;  %v2748_v36 = vld [vmem:[%s3464_s1 + $0x1c0] sm:$0xff]  }
  0xcc   : > { %2458 = vmatprep.mubr.msk.bf16.mxu1 %vm2770_vm0, %v2769_v3  ;;  %2484 = vmatprep.mubr.msk.bf16.mxu0 %vm2770_vm0, %v2769_v3 }
  0xd3   : > { %2459 = vmatmul.mubr.msk.bf16.gmra.mxu1 %vm244_vm2, %v2715_v37  ;;  %2485 = vmatmul.mubr.msk.bf16.gmra.mxu0 %vm244_vm2, %v2716_v38 }
  0xd4   : > { %2488 = vmatprep.mubr.msk.bf16.mxu0 %vm2770_vm0, %v2769_v3  ;;  %2494 = vmatprep.mubr.msk.bf16.mxu1 %vm2770_vm0, %v2769_v3 }
  0xdb   : > { %2489 = vmatmul.mubr.msk.bf16.gmra.mxu0 %vm244_vm2, %v2717_v39  ;;  %2495 = vmatmul.mubr.msk.bf16.vlgmr.msra.gmra.mxu1 %vm244_vm2, %v2718_v40 }
  0xdc   : > { %2498 = vmatprep.mubr.msk.bf16.mxu1 %vm2770_vm0, %v2769_v3  ;;  %2524 = vmatprep.mubr.msk.bf16.mxu0 %vm2770_vm0, %v2769_v3 }
  0xdd   : > { %2553 = vmatpush3.bf16.msra.mxu1 %v1154_v42 }
  0xde   : > { %2612 = vmatprep.subr.bf16.mxu1 %v2769_v3 }
  0xe3   : > { %2499 = vmatmul.mubr.msk.bf16.gmra.mxu1 %vm244_vm2, %v2719_v44  ;;  %2525 = vmatmul.mubr.msk.bf16.vlgmr.msra.gmra.mxu0 %vm244_vm2, %v2720_v45  ;;  %v2749_v45 = vld [vmem:[%s3464_s1 + $0x198] sm:$0xff]  }
  0xe4   : > { %2583 = vmatpush3.bf16.msra.mxu0 %v1342_v46  ;;  %2502 = vmatprep.mubr.msk.bf16.mxu1 %vm2770_vm0, %v2769_v3  ;;  %v2750_v46 = vld [vmem:[%s3464_s1 + $0x1c8] sm:$0xff]  }
  0xe5   : > { %2528 = vmatprep.mubr.msk.bf16.mxu0 %vm2770_vm0, %v2769_v3  ;;  %2642 = vmatprep.subr.bf16.mxu0 %v2769_v3 }
  0xeb   : > { %2503 = vmatmul.mubr.msk.bf16.gmra.mxu1 %vm244_vm2, %v2721_v47  ;;  %2529 = vmatmul.mubr.msk.bf16.gmra.mxu0 %vm244_vm2, %v2722_v48 }
  0xec   : > { %2506 = vmatprep.mubr.msk.bf16.mxu1 %vm2770_vm0, %v2769_v3  ;;  %2532 = vmatprep.mubr.msk.bf16.mxu0 %vm2770_vm0, %v2769_v3 }
  0xf3   : > { %2507 = vmatmul.mubr.msk.bf16.gmra.mxu1 %vm244_vm2, %v2723_v49  ;;  %2533 = vmatmul.mubr.msk.bf16.gmra.mxu0 %vm244_vm2, %v2724_v50 }
  0xf4   : > { %2510 = vmatprep.mubr.msk.bf16.mxu1 %vm2770_vm0, %v2769_v3  ;;  %2536 = vmatprep.mubr.msk.bf16.mxu0 %vm2770_vm0, %v2769_v3 }
  0xfb   : > { %2511 = vmatmul.mubr.msk.bf16.gmra.mxu1 %vm244_vm2, %v2725_v51  ;;  %2537 = vmatmul.mubr.msk.bf16.gmra.mxu0 %vm244_vm2, %v2726_v52 }
  0xfc   : > { %2514 = vmatprep.mubr.msk.bf16.mxu1 %vm2770_vm0, %v2769_v3  ;;  %2540 = vmatprep.mubr.msk.bf16.mxu0 %vm2770_vm0, %v2769_v3 }
 0x103   : > { %2515 = vmatmul.mubr.msk.bf16.gmra.mxu1 %vm244_vm2, %v2727_v53  ;;  %2541 = vmatmul.mubr.msk.bf16.gmra.mxu0 %vm244_vm2, %v2728_v54 }
 0x104   : > { %2518 = vmatprep.mubr.msk.bf16.mxu1 %vm2770_vm0, %v2769_v3  ;;  %2544 = vmatprep.mubr.msk.bf16.mxu0 %vm2770_vm0, %v2769_v3 }
 0x10b   : > { %2519 = vmatmul.mubr.msk.bf16.gmra.mxu1 %vm244_vm2, %v2729_v55  ;;  %2545 = vmatmul.mubr.msk.bf16.gmra.mxu0 %vm244_vm2, %v2730_v56  ;;  %v2751_v55 = vld [vmem:[%s3464_s1 + $0x1a0] sm:$0xff]   ;;  %v2752_v56 = vld [vmem:[%s3464_s1 + $0x1d0] sm:$0xff]  }
 0x10c   : > { %2548 = vmatprep.mubr.msk.bf16.mxu0 %vm2770_vm0, %v2769_v3  ;;  %2554 = vmatprep.mubr.msk.bf16.mxu1 %vm2770_vm0, %v2769_v3 }
 0x113   : > { %2549 = vmatmul.mubr.msk.bf16.gmra.mxu0 %vm244_vm2, %v2731_v57  ;;  %2555 = vmatmul.mubr.msk.bf16.vlgmr.msra.gmra.mxu1 %vm244_vm2, %v2732_v58 }
 0x114   : > { %2558 = vmatprep.mubr.msk.bf16.mxu1 %vm2770_vm0, %v2769_v3  ;;  %2584 = vmatprep.mubr.msk.bf16.mxu0 %vm2770_vm0, %v2769_v3 }
 0x115   : > { %2613 = vmatpush3.bf16.msra.mxu1 %v1530_v60 }
 0x11b   : > { %2559 = vmatmul.mubr.msk.bf16.gmra.mxu1 %vm244_vm2, %v2733_v62  ;;  %2585 = vmatmul.mubr.msk.bf16.vlgmr.msra.gmra.mxu0 %vm244_vm2, %v2734_v63 }
 0x11c   : > { %2643 = vmatpush3.bf16.msra.mxu0 %v1718_v0  ;;  %2562 = vmatprep.mubr.msk.bf16.mxu1 %vm2770_vm0, %v2769_v3 }
 0x11d   : > { %2588 = vmatprep.mubr.msk.bf16.mxu0 %vm2770_vm0, %v2769_v3 }
 0x123   : > { %2563 = vmatmul.mubr.msk.bf16.gmra.mxu1 %vm244_vm2, %v2735_v5  ;;  %2589 = vmatmul.mubr.msk.bf16.gmra.mxu0 %vm244_vm2, %v2736_v6 }
 0x124   : > { %2566 = vmatprep.mubr.msk.bf16.mxu1 %vm2770_vm0, %v2769_v3  ;;  %2592 = vmatprep.mubr.msk.bf16.mxu0 %vm2770_vm0, %v2769_v3 }
 0x12b   : > { %2567 = vmatmul.mubr.msk.bf16.gmra.mxu1 %vm244_vm2, %v2737_v11  ;;  %2593 = vmatmul.mubr.msk.bf16.gmra.mxu0 %vm244_vm2, %v2738_v12 }
 0x12c   : > { %2570 = vmatprep.mubr.msk.bf16.mxu1 %vm2770_vm0, %v2769_v3  ;;  %2596 = vmatprep.mubr.msk.bf16.mxu0 %vm2770_vm0, %v2769_v3 }
 0x133   : > { %2571 = vmatmul.mubr.msk.bf16.gmra.mxu1 %vm244_vm2, %v2739_v17  ;;  %2597 = vmatmul.mubr.msk.bf16.gmra.mxu0 %vm244_vm2, %v2740_v18  ;;  %v2756_v17 = vld [vmem:[%s3464_s1 + $0x1e0] sm:$0xff]  }
 0x134   : > { %2574 = vmatprep.mubr.msk.bf16.mxu1 %vm2770_vm0, %v2769_v3  ;;  %2600 = vmatprep.mubr.msk.bf16.mxu0 %vm2770_vm0, %v2769_v3 }
 0x13b   : > { %2575 = vmatmul.mubr.msk.bf16.gmra.mxu1 %vm244_vm2, %v2741_v23  ;;  %2601 = vmatmul.mubr.msk.bf16.gmra.mxu0 %vm244_vm2, %v2742_v24 }
 0x13c   : > { %2578 = vmatprep.mubr.msk.bf16.mxu1 %vm2770_vm0, %v2769_v3  ;;  %2604 = vmatprep.mubr.msk.bf16.mxu0 %vm2770_vm0, %v2769_v3 }
 0x143   : > { %2579 = vmatmul.mubr.msk.bf16.gmra.mxu1 %vm244_vm2, %v2743_v25  ;;  %2605 = vmatmul.mubr.msk.bf16.gmra.mxu0 %vm244_vm2, %v2744_v26 }
 0x144   : > { %2608 = vmatprep.mubr.msk.bf16.mxu0 %vm2770_vm0, %v2769_v3  ;;  %2614 = vmatprep.mubr.msk.bf16.mxu1 %vm2770_vm0, %v2769_v3 }
 0x14b   : > { %v304_v29 = vpop.f32.mrf.mxu0  ;;  %v3173_v30 = vpop.f32.mrf.mxu1  ;;  %2609 = vmatmul.mubr.msk.bf16.gmra.mxu0 %vm244_vm2, %v2745_v27  ;;  %2615 = vmatmul.mubr.msk.bf16.vlgmr.msra.gmra.mxu1 %vm244_vm2, %v2746_v28 }
 0x14c   : > { %2618 = vmatprep.mubr.msk.bf16.mxu1 %vm2770_vm0, %v2769_v3  ;;  %2644 = vmatprep.mubr.msk.bf16.mxu0 %vm2770_vm0, %v2769_v3 }
 0x14d   : > { %v2406_v31 = vpop.f32.mrf.mxu0  ;;  %v2422_v32 = vpop.f32.mrf.mxu1 }
 0x14e   : > { %v2757_v31 = vld [vmem:[%s3464_s1 + $0x1b8] sm:$0x3f]   ;;  %v2758_v32 = vld [vmem:[%s3464_s1 + $0x1e8] sm:$0xff]  }
 0x14f   : > { %v307_v33 = vpop.f32.mrf.mxu0  ;;  %v3181_v34 = vpop.f32.mrf.mxu1 }
 0x151   : > { %v2407_v37 = vpop.f32.mrf.mxu0  ;;  %v2423_v38 = vpop.f32.mrf.mxu1 }
 0x153   : > { %v312_v39 = vpop.f32.mrf.mxu0  ;;  %v3189_v40 = vpop.f32.mrf.mxu1  ;;  %2619 = vmatmul.mubr.msk.bf16.gmra.mxu1 %vm244_vm2, %v2747_v35  ;;  %2645 = vmatmul.mubr.msk.bf16.vlgmr.msra.gmra.mxu0 %vm244_vm2, %v2748_v36 }
 0x154   : > { %2622 = vmatprep.mubr.msk.bf16.mxu1 %vm2770_vm0, %v2769_v3  ;;  %2648 = vmatprep.mubr.msk.bf16.mxu0 %vm2770_vm0, %v2769_v3 }
 0x155   : > { %v2410_v41 = vpop.f32.mrf.mxu0  ;;  %v2426_v42 = vpop.f32.mrf.mxu1 }
 0x157   : > { %v315_v43 = vpop.f32.mrf.mxu0  ;;  %v3197_v44 = vpop.f32.mrf.mxu1 }
 0x159   : > { %v2411_v47 = vpop.f32.mrf.mxu0  ;;  %v2427_v48 = vpop.f32.mrf.mxu1 }
 0x15a   : > { %v2759_v48 = vld [vmem:[%s3464_s1 + $0x1f0] sm:$0x3f]  }
 0x15b   : > { %v320_v49 = vpop.f32.mrf.mxu0  ;;  %v3205_v50 = vpop.f32.mrf.mxu1  ;;  %2623 = vmatmul.mubr.msk.bf16.gmra.mxu1 %vm244_vm2, %v2749_v45  ;;  %2649 = vmatmul.mubr.msk.bf16.gmra.mxu0 %vm244_vm2, %v2750_v46 }
 0x15c   : > { %2626 = vmatprep.mubr.msk.bf16.mxu1 %vm2770_vm0, %v2769_v3  ;;  %2652 = vmatprep.mubr.msk.bf16.mxu0 %vm2770_vm0, %v2769_v3 }
 0x15d   : > { %v2414_v51 = vpop.f32.mrf.mxu0  ;;  %v2430_v52 = vpop.f32.mrf.mxu1 }
 0x15f   : > { %v323_v53 = vpop.f32.mrf.mxu0  ;;  %v3213_v54 = vpop.f32.mrf.mxu1 }
 0x161   : > { %v2415_v57 = vpop.f32.mrf.mxu0  ;;  %v2431_v58 = vpop.f32.mrf.mxu1 }
 0x163   : > { %v328_v59 = vpop.f32.mrf.mxu0  ;;  %v452_v60 = vpop.f32.mrf.mxu1  ;;  %2627 = vmatmul.mubr.msk.bf16.gmra.mxu1 %vm244_vm2, %v2751_v55  ;;  %2653 = vmatmul.mubr.msk.bf16.gmra.mxu0 %vm244_vm2, %v2752_v56 }
 0x164   : > { %v453_v61 = vadd.f32 %v452_v60, %v304_v29  ;;  %2630 = vmatprep.mubr.msk.bf16.mxu1 %vm2770_vm0, %v2769_v3  ;;  %2656 = vmatprep.mubr.msk.bf16.mxu0 %vm2770_vm0, %v2769_v3 }
 0x165   : > { %v2418_v62 = vpop.f32.mrf.mxu0  ;;  %v2436_v63 = vpop.f32.mrf.mxu1 }
 0x167   : > { %v331_v0 = vpop.f32.mrf.mxu0  ;;  %v455_v1 = vpop.f32.mrf.mxu1 }
 0x168   : > { %v456_v5 = vadd.f32 %v455_v1, %v307_v33 }
 0x169   : > { %v2419_v6 = vpop.f32.mrf.mxu0  ;;  %v2437_v7 = vpop.f32.mrf.mxu1 }
 0x16b   : > { %v460_v8 = vpop.f32.mrf.mxu1  ;;  %v626_v9 = vpop.f32.mrf.mxu0  ;;  %2631 = vmatmul.mubr.msk.bf16.gmra.mxu1 %vm244_vm2, %v2753_v2  ;;  %2657 = vmatmul.mubr.msk.bf16.gmra.mxu0 %vm244_vm2, %v2754_v4 }
 0x16c   : > { %v461_v10 = vadd.f32 %v460_v8, %v312_v39  ;;  %v3235_v11 = vadd.f32 %v626_v9, %v453_v61  ;;  %2634 = vmatprep.mubr.msk.bf16.mxu1 %vm2770_vm0, %v2769_v3  ;;  %2660 = vmatprep.mubr.msk.bf16.mxu0 %vm2770_vm0, %v2769_v3 }
 0x16d   : > { %v2440_v12 = vpop.f32.mrf.mxu1  ;;  %v2466_v13 = vpop.f32.mrf.mxu0 }
 0x16f   : > { %v463_v14 = vpop.f32.mrf.mxu1  ;;  %v629_v15 = vpop.f32.mrf.mxu0 }
 0x170   : > { %v464_v18 = vadd.f32 %v463_v14, %v315_v43  ;;  %v3247_v19 = vadd.f32 %v629_v15, %v456_v5 }
 0x171   : > { %v2441_v20 = vpop.f32.mrf.mxu1  ;;  %v2467_v21 = vpop.f32.mrf.mxu0 }
 0x173   : > { %v468_v22 = vpop.f32.mrf.mxu1  ;;  %v634_v23 = vpop.f32.mrf.mxu0  ;;  %2635 = vmatmul.mubr.msk.bf16.gmra.mxu1 %vm244_vm2, %v2755_v16  ;;  %2661 = vmatmul.mubr.msk.bf16.gmra.mxu0 %vm244_vm2, %v2756_v17 }
 0x174   : > { %v469_v24 = vadd.f32 %v468_v22, %v320_v49  ;;  %v3251_v25 = vadd.f32 %v634_v23, %v461_v10  ;;  %2638 = vmatprep.mubr.msk.bf16.mxu1 %vm2770_vm0, %v2769_v3  ;;  %2664 = vmatprep.mubr.msk.bf16.mxu0 %vm2770_vm0, %v2769_v3 }
 0x175   : > { %v2444_v26 = vpop.f32.mrf.mxu1  ;;  %v2470_v27 = vpop.f32.mrf.mxu0 }
 0x177   : > { %v471_v28 = vpop.f32.mrf.mxu1  ;;  %v637_v29 = vpop.f32.mrf.mxu0 }
 0x178   : > { %v472_v33 = vadd.f32 %v471_v28, %v323_v53  ;;  %v3263_v35 = vadd.f32 %v637_v29, %v464_v18 }
 0x179   : > { %v2445_v36 = vpop.f32.mrf.mxu1  ;;  %v2471_v37 = vpop.f32.mrf.mxu0 }
 0x17b   : > { %v476_v38 = vpop.f32.mrf.mxu1  ;;  %v642_v39 = vpop.f32.mrf.mxu0  ;;  %2639 = vmatmul.mubr.msk.bf16.gmra.mxu1 %vm244_vm2, %v2757_v31  ;;  %2665 = vmatmul.mubr.msk.bf16.gmra.mxu0 %vm244_vm2, %v2758_v32 }
 0x17c   : > { %v477_v41 = vadd.f32 %v476_v38, %v328_v59  ;;  %v3267_v42 = vadd.f32 %v642_v39, %v469_v24  ;;  %2668 = vmatprep.mubr.msk.bf16.mxu0 %vm2770_vm0, %v2769_v3 }
 0x17d   : > { %v2448_v43 = vpop.f32.mrf.mxu1  ;;  %v2474_v45 = vpop.f32.mrf.mxu0 }
 0x17f   : > { %v479_v46 = vpop.f32.mrf.mxu1  ;;  %v645_v47 = vpop.f32.mrf.mxu0 }
 0x180   : > { %v480_v49 = vadd.f32 %v479_v46, %v331_v0  ;;  %v3274_v51 = vadd.f32 %v645_v47, %v472_v33 }
 0x181   : > { %v2449_v52 = vpop.f32.mrf.mxu1  ;;  %v2475_v53 = vpop.f32.mrf.mxu0 }
 0x183   : > { %v484_v55 = vpop.f32.mrf.mxu1  ;;  %v650_v56 = vpop.f32.mrf.mxu0  ;;  %2669 = vmatmul.mubr.msk.bf16.gmra.mxu0 %vm244_vm2, %v2759_v48 }
 0x184   : > { %v485_v57 = vadd.f32 %v484_v55, %v3173_v30  ;;  %v3278_v3 = vadd.f32 %v650_v56, %v477_v41 }
 0x185   : > { %v2452_v58 = vpop.f32.mrf.mxu1  ;;  %v2478_v59 = vpop.f32.mrf.mxu0 }
 0x187   : > { %v487_v60 = vpop.f32.mrf.mxu1  ;;  %v653_v61 = vpop.f32.mrf.mxu0 }
 0x188   : > { %v488_v62 = vadd.f32 %v487_v60, %v3181_v34  ;;  %v3281_v63 = vadd.f32 %v653_v61, %v480_v49 }
 0x189   : > { %v2453_v0 = vpop.f32.mrf.mxu1  ;;  %v2479_v1 = vpop.f32.mrf.mxu0 }
 0x18b   : > { %v492_v2 = vpop.f32.mrf.mxu1  ;;  %v658_v4 = vpop.f32.mrf.mxu0 }
 0x18c   : > { %v493_v5 = vadd.f32 %v492_v2, %v3189_v40  ;;  %v3284_v6 = vadd.f32 %v658_v4, %v485_v57 }
 0x18d   : > { %v2456_v7 = vpop.f32.mrf.mxu1  ;;  %v2482_v30 = vpop.f32.mrf.mxu0 }
 0x18f   : > { %v495_v8 = vpop.f32.mrf.mxu1  ;;  %v661_v9 = vpop.f32.mrf.mxu0 }
 0x190   : > { %v496_v10 = vadd.f32 %v495_v8, %v3197_v44  ;;  %v3287_v12 = vadd.f32 %v661_v9, %v488_v62 }
 0x191   : > { %v2457_v13 = vpop.f32.mrf.mxu1  ;;  %v2483_v34 = vpop.f32.mrf.mxu0 }
 0x193   : > { %v500_v14 = vpop.f32.mrf.mxu1  ;;  %v666_v15 = vpop.f32.mrf.mxu0 }
 0x194   : > { %v501_v16 = vadd.f32 %v500_v14, %v3205_v50  ;;  %v3290_v17 = vadd.f32 %v666_v15, %v493_v5 }
 0x195   : > { %v2460_v18 = vpop.f32.mrf.mxu1  ;;  %v2486_v40 = vpop.f32.mrf.mxu0 }
 0x197   : > { %v503_v20 = vpop.f32.mrf.mxu1  ;;  %v669_v21 = vpop.f32.mrf.mxu0 }
 0x198   : > { %v504_v22 = vadd.f32 %v503_v20, %v3213_v54  ;;  %v3293_v23 = vadd.f32 %v669_v21, %v496_v10 }
 0x199   : > { %v2461_v24 = vpop.f32.mrf.mxu1  ;;  %v2487_v44 = vpop.f32.mrf.mxu0 }
 0x19b   : > { %v674_v26 = vpop.f32.mrf.mxu0  ;;  %v814_v27 = vpop.f32.mrf.mxu1 }
 0x19c   : > { %v3295_v28 = vadd.f32 %v674_v26, %v501_v16  ;;  %v869_v29 = vadd.f32 %v814_v27, %v3235_v11 }
 0x19d   : > { %v2490_v31 = vpop.f32.mrf.mxu0  ;;  %v2496_v50 = vpop.f32.mrf.mxu1 }
 0x19f   : > { %v677_v32 = vpop.f32.mrf.mxu0  ;;  %v817_v33 = vpop.f32.mrf.mxu1 }
 0x1a0   : > { %v3298_v36 = vadd.f32 %v677_v32, %v504_v22  ;;  %v870_v37 = vadd.f32 %v817_v33, %v3247_v19 }
 0x1a1   : > { %v2491_v38 = vpop.f32.mrf.mxu0  ;;  %v2497_v54 = vpop.f32.mrf.mxu1 }
 0x1a3   : > { %v822_v39 = vpop.f32.mrf.mxu1  ;;  %v1002_v41 = vpop.f32.mrf.mxu0 }
 0x1a4   : > { %v871_v43 = vadd.f32 %v822_v39, %v3251_v25  ;;  %v3302_v45 = vadd.f32 %v1002_v41, %v869_v29 }
 0x1a5   : > { %v2500_v46 = vpop.f32.mrf.mxu1  ;;  %v2526_v47 = vpop.f32.mrf.mxu0 }
 0x1a7   : > { %v825_v48 = vpop.f32.mrf.mxu1  ;;  %v1005_v11 = vpop.f32.mrf.mxu0 }
 0x1a8   : > { %v872_v49 = vadd.f32 %v825_v48, %v3263_v35  ;;  %v3305_v52 = vadd.f32 %v1005_v11, %v870_v37 }
 0x1a9   : > { %v2501_v53 = vpop.f32.mrf.mxu1  ;;  %v2527_v55 = vpop.f32.mrf.mxu0 }
 0x1ab   : > { %v830_v56 = vpop.f32.mrf.mxu1  ;;  %v1010_v19 = vpop.f32.mrf.mxu0 }
 0x1ac   : > { %v873_v57 = vadd.f32 %v830_v56, %v3267_v42  ;;  %v3308_v58 = vadd.f32 %v1010_v19, %v871_v43 }
 0x1ad   : > { %v2504_v59 = vpop.f32.mrf.mxu1  ;;  %v2530_v25 = vpop.f32.mrf.mxu0 }
 0x1af   : > { %v833_v60 = vpop.f32.mrf.mxu1  ;;  %v1013_v61 = vpop.f32.mrf.mxu0 }
 0x1b0   : > { %v874_v62 = vadd.f32 %v833_v60, %v3274_v51  ;;  %v3311_v0 = vadd.f32 %v1013_v61, %v872_v49 }
 0x1b1   : > { %v2505_v1 = vpop.f32.mrf.mxu1  ;;  %v2531_v35 = vpop.f32.mrf.mxu0 }
 0x1b3   : > { %v838_v2 = vpop.f32.mrf.mxu1  ;;  %v1018_v4 = vpop.f32.mrf.mxu0 }
 0x1b4   : > { %v875_v5 = vadd.f32 %v838_v2, %v3278_v3  ;;  %v3314_v7 = vadd.f32 %v1018_v4, %v873_v57 }
 0x1b5   : > { %v2508_v30 = vpop.f32.mrf.mxu1  ;;  %v2534_v42 = vpop.f32.mrf.mxu0 }
 0x1b7   : > { %v841_v8 = vpop.f32.mrf.mxu1  ;;  %v1021_v9 = vpop.f32.mrf.mxu0 }
 0x1b8   : > { %v876_v10 = vadd.f32 %v841_v8, %v3281_v63  ;;  %v3317_v13 = vadd.f32 %v1021_v9, %v874_v62 }
 0x1b9   : > { %v2509_v34 = vpop.f32.mrf.mxu1  ;;  %v2535_v51 = vpop.f32.mrf.mxu0 }
 0x1bb   : > { %v846_v14 = vpop.f32.mrf.mxu1  ;;  %v1026_v15 = vpop.f32.mrf.mxu0 }
 0x1bc   : > { %v877_v16 = vadd.f32 %v846_v14, %v3284_v6  ;;  %v3320_v18 = vadd.f32 %v1026_v15, %v875_v5 }
 0x1bd   : > { %v2512_v40 = vpop.f32.mrf.mxu1  ;;  %v2538_v3 = vpop.f32.mrf.mxu0 }
 0x1bf   : > { %v849_v20 = vpop.f32.mrf.mxu1  ;;  %v1029_v21 = vpop.f32.mrf.mxu0 }
 0x1c0   : > { %v878_v22 = vadd.f32 %v849_v20, %v3287_v12  ;;  %v3323_v24 = vadd.f32 %v1029_v21, %v876_v10 }
 0x1c1   : > { %v2513_v44 = vpop.f32.mrf.mxu1  ;;  %v2539_v63 = vpop.f32.mrf.mxu0 }
 0x1c3   : > { %v854_v26 = vpop.f32.mrf.mxu1  ;;  %v1034_v27 = vpop.f32.mrf.mxu0 }
 0x1c4   : > { %v879_v29 = vadd.f32 %v854_v26, %v3290_v17  ;;  %v3326_v31 = vadd.f32 %v1034_v27, %v877_v16 }
 0x1c5   : > { %v2516_v50 = vpop.f32.mrf.mxu1  ;;  %v2542_v6 = vpop.f32.mrf.mxu0 }
 0x1c7   : > { %v857_v32 = vpop.f32.mrf.mxu1  ;;  %v1037_v33 = vpop.f32.mrf.mxu0 }
 0x1c8   : > { %v880_v37 = vadd.f32 %v857_v32, %v3293_v23  ;;  %v3329_v38 = vadd.f32 %v1037_v33, %v878_v22 }
 0x1c9   : > { %v2517_v54 = vpop.f32.mrf.mxu1  ;;  %v2543_v12 = vpop.f32.mrf.mxu0 }
 0x1cb   : > { %v862_v39 = vpop.f32.mrf.mxu1  ;;  %v1042_v41 = vpop.f32.mrf.mxu0 }
 0x1cc   : > { %v881_v43 = vadd.f32 %v862_v39, %v3295_v28  ;;  %v3332_v46 = vadd.f32 %v1042_v41, %v879_v29 }
 0x1cd   : > { %v2520_v47 = vpop.f32.mrf.mxu1  ;;  %v2546_v17 = vpop.f32.mrf.mxu0 }
 0x1cf   : > { %v865_v48 = vpop.f32.mrf.mxu1  ;;  %v1045_v11 = vpop.f32.mrf.mxu0 }
 0x1d0   : > { %v882_v49 = vadd.f32 %v865_v48, %v3298_v36  ;;  %v3335_v53 = vadd.f32 %v1045_v11, %v880_v37 }
 0x1d1   : > { %v2521_v55 = vpop.f32.mrf.mxu1  ;;  %v2547_v23 = vpop.f32.mrf.mxu0 }
 0x1d3   : > { %v1050_v56 = vpop.f32.mrf.mxu0  ;;  %v1190_v19 = vpop.f32.mrf.mxu1 }
 0x1d4   : > { %v3337_v57 = vadd.f32 %v1050_v56, %v881_v43 }
 0x1d5   : > { %v2550_v59 = vpop.f32.mrf.mxu0  ;;  %v2556_v25 = vpop.f32.mrf.mxu1 }
 0x1d7   : > { %v1053_v60 = vpop.f32.mrf.mxu0  ;;  %v1193_v28 = vpop.f32.mrf.mxu1 }
 0x1d8   : > { %v3339_v61 = vadd.f32 %v1053_v60, %v882_v49 }
 0x1d9   : > { %v2551_v62 = vpop.f32.mrf.mxu0  ;;  %v2557_v1 = vpop.f32.mrf.mxu1 }
 0x1db   : > { %v3341_v35 = vpop.f32.mrf.mxu1  ;;  %v1378_v2 = vpop.f32.mrf.mxu0 }
 0x1dd   : > { %v2560_v36 = vpop.f32.mrf.mxu1  ;;  %v2586_v4 = vpop.f32.mrf.mxu0 }
 0x1df   : > { %v3343_v5 = vpop.f32.mrf.mxu1  ;;  %v1381_v30 = vpop.f32.mrf.mxu0 }
 0x1e1   : > { %v2561_v42 = vpop.f32.mrf.mxu1  ;;  %v2587_v8 = vpop.f32.mrf.mxu0 }
 0x1e3   : > { %v3345_v9 = vpop.f32.mrf.mxu1  ;;  %v3347_v10 = vpop.f32.mrf.mxu0 }
 0x1e5   : > { %v2564_v34 = vpop.f32.mrf.mxu1  ;;  %v2590_v51 = vpop.f32.mrf.mxu0 }
 0x1e6   : > { %v1245_v34 = vadd.f32 %v1190_v19, %v3302_v45  ;;  %v1247_v45 = vadd.f32 %v3341_v35, %v3308_v58  ;;  %v1248_v58 = vadd.f32 %v3343_v5, %v3311_v0 }
 0x1e7   : > { %v3349_v14 = vpop.f32.mrf.mxu1  ;;  %v3351_v15 = vpop.f32.mrf.mxu0 }
 0x1e9   : > { %v2565_v16 = vpop.f32.mrf.mxu1  ;;  %v2591_v40 = vpop.f32.mrf.mxu0 }
 0x1ea   : > { %v1433_v40 = vadd.f32 %v1378_v2, %v1245_v34  ;;  %v1435_v2 = vadd.f32 %v3347_v10, %v1247_v45 }
 0x1eb   : > { %v3353_v3 = vpop.f32.mrf.mxu1  ;;  %v3355_v20 = vpop.f32.mrf.mxu0 }
 0x1ed   : > { %v2568_v21 = vpop.f32.mrf.mxu1  ;;  %v2594_v22 = vpop.f32.mrf.mxu0 }
 0x1ef   : > { %v3357_v44 = vpop.f32.mrf.mxu1  ;;  %v3359_v63 = vpop.f32.mrf.mxu0 }
 0x1f1   : > { %v2569_v26 = vpop.f32.mrf.mxu1  ;;  %v2595_v27 = vpop.f32.mrf.mxu0 }
 0x1f2   : > { %v1246_v26 = vadd.f32 %v1193_v28, %v3305_v52 }
 0x1f3   : > { %v3361_v29 = vpop.f32.mrf.mxu1  ;;  %v3363_v50 = vpop.f32.mrf.mxu0 }
 0x1f5   : > { %v2572_v6 = vpop.f32.mrf.mxu1  ;;  %v2598_v32 = vpop.f32.mrf.mxu0 }
 0x1f6   : > { %v1840_v6 = vpop.permute.xlu0 %1839 }
 0x1f7   : > { %v3365_v33 = vpop.f32.mrf.mxu1  ;;  %v3367_v37 = vpop.f32.mrf.mxu0 }
 0x1f9   : > { %v2573_v54 = vpop.f32.mrf.mxu1  ;;  %v2599_v12 = vpop.f32.mrf.mxu0 }
 0x1fa   : > { %v1434_v12 = vadd.f32 %v1381_v30, %v1246_v26  ;;  %v1249_v26 = vadd.f32 %v3345_v9, %v3314_v7 }
 0x1fb   : > { %v3369_v39 = vpop.f32.mrf.mxu1  ;;  %v3371_v41 = vpop.f32.mrf.mxu0 }
 0x1fd   : > { %v2576_v43 = vpop.f32.mrf.mxu1  ;;  %v2602_v47 = vpop.f32.mrf.mxu0 }
 0x1fe   : > { %v1845_v47 = vpop.permute.xlu1 %1844 }
 0x1ff   : > { %v3373_v17 = vpop.f32.mrf.mxu1  ;;  %v3375_v48 = vpop.f32.mrf.mxu0 }
 0x201   : > { %v2577_v11 = vpop.f32.mrf.mxu1  ;;  %v2603_v49 = vpop.f32.mrf.mxu0 }
 0x203   : > { %v3377_v55 = vpop.f32.mrf.mxu1  ;;  %v3379_v23 = vpop.f32.mrf.mxu0 }
 0x205   : > { %v2580_v56 = vpop.f32.mrf.mxu1  ;;  %v2606_v59 = vpop.f32.mrf.mxu0 }
 0x207   : > { %v3381_v25 = vpop.f32.mrf.mxu1  ;;  %v3383_v60 = vpop.f32.mrf.mxu0 }
 0x209   : > { %v2581_v62 = vpop.f32.mrf.mxu1  ;;  %v2607_v1 = vpop.f32.mrf.mxu0 }
 0x20b   : > { %v3385_v36 = vpop.f32.mrf.mxu0  ;;  %v1566_v4 = vpop.f32.mrf.mxu1 }
 0x20c   : > { %v1621_v27 = vadd.f32 %v1566_v4, %v1433_v40 }
 0x20d   : > { %v2610_v42 = vpop.f32.mrf.mxu0  ;;  %v2616_v8 = vpop.f32.mrf.mxu1 }
 0x20e   : > { %v1850_v42 = vpop.permute.xlu1 %1849 }
 0x20f   : > { %v3388_v51 = vpop.f32.mrf.mxu0  ;;  %v1569_v16 = vpop.f32.mrf.mxu1 }
 0x210   : > { %v1622_v19 = vadd.f32 %v1569_v16, %v1434_v12  ;;  %v1436_v16 = vadd.f32 %v3351_v15, %v1248_v58  ;;  %v1855_v12 = vpop.permute.xlu0 %1854 }
 0x211   : > { %v2611_v21 = vpop.f32.mrf.mxu0  ;;  %v2617_v22 = vpop.f32.mrf.mxu1 }
 0x213   : > { %v1574_v32 = vpop.f32.mrf.mxu1  ;;  %v1754_v54 = vpop.f32.mrf.mxu0 }
 0x214   : > { %v1809_v43 = vadd.f32 %v1754_v54, %v1621_v27  ;;  %v1623_v35 = vadd.f32 %v1574_v32, %v1435_v2  ;;  %v1437_v32 = vadd.f32 %v3355_v20, %v1249_v26  ;;  %v1865_v58 = vpop.permute.xlu0 %1864 }
 0x215   : > { %v2620_v11 = vpop.f32.mrf.mxu1  ;;  %v2646_v49 = vpop.f32.mrf.mxu0 }
 0x216   : > { %v1907_v56 = vadd.f32 %v1840_v6, %v1809_v43  ;;  %v1250_v11 = vadd.f32 %v3349_v14, %v3317_v13 }
 0x217   : > { %v1577_v52 = vpop.f32.mrf.mxu1  ;;  %v1757_v28 = vpop.f32.mrf.mxu0 }
 0x218   : > { %v2316_v30 = vpack.c.bf16 %v1907_v56, %v1907_v56  ;;  %v1810_v59 = vadd.f32 %v1757_v28, %v1622_v19  ;;  %v1624_v27 = vadd.f32 %v1577_v52, %v1436_v16  ;;  %v1438_v19 = vadd.f32 %v3359_v63, %v1250_v11  ;;  %v1860_v52 = vpop.permute.xlu1 %1859 }
 0x219   : > { %v2621_v62 = vpop.f32.mrf.mxu1  ;;  %v2647_v1 = vpop.f32.mrf.mxu0 }
 0x21a   : > { %1978 = vst.msk [vmem:[%s3397_s6] sm:$0xf] %vm1977_vm3, %v2316_v30  ;;  %v1908_v4 = vadd.f32 %v1845_v47, %v1810_v59  ;;  %v1251_v30 = vadd.f32 %v3353_v3, %v3320_v18 }
 0x21b   : > { %v1582_v8 = vpop.f32.mrf.mxu1  ;;  %v1762_v34 = vpop.f32.mrf.mxu0 }
 0x21c   : > { %v2317_v40 = vpack.c.bf16 %v1908_v4, %v1908_v4  ;;  %v1811_v21 = vadd.f32 %v1762_v34, %v1623_v35  ;;  %v1625_v49 = vadd.f32 %v1582_v8, %v1437_v32  ;;  %v1439_v1 = vadd.f32 %v3363_v50, %v1251_v30  ;;  %v1875_v32 = vpop.permute.xlu0 %1874 }
 0x21d   : > { %v2624_v10 = vpop.f32.mrf.mxu1  ;;  %v2650_v22 = vpop.f32.mrf.mxu0  ;;  %v1252_v8 = vadd.f32 %v3357_v44, %v3323_v24 }
 0x21e   : > { %1979 = vst.msk [vmem:[%s3397_s6 + $0x4] sm:$0xf] %vm1977_vm3, %v2317_v40  ;;  %v1909_v0 = vadd.f32 %v1850_v42, %v1811_v21  ;;  %v1870_v21 = vpop.permute.xlu1 %1869 }
 0x21f   : > { %v1585_v5 = vpop.f32.mrf.mxu1  ;;  %v1765_v6 = vpop.f32.mrf.mxu0  ;;  %v1440_v40 = vadd.f32 %v3367_v37, %v1252_v8  ;;  %v1257_v8 = vadd.f32 %v3377_v55, %v3337_v57 }
 0x220   : > { %v2318_v54 = vpack.c.bf16 %v1909_v0, %v1909_v0  ;;  %v1812_v43 = vadd.f32 %v1765_v6, %v1624_v27  ;;  %v1626_v59 = vadd.f32 %v1585_v5, %v1438_v19  ;;  %v1253_v27 = vadd.f32 %v3361_v29, %v3326_v31 }
 0x221   : > { %v2625_v15 = vpop.f32.mrf.mxu1  ;;  %v2651_v47 = vpop.f32.mrf.mxu0 }
 0x222   : > { %1980 = vst.msk [vmem:[%s3397_s6 + $0x8] sm:$0xf] %vm1977_vm3, %v2318_v54  ;;  %v1910_v7 = vadd.f32 %v1855_v12, %v1812_v43  ;;  %v1441_v6 = vadd.f32 %v3371_v41, %v1253_v27  ;;  %v1254_v15 = vadd.f32 %v3365_v33, %v3329_v38 }
 0x223   : > { %v1590_v9 = vpop.f32.mrf.mxu1  ;;  %v1770_v45 = vpop.f32.mrf.mxu0 }
 0x224   : > { %v2319_v56 = vpack.c.bf16 %v1910_v7, %v1910_v7  ;;  %v1813_v20 = vadd.f32 %v1770_v45, %v1625_v49  ;;  %v1627_v34 = vadd.f32 %v1590_v9, %v1439_v1  ;;  %v1442_v49 = vadd.f32 %v3375_v48, %v1254_v15  ;;  %v1880_v7 = vpop.permute.xlu1 %1879 }
 0x225   : > { %v2628_v28 = vpop.f32.mrf.mxu1  ;;  %v2654_v2 = vpop.f32.mrf.mxu0 }
 0x226   : > { %1981 = vst.msk [vmem:[%s3397_s6 + $0xc] sm:$0xf] %vm1977_vm3, %v2319_v56  ;;  %v1911_v13 = vadd.f32 %v1860_v52, %v1813_v20  ;;  %v1255_v56 = vadd.f32 %v3369_v39, %v3332_v46  ;;  %v1885_v2 = vpop.permute.xlu0 %1884 }
 0x227   : > { %v1593_v14 = vpop.f32.mrf.mxu1  ;;  %v1773_v62 = vpop.f32.mrf.mxu0 }
 0x228   : > { %v2320_v35 = vpack.c.bf16 %v1911_v13, %v1911_v13  ;;  %v1814_v63 = vadd.f32 %v1773_v62, %v1626_v59  ;;  %v1628_v0 = vadd.f32 %v1593_v14, %v1440_v40  ;;  %v1443_v28 = vadd.f32 %v3379_v23, %v1255_v56 }
 0x229   : > { %v2629_v4 = vpop.f32.mrf.mxu1  ;;  %v2655_v42 = vpop.f32.mrf.mxu0  ;;  %v1256_v14 = vadd.f32 %v3373_v17, %v3335_v53 }
 0x22a   : > { %1982 = vst.msk [vmem:[%s3397_s6 + $0x10] sm:$0xf] %vm1977_vm3, %v2320_v35  ;;  %v1912_v18 = vadd.f32 %v1865_v58, %v1814_v63  ;;  %v1890_v35 = vpop.permute.xlu1 %1889 }
 0x22b   : > { %v1598_v3 = vpop.f32.mrf.mxu1  ;;  %v1778_v16 = vpop.f32.mrf.mxu0  ;;  %v1444_v58 = vadd.f32 %v3383_v60, %v1256_v14 }
 0x22c   : > { %v2321_v10 = vpack.c.bf16 %v1912_v18, %v1912_v18  ;;  %v1815_v50 = vadd.f32 %v1778_v16, %v1627_v34  ;;  %v1629_v47 = vadd.f32 %v1598_v3, %v1441_v6  ;;  %v1445_v3 = vadd.f32 %v3385_v36, %v1257_v8  ;;  %v1895_v16 = vpop.permute.xlu0 %1894 }
 0x22d   : > { %v2632_v22 = vpop.f32.mrf.mxu1  ;;  %v2658_v26 = vpop.f32.mrf.mxu0 }
 0x22e   : > { %1983 = vst.msk [vmem:[%s3397_s6 + $0x14] sm:$0xf] %vm1977_vm3, %v2321_v10  ;;  %v1913_v24 = vadd.f32 %v1870_v21, %v1815_v50  ;;  %v1258_v50 = vadd.f32 %v3381_v25, %v3339_v61 }
 0x22f   : > { %v1601_v44 = vpop.f32.mrf.mxu1  ;;  %v1781_v5 = vpop.f32.mrf.mxu0 }
 0x230   : > { %v2322_v54 = vpack.c.bf16 %v1913_v24, %v1913_v24  ;;  %v1816_v37 = vadd.f32 %v1781_v5, %v1628_v0  ;;  %v1630_v52 = vadd.f32 %v1601_v44, %v1442_v49  ;;  %v1446_v26 = vadd.f32 %v3388_v51, %v1258_v50  ;;  %v1900_v0 = vpop.permute.xlu1 %1899  ;;  %v1905_v25 = vpop.permute.xlu0 %1904 }
 0x231   : > { %v2633_v12 = vpop.f32.mrf.mxu1  ;;  %v2659_v43 = vpop.f32.mrf.mxu0 }
 0x232   : > { %1984 = vst.msk [vmem:[%s3397_s6 + $0x18] sm:$0xf] %vm1977_vm3, %v2322_v54  ;;  %v1914_v31 = vadd.f32 %v1875_v32, %v1816_v37 }
 0x233   : > { %v1606_v29 = vpop.f32.mrf.mxu1  ;;  %v1786_v11 = vpop.f32.mrf.mxu0 }
 0x234   : > { %v2323_v9 = vpack.c.bf16 %v1914_v31, %v1914_v31  ;;  %v1817_v41 = vadd.f32 %v1786_v11, %v1629_v47  ;;  %v1631_v62 = vadd.f32 %v1606_v29, %v1443_v28 }
 0x235   : > { %v2636_v45 = vpop.f32.mrf.mxu1  ;;  %v2662_v19 = vpop.f32.mrf.mxu0 }
 0x236   : > { %1985 = vst.msk [vmem:[%s3397_s6 + $0x1c] sm:$0xf] %vm1977_vm3, %v2323_v9  ;;  %v1915_v38 = vadd.f32 %v1880_v7, %v1817_v41 }
 0x237   : > { %v1609_v33 = vpop.f32.mrf.mxu1  ;;  %v1789_v20 = vpop.f32.mrf.mxu0 }
 0x238   : > { %v2324_v30 = vpack.c.bf16 %v1915_v38, %v1915_v38  ;;  %v1818_v48 = vadd.f32 %v1789_v20, %v1630_v52  ;;  %v1632_v34 = vadd.f32 %v1609_v33, %v1444_v58 }
 0x239   : > { %v2637_v59 = vpop.f32.mrf.mxu1  ;;  %v2663_v13 = vpop.f32.mrf.mxu0 }
 0x23a   : > { %1986 = vst.msk [vmem:[%s3397_s6 + $0x20] sm:$0xf] %vm1977_vm3, %v2324_v30  ;;  %v1916_v46 = vadd.f32 %v1885_v2, %v1818_v48 }
 0x23b   : > { %v1614_v39 = vpop.f32.mrf.mxu1  ;;  %v1794_v1 = vpop.f32.mrf.mxu0 }
 0x23c   : > { %v2325_v63 = vpack.c.bf16 %v1916_v46, %v1916_v46  ;;  %v1819_v23 = vadd.f32 %v1794_v1, %v1631_v62  ;;  %v1633_v22 = vadd.f32 %v1614_v39, %v1445_v3 }
 0x23d   : > { %v2640_v4 = vpop.f32.mrf.mxu1  ;;  %v2666_v42 = vpop.f32.mrf.mxu0 }
 0x23e   : > { %1987 = vst.msk [vmem:[%s3397_s6 + $0x24] sm:$0xf] %vm1977_vm3, %v2325_v63  ;;  %v1917_v53 = vadd.f32 %v1890_v35, %v1819_v23 }
 0x23f   : > { %v1617_v17 = vpop.f32.mrf.mxu1  ;;  %v1797_v18 = vpop.f32.mrf.mxu0 }
 0x240   : > { %v2326_v60 = vpack.c.bf16 %v1917_v53, %v1917_v53  ;;  %v1820_v40 = vadd.f32 %v1797_v18, %v1632_v34  ;;  %v1634_v44 = vadd.f32 %v1617_v17, %v1446_v26 }
 0x241   : > { %v2667_v21 = vpop.f32.mrf.mxu0  ;;  %v2641_v10 = vpop.f32.mrf.mxu1 }
 0x242   : > { %1988 = vst.msk [vmem:[%s3397_s6 + $0x28] sm:$0xf] %vm1977_vm3, %v2326_v60  ;;  %v1918_v57 = vadd.f32 %v1895_v16, %v1820_v40 }
 0x243   : > { %v1802_v55 = vpop.f32.mrf.mxu0 }
 0x244   : > { %v2327_v27 = vpack.c.bf16 %v1918_v57, %v1918_v57  ;;  %v1821_v36 = vadd.f32 %v1802_v55, %v1633_v22 }
 0x245   : > { %v2670_v24 = vpop.f32.mrf.mxu0 }
 0x246   : > { %1989 = vst.msk [vmem:[%s3397_s6 + $0x2c] sm:$0xf] %vm1977_vm3, %v2327_v27  ;;  %v1919_v5 = vadd.f32 %v1900_v0, %v1821_v36 }
 0x247   : > { %v1805_v6 = vpop.f32.mrf.mxu0 }
 0x248   : > { %v2328_v32 = vpack.c.bf16 %v1919_v5, %v1919_v5  ;;  %v1822_v61 = vadd.f32 %v1805_v6, %v1634_v44 }
 0x249   : > { %v2671_v54 = vpop.f32.mrf.mxu0 }
 0x24a   : > { %1990 = vst.msk [vmem:[%s3397_s6 + $0x30] sm:$0xf] %vm1977_vm3, %v2328_v32  ;;  %v1920_v37 = vadd.f32 %v1905_v25, %v1822_v61 }
 0x24c   : > { %v2329_v12 = vpack.c.bf16 %v1920_v37, %v1920_v37 }
 0x24e   : > { %1992 = vst.msk [vmem:[%s3397_s6 + $0x34] sm:$0x3] %vm1991_vm4, %v2329_v12 }
 0x24f PF: > { %s13_s12 = sadd.s32 1, %s2766_s12  }
 0x250   : > { %p10_p4 = scmp.ge.s32.totalorder %s13_s12, 4  }
 0x252   :  { %12 = sbr.rel (!%p10_p4) target bundleno = 1 (0x1), region = 70 }

// kernel: dsta_forward.19
= control target key start
LH: loop header
LB: loop body
LE: loop exit
PB: predicated region body
PF: predicated region fallthrough
CT: control target
= control target key end

     0   :  { %s2800_s12 = smov 0   ;;  %s3463_s0 = inlined_call_operand.vmem [shape: bf16[2,4,27], index: 0, kind: input, shape index: {}]   ;;  %s3464_s1 = inlined_call_operand.vmem [shape: bf16[9,108,4], index: 1, kind: input, shape index: {}]   ;;  %s3465_s2 = inlined_call_operand.vmem [shape: f32[108,1], index: 2, kind: input, shape index: {}]   ;;  %s3466_s3 = inlined_call_operand.vmem [shape: bf16[2,108,15], index: 3, kind: output, shape index: {}]  }
   0x1 LB: > { %s2048_s13 = sadd.s32 4294967295, %s2766_s12   ;;  %p2052_p0 = scmp.ge.s32.totalorder %s2766_s12, 1  ;;  %s2766_s12 = sphi %s2800_s12, %s13_s12  }
   0x2   : > { %p136_p1 = scmp.lt.s32.totalorder %s2766_s12, 3 }
   0x4   : > { %p137_p2 = pnand %p2052_p0, %p136_p1 }
   0x5   : > { %p159_p3 = scmp.lt.s32.totalorder (!%p137_p2), %s2048_s13, 1  ;;  %s2771_s18 = smov (!%p137_p2), 123  }
   0x6   : > { %140 = sbr.rel (%p137_p2) target bundleno = 591 (0x24f), region = 32  ;;  %s2772_s19 = smov (!%p137_p2), 127  }
   0x7   : > { %s2773_s20 = smov (!%p137_p2), 122   ;;  %s2774_s21 = smov (!%p137_p2), 126  }
   0x8   : > { %s2775_s22 = smov (!%p137_p2), 118   ;;  %s2776_s23 = smov (!%p137_p2), 121  }
   0x9   : > { %s2777_s24 = smov (!%p137_p2), 117   ;;  %s2778_s25 = smov (!%p137_p2), 116  }
   0xb   : > { %v238_v0 = vlaneseq  ;;  %v2768_v1 = vmov 1983009808   ;;  %v2769_v3 = vmov 0.0   ;;  %s3468_s13 = smov (!%p159_p3, %s2048_s13), 1  ;;  %vm2770_vm0 = vmmov 0   ;;  %v2697_v12 = vld [vmem:[%s3464_s1 + $0x38] sm:$0xff]  }
   0xc   : > { %v236_v2 = vunpack.c.l.s4 %v2768_v1  ;;  %2402 = vmatprep.subr.bf16.mxu0 %v2769_v3  ;;  %2672 = vmatprep.subr.bf16.mxu1 %v2769_v3  ;;  %s2053_s14 = sshll.u32 %s3468_s13, 1  ;;  %vm266_vm1 = vcmask 1041408   ;;  %v2698_v13 = vld [vmem:[%s3464_s1 + $0x58] sm:$0xff]   ;;  %vm244_vm2 = vcmask 31744   ;;  %v2699_v17 = vld [vmem:[%s3464_s1 + $0x40] sm:$0xff]   ;;  %v2701_v19 = vld [vmem:[%s3464_s1 + $0x48] sm:$0xff]  }
   0xd   : > { %v239_v4 = vshrl.u32 %v238_v0, 7  ;;  %2404 = vmatprep.mubr.msk.bf16.mxu0 %vm2770_vm0, %v2769_v3  ;;  %2420 = vmatprep.mubr.msk.bf16.mxu1 %vm2770_vm0, %v2769_v3  ;;  %s162_s17 = scalar_lea.vmem %s3463_s0, %s2053_s14  ;;  %v2700_v18 = vld [vmem:[%s3464_s1 + $0x60] sm:$0xff]   ;;  %v2702_v20 = vld [vmem:[%s3464_s1 + $0x68] sm:$0x3f]   ;;  %v2703_v22 = vld [vmem:[%s3464_s1 + $0x50] sm:$0xff]   ;;  %v2779_v1 = vmov 0  }
   0xe   : > { %v237_v5 = vunpack.c.0.s8 %v236_v2  ;;  %v183_v7 = vld [vmem:[%s162_s17] sm:$0x3]  ;;  %v2705_v26 = vld [vmem:[%s3464_s1 + $0x8] sm:$0xff]   ;;  %v2706_v27 = vld [vmem:[%s3464_s1 + $0x70] sm:$0xff]   ;;  %2695 = vset.pattern.permute.xlu0 %v2779_v1  ;;  %2696 = vset.pattern.permute.xlu1 %v2779_v1  ;;  %s2674_s30 = smul.u32 56, %s3468_s13  ;;  %vm1977_vm3 = vcmask 117760  }
   0xf   : > { %v2118_v8 = vld.sshfl [vmem:[%s162_s17] sm:$0x3 pattern:$0x76325410]  ;;  %v416_v15 = vsel %vm266_vm1, %v183_v7, 0  ;;  %v2707_v29 = vld [vmem:[%s3464_s1 + $0x10] sm:$0xff]  }
  0x10   : > { %v240_v6 = vsub.s32 %v237_v5, %v239_v4  ;;  %754 = vrot.lane.b32.xlu1 %v2118_v8, %s2771_s18  ;;  %v2704_v23 = vld [vmem:[%s3464_s1] sm:$0xff]   ;;  %v2708_v30 = vld [vmem:[%s3464_s1 + $0x78] sm:$0xff]   ;;  %v2712_v34 = vld [vmem:[%s3464_s1 + $0x88] sm:$0xff]   ;;  %s3397_s6 = scalar_lea.vmem %s3466_s3, %s2674_s30  ;;  %vm1991_vm4 = vcmask 115712  }
  0x11   : > { %v2709_v31 = vld [vmem:[%s3464_s1 + $0x18] sm:$0xff]   ;;  %v2710_v32 = vld [vmem:[%s3464_s1 + $0x80] sm:$0xff]   ;;  %v2713_v35 = vld [vmem:[%s3464_s1 + $0x28] sm:$0xff]  }
  0x12   : > { %v241_v9 = vrot.slane %v183_v7, %v240_v6  ;;  %v2711_v33 = vld [vmem:[%s3464_s1 + $0x20] sm:$0xff]   ;;  %v2714_v36 = vld [vmem:[%s3464_s1 + $0x90] sm:$0xff]   ;;  %v2716_v38 = vld [vmem:[%s3464_s1 + $0x98] sm:$0xff]  }
  0x13   : > { %v2715_v37 = vld [vmem:[%s3464_s1 + $0x30] sm:$0x3f]   ;;  %v2717_v39 = vld [vmem:[%s3464_s1 + $0xa0] sm:$0x3f]   ;;  %v2718_v40 = vld [vmem:[%s3464_s1 + $0xa8] sm:$0xff]  }
  0x14   : > { %242 = vrot.lane.b32.xlu0 %v241_v9, %s2772_s19  ;;  %942 = vrot.lane.b32.xlu1 %v2118_v8, %s2773_s20  ;;  %v2719_v44 = vld [vmem:[%s3464_s1 + $0xb0] sm:$0xff]   ;;  %v2720_v45 = vld [vmem:[%s3464_s1 + $0xe0] sm:$0xff]  }
  0x15   : > { %v2721_v47 = vld [vmem:[%s3464_s1 + $0xb8] sm:$0xff]   ;;  %v2722_v48 = vld [vmem:[%s3464_s1 + $0xe8] sm:$0xff]   ;;  %v2723_v49 = vld [vmem:[%s3464_s1 + $0xc0] sm:$0xff]  }
  0x16   : > { %v2724_v50 = vld [vmem:[%s3464_s1 + $0xf0] sm:$0xff]   ;;  %v2725_v51 = vld [vmem:[%s3464_s1 + $0xc8] sm:$0xff]   ;;  %v2726_v52 = vld [vmem:[%s3464_s1 + $0xf8] sm:$0xff]  }
  0x17   : > { %v2727_v53 = vld [vmem:[%s3464_s1 + $0xd0] sm:$0xff]   ;;  %v2728_v54 = vld [vmem:[%s3464_s1 + $0x100] sm:$0xff]   ;;  %v2729_v55 = vld [vmem:[%s3464_s1 + $0xd8] sm:$0x3f]  }
  0x18   : > { %566 = vrot.lane.b32.xlu0 %v2118_v8, %s2774_s21  ;;  %1318 = vrot.lane.b32.xlu1 %v2118_v8, %s2775_s22  ;;  %v2730_v56 = vld [vmem:[%s3464_s1 + $0x108] sm:$0xff]   ;;  %v2731_v57 = vld [vmem:[%s3464_s1 + $0x110] sm:$0x3f]  }
  0x19   : > { %v2732_v58 = vld [vmem:[%s3464_s1 + $0x118] sm:$0xff]   ;;  %v2733_v62 = vld [vmem:[%s3464_s1 + $0x120] sm:$0xff]   ;;  %v2734_v63 = vld [vmem:[%s3464_s1 + $0x150] sm:$0xff]  }
  0x1a   : > { %v1823_v2 = vld [vmem:[%s3465_s2] sm:$0xff]  ;;  %v1824_v4 = vld [vmem:[%s3465_s2 + $0x8] sm:$0xff]  ;;  %v2736_v6 = vld [vmem:[%s3464_s1 + $0x158] sm:$0xff]  }
  0x1b   : > { %v2735_v5 = vld [vmem:[%s3464_s1 + $0x128] sm:$0xff]   ;;  %v1825_v7 = vld [vmem:[%s3465_s2 + $0x10] sm:$0xff]  ;;  %v1827_v9 = vld [vmem:[%s3465_s2 + $0x20] sm:$0xff] }
  0x1c   : > { %1130 = vrot.lane.b32.xlu0 %v2118_v8, %s2776_s23  ;;  %1694 = vrot.lane.b32.xlu1 %v2118_v8, %s2778_s25 }
  0x20   : > { %1506 = vrot.lane.b32.xlu0 %v2118_v8, %s2777_s24  ;;  %1844 = vperm.xlu1 %2696, %v1824_v4   ;;  %v1826_v8 = vld [vmem:[%s3465_s2 + $0x18] sm:$0xff] }
  0x21   : > { %v2754_v4 = vld [vmem:[%s3464_s1 + $0x1d8] sm:$0xff]  }
  0x24   : > { %1839 = vperm.xlu0 %2695, %v1823_v2   ;;  %1849 = vperm.xlu1 %2696, %v1825_v7   ;;  %v2753_v2 = vld [vmem:[%s3464_s1 + $0x1a8] sm:$0xff]  }
  0x28   : > { %1854 = vperm.xlu0 %2695, %v1826_v8   ;;  %1859 = vperm.xlu1 %2696, %v1827_v9  }
  0x82   : > { %v755_v21 = vpop.permute.xlu1 %754 }
  0x83   : > { %v778_v24 = vsel %vm266_vm1, %v755_v21, 0  ;;  %v1835_v21 = vld [vmem:[%s3465_s2 + $0x60] sm:$0xff] }
  0x86   : > { %v243_v10 = vpop.permute.xlu0 %242  ;;  %v943_v25 = vpop.permute.xlu1 %942 }
  0x87   : > { %v268_v11 = vsel %vm266_vm1, %v243_v10, 0  ;;  %v966_v28 = vsel %vm266_vm1, %v943_v25, 0  ;;  %v1828_v10 = vld [vmem:[%s3465_s2 + $0x28] sm:$0xff] }
  0x88   : > { %2403 = vmatpush3.bf16.msra.mxu0 %v268_v11  ;;  %2673 = vmatpush3.bf16.msra.mxu1 %v268_v11  ;;  %v2737_v11 = vld [vmem:[%s3464_s1 + $0x130] sm:$0xff]   ;;  %v2743_v25 = vld [vmem:[%s3464_s1 + $0x148] sm:$0x3f]  }
  0x89   : > { %2462 = vmatprep.subr.bf16.mxu0 %v2769_v3  ;;  %2432 = vmatprep.subr.bf16.mxu1 %v2769_v3 }
  0x8a   : > { %v567_v14 = vpop.permute.xlu0 %566  ;;  %v1319_v43 = vpop.permute.xlu1 %1318  ;;  %1864 = vperm.xlu0 %2695, %v1828_v10  }
  0x8b   : > { %v590_v16 = vsel %vm266_vm1, %v567_v14, 0  ;;  %2405 = vmatmul.mubr.msk.bf16.vlgmr.msra.gmra.mxu0 %vm244_vm2, %v2697_v12  ;;  %2421 = vmatmul.mubr.msk.bf16.vlgmr.msra.gmra.mxu1 %vm244_vm2, %v2698_v13  ;;  %v1342_v46 = vsel %vm266_vm1, %v1319_v43, 0  ;;  %v2738_v12 = vld [vmem:[%s3464_s1 + $0x160] sm:$0xff]   ;;  %v1829_v13 = vld [vmem:[%s3465_s2 + $0x30] sm:$0xff]  ;;  %v1830_v14 = vld [vmem:[%s3465_s2 + $0x38] sm:$0xff] }
  0x8c   : > { %2463 = vmatpush3.bf16.msra.mxu0 %v590_v16  ;;  %2408 = vmatprep.mubr.msk.bf16.mxu0 %vm2770_vm0, %v2769_v3  ;;  %v1832_v16 = vld [vmem:[%s3465_s2 + $0x48] sm:$0xff] }
  0x8d   : > { %2424 = vmatprep.mubr.msk.bf16.mxu1 %vm2770_vm0, %v2769_v3  ;;  %2433 = vmatpush3.bf16.msra.mxu1 %v416_v15  ;;  %v1831_v15 = vld [vmem:[%s3465_s2 + $0x40] sm:$0xff] }
  0x8e   : > { %2492 = vmatprep.subr.bf16.mxu1 %v2769_v3  ;;  %2522 = vmatprep.subr.bf16.mxu0 %v2769_v3  ;;  %v1131_v41 = vpop.permute.xlu0 %1130  ;;  %v1695_v61 = vpop.permute.xlu1 %1694 }
  0x8f   : > { %v1154_v42 = vsel %vm266_vm1, %v1131_v41, 0  ;;  %v1718_v0 = vsel %vm266_vm1, %v1695_v61, 0  ;;  %1869 = vperm.xlu1 %2696, %v1829_v13   ;;  %1874 = vperm.xlu0 %2695, %v1830_v14  }
  0x92   : > { %v1507_v59 = vpop.permute.xlu0 %1506 }
  0x93   : > { %2409 = vmatmul.mubr.msk.bf16.gmra.mxu0 %vm244_vm2, %v2699_v17  ;;  %2425 = vmatmul.mubr.msk.bf16.gmra.mxu1 %vm244_vm2, %v2700_v18  ;;  %v1530_v60 = vsel %vm266_vm1, %v1507_v59, 0  ;;  %v2739_v17 = vld [vmem:[%s3464_s1 + $0x138] sm:$0xff]   ;;  %v2740_v18 = vld [vmem:[%s3464_s1 + $0x168] sm:$0xff]  }
  0x94   : > { %2412 = vmatprep.mubr.msk.bf16.mxu0 %vm2770_vm0, %v2769_v3  ;;  %2428 = vmatprep.mubr.msk.bf16.mxu1 %vm2770_vm0, %v2769_v3 }
  0x95   : > { %1879 = vperm.xlu1 %2696, %v1831_v15   ;;  %1884 = vperm.xlu0 %2695, %v1832_v16   ;;  %v2755_v16 = vld [vmem:[%s3464_s1 + $0x1b0] sm:$0xff]  }
  0x9b   : > { %2413 = vmatmul.mubr.msk.bf16.gmra.mxu0 %vm244_vm2, %v2701_v19  ;;  %2429 = vmatmul.mubr.msk.bf16.gmra.mxu1 %vm244_vm2, %v2702_v20  ;;  %v1833_v19 = vld [vmem:[%s3465_s2 + $0x50] sm:$0xff]  ;;  %v1834_v20 = vld [vmem:[%s3465_s2 + $0x58] sm:$0xff] }
  0x9c   : > { %2416 = vmatprep.mubr.msk.bf16.mxu0 %vm2770_vm0, %v2769_v3  ;;  %2434 = vmatprep.mubr.msk.bf16.mxu1 %vm2770_vm0, %v2769_v3 }
  0x9d   : > { %1889 = vperm.xlu1 %2696, %v1833_v19   ;;  %1894 = vperm.xlu0 %2695, %v1834_v20  }
  0xa1   : > { %1899 = vperm.xlu1 %2696, %v1835_v21  }
  0xa3   : > { %2417 = vmatmul.mubr.msk.bf16.gmra.mxu0 %vm244_vm2, %v2703_v22  ;;  %2435 = vmatmul.mubr.msk.bf16.vlgmr.msra.gmra.mxu1 %vm244_vm2, %v2704_v23  ;;  %v1836_v22 = vld [vmem:[%s3465_s2 + $0x68] sm:$0xf]  ;;  %v2741_v23 = vld [vmem:[%s3464_s1 + $0x140] sm:$0xff]  }
  0xa4   : > { %2493 = vmatpush3.bf16.msra.mxu1 %v778_v24  ;;  %2438 = vmatprep.mubr.msk.bf16.mxu1 %vm2770_vm0, %v2769_v3  ;;  %v2742_v24 = vld [vmem:[%s3464_s1 + $0x170] sm:$0xff]  }
  0xa5   : > { %2464 = vmatprep.mubr.msk.bf16.mxu0 %vm2770_vm0, %v2769_v3  ;;  %2552 = vmatprep.subr.bf16.mxu1 %v2769_v3 }
  0xa6   : > { %1904 = vperm.xlu0 %2695, %v1836_v22  }
  0xab   : > { %2439 = vmatmul.mubr.msk.bf16.gmra.mxu1 %vm244_vm2, %v2705_v26  ;;  %2465 = vmatmul.mubr.msk.bf16.vlgmr.msra.gmra.mxu0 %vm244_vm2, %v2706_v27  ;;  %v2744_v26 = vld [vmem:[%s3464_s1 + $0x178] sm:$0xff]   ;;  %v2745_v27 = vld [vmem:[%s3464_s1 + $0x180] sm:$0x3f]  }
  0xac   : > { %2523 = vmatpush3.bf16.msra.mxu0 %v966_v28  ;;  %2442 = vmatprep.mubr.msk.bf16.mxu1 %vm2770_vm0, %v2769_v3  ;;  %v2746_v28 = vld [vmem:[%s3464_s1 + $0x188] sm:$0xff]  }
  0xad   : > { %2468 = vmatprep.mubr.msk.bf16.mxu0 %vm2770_vm0, %v2769_v3  ;;  %2582 = vmatprep.subr.bf16.mxu0 %v2769_v3 }
  0xb3   : > { %2443 = vmatmul.mubr.msk.bf16.gmra.mxu1 %vm244_vm2, %v2707_v29  ;;  %2469 = vmatmul.mubr.msk.bf16.gmra.mxu0 %vm244_vm2, %v2708_v30 }
  0xb4   : > { %2446 = vmatprep.mubr.msk.bf16.mxu1 %vm2770_vm0, %v2769_v3  ;;  %2472 = vmatprep.mubr.msk.bf16.mxu0 %vm2770_vm0, %v2769_v3 }
  0xbb   : > { %2447 = vmatmul.mubr.msk.bf16.gmra.mxu1 %vm244_vm2, %v2709_v31  ;;  %2473 = vmatmul.mubr.msk.bf16.gmra.mxu0 %vm244_vm2, %v2710_v32 }
  0xbc   : > { %2450 = vmatprep.mubr.msk.bf16.mxu1 %vm2770_vm0, %v2769_v3  ;;  %2476 = vmatprep.mubr.msk.bf16.mxu0 %vm2770_vm0, %v2769_v3 }
  0xc3   : > { %2451 = vmatmul.mubr.msk.bf16.gmra.mxu1 %vm244_vm2, %v2711_v33  ;;  %2477 = vmatmul.mubr.msk.bf16.gmra.mxu0 %vm244_vm2, %v2712_v34 }
  0xc4   : > { %2454 = vmatprep.mubr.msk.bf16.mxu1 %vm2770_vm0, %v2769_v3  ;;  %2480 = vmatprep.mubr.msk.bf16.mxu0 %vm2770_vm0, %v2769_v3 }
  0xcb   : > { %2455 = vmatmul.mubr.msk.bf16.gmra.mxu1 %vm244_vm2, %v2713_v35  ;;  %2481 = vmatmul.mubr.msk.bf16.gmra.mxu0 %vm244_vm2, %v2714_v36  ;;  %v2747_v35 = vld [vmem:[%s3464_s1 + $0x190] sm:$0xff]   ;;  %v2748_v36 = vld [vmem:[%s3464_s1 + $0x1c0] sm:$0xff]  }
  0xcc   : > { %2458 = vmatprep.mubr.msk.bf16.mxu1 %vm2770_vm0, %v2769_v3  ;;  %2484 = vmatprep.mubr.msk.bf16.mxu0 %vm2770_vm0, %v2769_v3 }
  0xd3   : > { %2459 = vmatmul.mubr.msk.bf16.gmra.mxu1 %vm244_vm2, %v2715_v37  ;;  %2485 = vmatmul.mubr.msk.bf16.gmra.mxu0 %vm244_vm2, %v2716_v38 }
  0xd4   : > { %2488 = vmatprep.mubr.msk.bf16.mxu0 %vm2770_vm0, %v2769_v3  ;;  %2494 = vmatprep.mubr.msk.bf16.mxu1 %vm2770_vm0, %v2769_v3 }
  0xdb   : > { %2489 = vmatmul.mubr.msk.bf16.gmra.mxu0 %vm244_vm2, %v2717_v39  ;;  %2495 = vmatmul.mubr.msk.bf16.vlgmr.msra.gmra.mxu1 %vm244_vm2, %v2718_v40 }
  0xdc   : > { %2498 = vmatprep.mubr.msk.bf16.mxu1 %vm2770_vm0, %v2769_v3  ;;  %2524 = vmatprep.mubr.msk.bf16.mxu0 %vm2770_vm0, %v2769_v3 }
  0xdd   : > { %2553 = vmatpush3.bf16.msra.mxu1 %v1154_v42 }
  0xde   : > { %2612 = vmatprep.subr.bf16.mxu1 %v2769_v3 }
  0xe3   : > { %2499 = vmatmul.mubr.msk.bf16.gmra.mxu1 %vm244_vm2, %v2719_v44  ;;  %2525 = vmatmul.mubr.msk.bf16.vlgmr.msra.gmra.mxu0 %vm244_vm2, %v2720_v45  ;;  %v2749_v45 = vld [vmem:[%s3464_s1 + $0x198] sm:$0xff]  }
  0xe4   : > { %2583 = vmatpush3.bf16.msra.mxu0 %v1342_v46  ;;  %2502 = vmatprep.mubr.msk.bf16.mxu1 %vm2770_vm0, %v2769_v3  ;;  %v2750_v46 = vld [vmem:[%s3464_s1 + $0x1c8] sm:$0xff]  }
  0xe5   : > { %2528 = vmatprep.mubr.msk.bf16.mxu0 %vm2770_vm0, %v2769_v3  ;;  %2642 = vmatprep.subr.bf16.mxu0 %v2769_v3 }
  0xeb   : > { %2503 = vmatmul.mubr.msk.bf16.gmra.mxu1 %vm244_vm2, %v2721_v47  ;;  %2529 = vmatmul.mubr.msk.bf16.gmra.mxu0 %vm244_vm2, %v2722_v48 }
  0xec   : > { %2506 = vmatprep.mubr.msk.bf16.mxu1 %vm2770_vm0, %v2769_v3  ;;  %2532 = vmatprep.mubr.msk.bf16.mxu0 %vm2770_vm0, %v2769_v3 }
  0xf3   : > { %2507 = vmatmul.mubr.msk.bf16.gmra.mxu1 %vm244_vm2, %v2723_v49  ;;  %2533 = vmatmul.mubr.msk.bf16.gmra.mxu0 %vm244_vm2, %v2724_v50 }
  0xf4   : > { %2510 = vmatprep.mubr.msk.bf16.mxu1 %vm2770_vm0, %v2769_v3  ;;  %2536 = vmatprep.mubr.msk.bf16.mxu0 %vm2770_vm0, %v2769_v3 }
  0xfb   : > { %2511 = vmatmul.mubr.msk.bf16.gmra.mxu1 %vm244_vm2, %v2725_v51  ;;  %2537 = vmatmul.mubr.msk.bf16.gmra.mxu0 %vm244_vm2, %v2726_v52 }
  0xfc   : > { %2514 = vmatprep.mubr.msk.bf16.mxu1 %vm2770_vm0, %v2769_v3  ;;  %2540 = vmatprep.mubr.msk.bf16.mxu0 %vm2770_vm0, %v2769_v3 }
 0x103   : > { %2515 = vmatmul.mubr.msk.bf16.gmra.mxu1 %vm244_vm2, %v2727_v53  ;;  %2541 = vmatmul.mubr.msk.bf16.gmra.mxu0 %vm244_vm2, %v2728_v54 }
 0x104   : > { %2518 = vmatprep.mubr.msk.bf16.mxu1 %vm2770_vm0, %v2769_v3  ;;  %2544 = vmatprep.mubr.msk.bf16.mxu0 %vm2770_vm0, %v2769_v3 }
 0x10b   : > { %2519 = vmatmul.mubr.msk.bf16.gmra.mxu1 %vm244_vm2, %v2729_v55  ;;  %2545 = vmatmul.mubr.msk.bf16.gmra.mxu0 %vm244_vm2, %v2730_v56  ;;  %v2751_v55 = vld [vmem:[%s3464_s1 + $0x1a0] sm:$0xff]   ;;  %v2752_v56 = vld [vmem:[%s3464_s1 + $0x1d0] sm:$0xff]  }
 0x10c   : > { %2548 = vmatprep.mubr.msk.bf16.mxu0 %vm2770_vm0, %v2769_v3  ;;  %2554 = vmatprep.mubr.msk.bf16.mxu1 %vm2770_vm0, %v2769_v3 }
 0x113   : > { %2549 = vmatmul.mubr.msk.bf16.gmra.mxu0 %vm244_vm2, %v2731_v57  ;;  %2555 = vmatmul.mubr.msk.bf16.vlgmr.msra.gmra.mxu1 %vm244_vm2, %v2732_v58 }
 0x114   : > { %2558 = vmatprep.mubr.msk.bf16.mxu1 %vm2770_vm0, %v2769_v3  ;;  %2584 = vmatprep.mubr.msk.bf16.mxu0 %vm2770_vm0, %v2769_v3 }
 0x115   : > { %2613 = vmatpush3.bf16.msra.mxu1 %v1530_v60 }
 0x11b   : > { %2559 = vmatmul.mubr.msk.bf16.gmra.mxu1 %vm244_vm2, %v2733_v62  ;;  %2585 = vmatmul.mubr.msk.bf16.vlgmr.msra.gmra.mxu0 %vm244_vm2, %v2734_v63 }
 0x11c   : > { %2643 = vmatpush3.bf16.msra.mxu0 %v1718_v0  ;;  %2562 = vmatprep.mubr.msk.bf16.mxu1 %vm2770_vm0, %v2769_v3 }
 0x11d   : > { %2588 = vmatprep.mubr.msk.bf16.mxu0 %vm2770_vm0, %v2769_v3 }
 0x123   : > { %2563 = vmatmul.mubr.msk.bf16.gmra.mxu1 %vm244_vm2, %v2735_v5  ;;  %2589 = vmatmul.mubr.msk.bf16.gmra.mxu0 %vm244_vm2, %v2736_v6 }
 0x124   : > { %2566 = vmatprep.mubr.msk.bf16.mxu1 %vm2770_vm0, %v2769_v3  ;;  %2592 = vmatprep.mubr.msk.bf16.mxu0 %vm2770_vm0, %v2769_v3 }
 0x12b   : > { %2567 = vmatmul.mubr.msk.bf16.gmra.mxu1 %vm244_vm2, %v2737_v11  ;;  %2593 = vmatmul.mubr.msk.bf16.gmra.mxu0 %vm244_vm2, %v2738_v12 }
 0x12c   : > { %2570 = vmatprep.mubr.msk.bf16.mxu1 %vm2770_vm0, %v2769_v3  ;;  %2596 = vmatprep.mubr.msk.bf16.mxu0 %vm2770_vm0, %v2769_v3 }
 0x133   : > { %2571 = vmatmul.mubr.msk.bf16.gmra.mxu1 %vm244_vm2, %v2739_v17  ;;  %2597 = vmatmul.mubr.msk.bf16.gmra.mxu0 %vm244_vm2, %v2740_v18  ;;  %v2756_v17 = vld [vmem:[%s3464_s1 + $0x1e0] sm:$0xff]  }
 0x134   : > { %2574 = vmatprep.mubr.msk.bf16.mxu1 %vm2770_vm0, %v2769_v3  ;;  %2600 = vmatprep.mubr.msk.bf16.mxu0 %vm2770_vm0, %v2769_v3 }
 0x13b   : > { %2575 = vmatmul.mubr.msk.bf16.gmra.mxu1 %vm244_vm2, %v2741_v23  ;;  %2601 = vmatmul.mubr.msk.bf16.gmra.mxu0 %vm244_vm2, %v2742_v24 }
 0x13c   : > { %2578 = vmatprep.mubr.msk.bf16.mxu1 %vm2770_vm0, %v2769_v3  ;;  %2604 = vmatprep.mubr.msk.bf16.mxu0 %vm2770_vm0, %v2769_v3 }
 0x143   : > { %2579 = vmatmul.mubr.msk.bf16.gmra.mxu1 %vm244_vm2, %v2743_v25  ;;  %2605 = vmatmul.mubr.msk.bf16.gmra.mxu0 %vm244_vm2, %v2744_v26 }
 0x144   : > { %2608 = vmatprep.mubr.msk.bf16.mxu0 %vm2770_vm0, %v2769_v3  ;;  %2614 = vmatprep.mubr.msk.bf16.mxu1 %vm2770_vm0, %v2769_v3 }
 0x14b   : > { %v304_v29 = vpop.f32.mrf.mxu0  ;;  %v3173_v30 = vpop.f32.mrf.mxu1  ;;  %2609 = vmatmul.mubr.msk.bf16.gmra.mxu0 %vm244_vm2, %v2745_v27  ;;  %2615 = vmatmul.mubr.msk.bf16.vlgmr.msra.gmra.mxu1 %vm244_vm2, %v2746_v28 }
 0x14c   : > { %2618 = vmatprep.mubr.msk.bf16.mxu1 %vm2770_vm0, %v2769_v3  ;;  %2644 = vmatprep.mubr.msk.bf16.mxu0 %vm2770_vm0, %v2769_v3 }
 0x14d   : > { %v2406_v31 = vpop.f32.mrf.mxu0  ;;  %v2422_v32 = vpop.f32.mrf.mxu1 }
 0x14e   : > { %v2757_v31 = vld [vmem:[%s3464_s1 + $0x1b8] sm:$0x3f]   ;;  %v2758_v32 = vld [vmem:[%s3464_s1 + $0x1e8] sm:$0xff]  }
 0x14f   : > { %v307_v33 = vpop.f32.mrf.mxu0  ;;  %v3181_v34 = vpop.f32.mrf.mxu1 }
 0x151   : > { %v2407_v37 = vpop.f32.mrf.mxu0  ;;  %v2423_v38 = vpop.f32.mrf.mxu1 }
 0x153   : > { %v312_v39 = vpop.f32.mrf.mxu0  ;;  %v3189_v40 = vpop.f32.mrf.mxu1  ;;  %2619 = vmatmul.mubr.msk.bf16.gmra.mxu1 %vm244_vm2, %v2747_v35  ;;  %2645 = vmatmul.mubr.msk.bf16.vlgmr.msra.gmra.mxu0 %vm244_vm2, %v2748_v36 }
 0x154   : > { %2622 = vmatprep.mubr.msk.bf16.mxu1 %vm2770_vm0, %v2769_v3  ;;  %2648 = vmatprep.mubr.msk.bf16.mxu0 %vm2770_vm0, %v2769_v3 }
 0x155   : > { %v2410_v41 = vpop.f32.mrf.mxu0  ;;  %v2426_v42 = vpop.f32.mrf.mxu1 }
 0x157   : > { %v315_v43 = vpop.f32.mrf.mxu0  ;;  %v3197_v44 = vpop.f32.mrf.mxu1 }
 0x159   : > { %v2411_v47 = vpop.f32.mrf.mxu0  ;;  %v2427_v48 = vpop.f32.mrf.mxu1 }
 0x15a   : > { %v2759_v48 = vld [vmem:[%s3464_s1 + $0x1f0] sm:$0x3f]  }
 0x15b   : > { %v320_v49 = vpop.f32.mrf.mxu0  ;;  %v3205_v50 = vpop.f32.mrf.mxu1  ;;  %2623 = vmatmul.mubr.msk.bf16.gmra.mxu1 %vm244_vm2, %v2749_v45  ;;  %2649 = vmatmul.mubr.msk.bf16.gmra.mxu0 %vm244_vm2, %v2750_v46 }
 0x15c   : > { %2626 = vmatprep.mubr.msk.bf16.mxu1 %vm2770_vm0, %v2769_v3  ;;  %2652 = vmatprep.mubr.msk.bf16.mxu0 %vm2770_vm0, %v2769_v3 }
 0x15d   : > { %v2414_v51 = vpop.f32.mrf.mxu0  ;;  %v2430_v52 = vpop.f32.mrf.mxu1 }
 0x15f   : > { %v323_v53 = vpop.f32.mrf.mxu0  ;;  %v3213_v54 = vpop.f32.mrf.mxu1 }
 0x161   : > { %v2415_v57 = vpop.f32.mrf.mxu0  ;;  %v2431_v58 = vpop.f32.mrf.mxu1 }
 0x163   : > { %v328_v59 = vpop.f32.mrf.mxu0  ;;  %v452_v60 = vpop.f32.mrf.mxu1  ;;  %2627 = vmatmul.mubr.msk.bf16.gmra.mxu1 %vm244_vm2, %v2751_v55  ;;  %2653 = vmatmul.mubr.msk.bf16.gmra.mxu0 %vm244_vm2, %v2752_v56 }
 0x164   : > { %v453_v61 = vadd.f32 %v452_v60, %v304_v29  ;;  %2630 = vmatprep.mubr.msk.bf16.mxu1 %vm2770_vm0, %v2769_v3  ;;  %2656 = vmatprep.mubr.msk.bf16.mxu0 %vm2770_vm0, %v2769_v3 }
 0x165   : > { %v2418_v62 = vpop.f32.mrf.mxu0  ;;  %v2436_v63 = vpop.f32.mrf.mxu1 }
 0x167   : > { %v331_v0 = vpop.f32.mrf.mxu0  ;;  %v455_v1 = vpop.f32.mrf.mxu1 }
 0x168   : > { %v456_v5 = vadd.f32 %v455_v1, %v307_v33 }
 0x169   : > { %v2419_v6 = vpop.f32.mrf.mxu0  ;;  %v2437_v7 = vpop.f32.mrf.mxu1 }
 0x16b   : > { %v460_v8 = vpop.f32.mrf.mxu1  ;;  %v626_v9 = vpop.f32.mrf.mxu0  ;;  %2631 = vmatmul.mubr.msk.bf16.gmra.mxu1 %vm244_vm2, %v2753_v2  ;;  %2657 = vmatmul.mubr.msk.bf16.gmra.mxu0 %vm244_vm2, %v2754_v4 }
 0x16c   : > { %v461_v10 = vadd.f32 %v460_v8, %v312_v39  ;;  %v3235_v11 = vadd.f32 %v626_v9, %v453_v61  ;;  %2634 = vmatprep.mubr.msk.bf16.mxu1 %vm2770_vm0, %v2769_v3  ;;  %2660 = vmatprep.mubr.msk.bf16.mxu0 %vm2770_vm0, %v2769_v3 }
 0x16d   : > { %v2440_v12 = vpop.f32.mrf.mxu1  ;;  %v2466_v13 = vpop.f32.mrf.mxu0 }
 0x16f   : > { %v463_v14 = vpop.f32.mrf.mxu1  ;;  %v629_v15 = vpop.f32.mrf.mxu0 }
 0x170   : > { %v464_v18 = vadd.f32 %v463_v14, %v315_v43  ;;  %v3247_v19 = vadd.f32 %v629_v15, %v456_v5 }
 0x171   : > { %v2441_v20 = vpop.f32.mrf.mxu1  ;;  %v2467_v21 = vpop.f32.mrf.mxu0 }
 0x173   : > { %v468_v22 = vpop.f32.mrf.mxu1  ;;  %v634_v23 = vpop.f32.mrf.mxu0  ;;  %2635 = vmatmul.mubr.msk.bf16.gmra.mxu1 %vm244_vm2, %v2755_v16  ;;  %2661 = vmatmul.mubr.msk.bf16.gmra.mxu0 %vm244_vm2, %v2756_v17 }
 0x174   : > { %v469_v24 = vadd.f32 %v468_v22, %v320_v49  ;;  %v3251_v25 = vadd.f32 %v634_v23, %v461_v10  ;;  %2638 = vmatprep.mubr.msk.bf16.mxu1 %vm2770_vm0, %v2769_v3  ;;  %2664 = vmatprep.mubr.msk.bf16.mxu0 %vm2770_vm0, %v2769_v3 }
 0x175   : > { %v2444_v26 = vpop.f32.mrf.mxu1  ;;  %v2470_v27 = vpop.f32.mrf.mxu0 }
 0x177   : > { %v471_v28 = vpop.f32.mrf.mxu1  ;;  %v637_v29 = vpop.f32.mrf.mxu0 }
 0x178   : > { %v472_v33 = vadd.f32 %v471_v28, %v323_v53  ;;  %v3263_v35 = vadd.f32 %v637_v29, %v464_v18 }
 0x179   : > { %v2445_v36 = vpop.f32.mrf.mxu1  ;;  %v2471_v37 = vpop.f32.mrf.mxu0 }
 0x17b   : > { %v476_v38 = vpop.f32.mrf.mxu1  ;;  %v642_v39 = vpop.f32.mrf.mxu0  ;;  %2639 = vmatmul.mubr.msk.bf16.gmra.mxu1 %vm244_vm2, %v2757_v31  ;;  %2665 = vmatmul.mubr.msk.bf16.gmra.mxu0 %vm244_vm2, %v2758_v32 }
 0x17c   : > { %v477_v41 = vadd.f32 %v476_v38, %v328_v59  ;;  %v3267_v42 = vadd.f32 %v642_v39, %v469_v24  ;;  %2668 = vmatprep.mubr.msk.bf16.mxu0 %vm2770_vm0, %v2769_v3 }
 0x17d   : > { %v2448_v43 = vpop.f32.mrf.mxu1  ;;  %v2474_v45 = vpop.f32.mrf.mxu0 }
 0x17f   : > { %v479_v46 = vpop.f32.mrf.mxu1  ;;  %v645_v47 = vpop.f32.mrf.mxu0 }
 0x180   : > { %v480_v49 = vadd.f32 %v479_v46, %v331_v0  ;;  %v3274_v51 = vadd.f32 %v645_v47, %v472_v33 }
 0x181   : > { %v2449_v52 = vpop.f32.mrf.mxu1  ;;  %v2475_v53 = vpop.f32.mrf.mxu0 }
 0x183   : > { %v484_v55 = vpop.f32.mrf.mxu1  ;;  %v650_v56 = vpop.f32.mrf.mxu0  ;;  %2669 = vmatmul.mubr.msk.bf16.gmra.mxu0 %vm244_vm2, %v2759_v48 }
 0x184   : > { %v485_v57 = vadd.f32 %v484_v55, %v3173_v30  ;;  %v3278_v3 = vadd.f32 %v650_v56, %v477_v41 }
 0x185   : > { %v2452_v58 = vpop.f32.mrf.mxu1  ;;  %v2478_v59 = vpop.f32.mrf.mxu0 }
 0x187   : > { %v487_v60 = vpop.f32.mrf.mxu1  ;;  %v653_v61 = vpop.f32.mrf.mxu0 }
 0x188   : > { %v488_v62 = vadd.f32 %v487_v60, %v3181_v34  ;;  %v3281_v63 = vadd.f32 %v653_v61, %v480_v49 }
 0x189   : > { %v2453_v0 = vpop.f32.mrf.mxu1  ;;  %v2479_v1 = vpop.f32.mrf.mxu0 }
 0x18b   : > { %v492_v2 = vpop.f32.mrf.mxu1  ;;  %v658_v4 = vpop.f32.mrf.mxu0 }
 0x18c   : > { %v493_v5 = vadd.f32 %v492_v2, %v3189_v40  ;;  %v3284_v6 = vadd.f32 %v658_v4, %v485_v57 }
 0x18d   : > { %v2456_v7 = vpop.f32.mrf.mxu1  ;;  %v2482_v30 = vpop.f32.mrf.mxu0 }
 0x18f   : > { %v495_v8 = vpop.f32.mrf.mxu1  ;;  %v661_v9 = vpop.f32.mrf.mxu0 }
 0x190   : > { %v496_v10 = vadd.f32 %v495_v8, %v3197_v44  ;;  %v3287_v12 = vadd.f32 %v661_v9, %v488_v62 }
 0x191   : > { %v2457_v13 = vpop.f32.mrf.mxu1  ;;  %v2483_v34 = vpop.f32.mrf.mxu0 }
 0x193   : > { %v500_v14 = vpop.f32.mrf.mxu1  ;;  %v666_v15 = vpop.f32.mrf.mxu0 }
 0x194   : > { %v501_v16 = vadd.f32 %v500_v14, %v3205_v50  ;;  %v3290_v17 = vadd.f32 %v666_v15, %v493_v5 }
 0x195   : > { %v2460_v18 = vpop.f32.mrf.mxu1  ;;  %v2486_v40 = vpop.f32.mrf.mxu0 }
 0x197   : > { %v503_v20 = vpop.f32.mrf.mxu1  ;;  %v669_v21 = vpop.f32.mrf.mxu0 }
 0x198   : > { %v504_v22 = vadd.f32 %v503_v20, %v3213_v54  ;;  %v3293_v23 = vadd.f32 %v669_v21, %v496_v10 }
 0x199   : > { %v2461_v24 = vpop.f32.mrf.mxu1  ;;  %v2487_v44 = vpop.f32.mrf.mxu0 }
 0x19b   : > { %v674_v26 = vpop.f32.mrf.mxu0  ;;  %v814_v27 = vpop.f32.mrf.mxu1 }
 0x19c   : > { %v3295_v28 = vadd.f32 %v674_v26, %v501_v16  ;;  %v869_v29 = vadd.f32 %v814_v27, %v3235_v11 }
 0x19d   : > { %v2490_v31 = vpop.f32.mrf.mxu0  ;;  %v2496_v50 = vpop.f32.mrf.mxu1 }
 0x19f   : > { %v677_v32 = vpop.f32.mrf.mxu0  ;;  %v817_v33 = vpop.f32.mrf.mxu1 }
 0x1a0   : > { %v3298_v36 = vadd.f32 %v677_v32, %v504_v22  ;;  %v870_v37 = vadd.f32 %v817_v33, %v3247_v19 }
 0x1a1   : > { %v2491_v38 = vpop.f32.mrf.mxu0  ;;  %v2497_v54 = vpop.f32.mrf.mxu1 }
 0x1a3   : > { %v822_v39 = vpop.f32.mrf.mxu1  ;;  %v1002_v41 = vpop.f32.mrf.mxu0 }
 0x1a4   : > { %v871_v43 = vadd.f32 %v822_v39, %v3251_v25  ;;  %v3302_v45 = vadd.f32 %v1002_v41, %v869_v29 }
 0x1a5   : > { %v2500_v46 = vpop.f32.mrf.mxu1  ;;  %v2526_v47 = vpop.f32.mrf.mxu0 }
 0x1a7   : > { %v825_v48 = vpop.f32.mrf.mxu1  ;;  %v1005_v11 = vpop.f32.mrf.mxu0 }
 0x1a8   : > { %v872_v49 = vadd.f32 %v825_v48, %v3263_v35  ;;  %v3305_v52 = vadd.f32 %v1005_v11, %v870_v37 }
 0x1a9   : > { %v2501_v53 = vpop.f32.mrf.mxu1  ;;  %v2527_v55 = vpop.f32.mrf.mxu0 }
 0x1ab   : > { %v830_v56 = vpop.f32.mrf.mxu1  ;;  %v1010_v19 = vpop.f32.mrf.mxu0 }
 0x1ac   : > { %v873_v57 = vadd.f32 %v830_v56, %v3267_v42  ;;  %v3308_v58 = vadd.f32 %v1010_v19, %v871_v43 }
 0x1ad   : > { %v2504_v59 = vpop.f32.mrf.mxu1  ;;  %v2530_v25 = vpop.f32.mrf.mxu0 }
 0x1af   : > { %v833_v60 = vpop.f32.mrf.mxu1  ;;  %v1013_v61 = vpop.f32.mrf.mxu0 }
 0x1b0   : > { %v874_v62 = vadd.f32 %v833_v60, %v3274_v51  ;;  %v3311_v0 = vadd.f32 %v1013_v61, %v872_v49 }
 0x1b1   : > { %v2505_v1 = vpop.f32.mrf.mxu1  ;;  %v2531_v35 = vpop.f32.mrf.mxu0 }
 0x1b3   : > { %v838_v2 = vpop.f32.mrf.mxu1  ;;  %v1018_v4 = vpop.f32.mrf.mxu0 }
 0x1b4   : > { %v875_v5 = vadd.f32 %v838_v2, %v3278_v3  ;;  %v3314_v7 = vadd.f32 %v1018_v4, %v873_v57 }
 0x1b5   : > { %v2508_v30 = vpop.f32.mrf.mxu1  ;;  %v2534_v42 = vpop.f32.mrf.mxu0 }
 0x1b7   : > { %v841_v8 = vpop.f32.mrf.mxu1  ;;  %v1021_v9 = vpop.f32.mrf.mxu0 }
 0x1b8   : > { %v876_v10 = vadd.f32 %v841_v8, %v3281_v63  ;;  %v3317_v13 = vadd.f32 %v1021_v9, %v874_v62 }
 0x1b9   : > { %v2509_v34 = vpop.f32.mrf.mxu1  ;;  %v2535_v51 = vpop.f32.mrf.mxu0 }
 0x1bb   : > { %v846_v14 = vpop.f32.mrf.mxu1  ;;  %v1026_v15 = vpop.f32.mrf.mxu0 }
 0x1bc   : > { %v877_v16 = vadd.f32 %v846_v14, %v3284_v6  ;;  %v3320_v18 = vadd.f32 %v1026_v15, %v875_v5 }
 0x1bd   : > { %v2512_v40 = vpop.f32.mrf.mxu1  ;;  %v2538_v3 = vpop.f32.mrf.mxu0 }
 0x1bf   : > { %v849_v20 = vpop.f32.mrf.mxu1  ;;  %v1029_v21 = vpop.f32.mrf.mxu0 }
 0x1c0   : > { %v878_v22 = vadd.f32 %v849_v20, %v3287_v12  ;;  %v3323_v24 = vadd.f32 %v1029_v21, %v876_v10 }
 0x1c1   : > { %v2513_v44 = vpop.f32.mrf.mxu1  ;;  %v2539_v63 = vpop.f32.mrf.mxu0 }
 0x1c3   : > { %v854_v26 = vpop.f32.mrf.mxu1  ;;  %v1034_v27 = vpop.f32.mrf.mxu0 }
 0x1c4   : > { %v879_v29 = vadd.f32 %v854_v26, %v3290_v17  ;;  %v3326_v31 = vadd.f32 %v1034_v27, %v877_v16 }
 0x1c5   : > { %v2516_v50 = vpop.f32.mrf.mxu1  ;;  %v2542_v6 = vpop.f32.mrf.mxu0 }
 0x1c7   : > { %v857_v32 = vpop.f32.mrf.mxu1  ;;  %v1037_v33 = vpop.f32.mrf.mxu0 }
 0x1c8   : > { %v880_v37 = vadd.f32 %v857_v32, %v3293_v23  ;;  %v3329_v38 = vadd.f32 %v1037_v33, %v878_v22 }
 0x1c9   : > { %v2517_v54 = vpop.f32.mrf.mxu1  ;;  %v2543_v12 = vpop.f32.mrf.mxu0 }
 0x1cb   : > { %v862_v39 = vpop.f32.mrf.mxu1  ;;  %v1042_v41 = vpop.f32.mrf.mxu0 }
 0x1cc   : > { %v881_v43 = vadd.f32 %v862_v39, %v3295_v28  ;;  %v3332_v46 = vadd.f32 %v1042_v41, %v879_v29 }
 0x1cd   : > { %v2520_v47 = vpop.f32.mrf.mxu1  ;;  %v2546_v17 = vpop.f32.mrf.mxu0 }
 0x1cf   : > { %v865_v48 = vpop.f32.mrf.mxu1  ;;  %v1045_v11 = vpop.f32.mrf.mxu0 }
 0x1d0   : > { %v882_v49 = vadd.f32 %v865_v48, %v3298_v36  ;;  %v3335_v53 = vadd.f32 %v1045_v11, %v880_v37 }
 0x1d1   : > { %v2521_v55 = vpop.f32.mrf.mxu1  ;;  %v2547_v23 = vpop.f32.mrf.mxu0 }
 0x1d3   : > { %v1050_v56 = vpop.f32.mrf.mxu0  ;;  %v1190_v19 = vpop.f32.mrf.mxu1 }
 0x1d4   : > { %v3337_v57 = vadd.f32 %v1050_v56, %v881_v43 }
 0x1d5   : > { %v2550_v59 = vpop.f32.mrf.mxu0  ;;  %v2556_v25 = vpop.f32.mrf.mxu1 }
 0x1d7   : > { %v1053_v60 = vpop.f32.mrf.mxu0  ;;  %v1193_v28 = vpop.f32.mrf.mxu1 }
 0x1d8   : > { %v3339_v61 = vadd.f32 %v1053_v60, %v882_v49 }
 0x1d9   : > { %v2551_v62 = vpop.f32.mrf.mxu0  ;;  %v2557_v1 = vpop.f32.mrf.mxu1 }
 0x1db   : > { %v3341_v35 = vpop.f32.mrf.mxu1  ;;  %v1378_v2 = vpop.f32.mrf.mxu0 }
 0x1dd   : > { %v2560_v36 = vpop.f32.mrf.mxu1  ;;  %v2586_v4 = vpop.f32.mrf.mxu0 }
 0x1df   : > { %v3343_v5 = vpop.f32.mrf.mxu1  ;;  %v1381_v30 = vpop.f32.mrf.mxu0 }
 0x1e1   : > { %v2561_v42 = vpop.f32.mrf.mxu1  ;;  %v2587_v8 = vpop.f32.mrf.mxu0 }
 0x1e3   : > { %v3345_v9 = vpop.f32.mrf.mxu1  ;;  %v3347_v10 = vpop.f32.mrf.mxu0 }
 0x1e5   : > { %v2564_v34 = vpop.f32.mrf.mxu1  ;;  %v2590_v51 = vpop.f32.mrf.mxu0 }
 0x1e6   : > { %v1245_v34 = vadd.f32 %v1190_v19, %v3302_v45  ;;  %v1247_v45 = vadd.f32 %v3341_v35, %v3308_v58  ;;  %v1248_v58 = vadd.f32 %v3343_v5, %v3311_v0 }
 0x1e7   : > { %v3349_v14 = vpop.f32.mrf.mxu1  ;;  %v3351_v15 = vpop.f32.mrf.mxu0 }
 0x1e9   : > { %v2565_v16 = vpop.f32.mrf.mxu1  ;;  %v2591_v40 = vpop.f32.mrf.mxu0 }
 0x1ea   : > { %v1433_v40 = vadd.f32 %v1378_v2, %v1245_v34  ;;  %v1435_v2 = vadd.f32 %v3347_v10, %v1247_v45 }
 0x1eb   : > { %v3353_v3 = vpop.f32.mrf.mxu1  ;;  %v3355_v20 = vpop.f32.mrf.mxu0 }
 0x1ed   : > { %v2568_v21 = vpop.f32.mrf.mxu1  ;;  %v2594_v22 = vpop.f32.mrf.mxu0 }
 0x1ef   : > { %v3357_v44 = vpop.f32.mrf.mxu1  ;;  %v3359_v63 = vpop.f32.mrf.mxu0 }
 0x1f1   : > { %v2569_v26 = vpop.f32.mrf.mxu1  ;;  %v2595_v27 = vpop.f32.mrf.mxu0 }
 0x1f2   : > { %v1246_v26 = vadd.f32 %v1193_v28, %v3305_v52 }
 0x1f3   : > { %v3361_v29 = vpop.f32.mrf.mxu1  ;;  %v3363_v50 = vpop.f32.mrf.mxu0 }
 0x1f5   : > { %v2572_v6 = vpop.f32.mrf.mxu1  ;;  %v2598_v32 = vpop.f32.mrf.mxu0 }
 0x1f6   : > { %v1840_v6 = vpop.permute.xlu0 %1839 }
 0x1f7   : > { %v3365_v33 = vpop.f32.mrf.mxu1  ;;  %v3367_v37 = vpop.f32.mrf.mxu0 }
 0x1f9   : > { %v2573_v54 = vpop.f32.mrf.mxu1  ;;  %v2599_v12 = vpop.f32.mrf.mxu0 }
 0x1fa   : > { %v1434_v12 = vadd.f32 %v1381_v30, %v1246_v26  ;;  %v1249_v26 = vadd.f32 %v3345_v9, %v3314_v7 }
 0x1fb   : > { %v3369_v39 = vpop.f32.mrf.mxu1  ;;  %v3371_v41 = vpop.f32.mrf.mxu0 }
 0x1fd   : > { %v2576_v43 = vpop.f32.mrf.mxu1  ;;  %v2602_v47 = vpop.f32.mrf.mxu0 }
 0x1fe   : > { %v1845_v47 = vpop.permute.xlu1 %1844 }
 0x1ff   : > { %v3373_v17 = vpop.f32.mrf.mxu1  ;;  %v3375_v48 = vpop.f32.mrf.mxu0 }
 0x201   : > { %v2577_v11 = vpop.f32.mrf.mxu1  ;;  %v2603_v49 = vpop.f32.mrf.mxu0 }
 0x203   : > { %v3377_v55 = vpop.f32.mrf.mxu1  ;;  %v3379_v23 = vpop.f32.mrf.mxu0 }
 0x205   : > { %v2580_v56 = vpop.f32.mrf.mxu1  ;;  %v2606_v59 = vpop.f32.mrf.mxu0 }
 0x207   : > { %v3381_v25 = vpop.f32.mrf.mxu1  ;;  %v3383_v60 = vpop.f32.mrf.mxu0 }
 0x209   : > { %v2581_v62 = vpop.f32.mrf.mxu1  ;;  %v2607_v1 = vpop.f32.mrf.mxu0 }
 0x20b   : > { %v3385_v36 = vpop.f32.mrf.mxu0  ;;  %v1566_v4 = vpop.f32.mrf.mxu1 }
 0x20c   : > { %v1621_v27 = vadd.f32 %v1566_v4, %v1433_v40 }
 0x20d   : > { %v2610_v42 = vpop.f32.mrf.mxu0  ;;  %v2616_v8 = vpop.f32.mrf.mxu1 }
 0x20e   : > { %v1850_v42 = vpop.permute.xlu1 %1849 }
 0x20f   : > { %v3388_v51 = vpop.f32.mrf.mxu0  ;;  %v1569_v16 = vpop.f32.mrf.mxu1 }
 0x210   : > { %v1622_v19 = vadd.f32 %v1569_v16, %v1434_v12  ;;  %v1436_v16 = vadd.f32 %v3351_v15, %v1248_v58  ;;  %v1855_v12 = vpop.permute.xlu0 %1854 }
 0x211   : > { %v2611_v21 = vpop.f32.mrf.mxu0  ;;  %v2617_v22 = vpop.f32.mrf.mxu1 }
 0x213   : > { %v1574_v32 = vpop.f32.mrf.mxu1  ;;  %v1754_v54 = vpop.f32.mrf.mxu0 }
 0x214   : > { %v1809_v43 = vadd.f32 %v1754_v54, %v1621_v27  ;;  %v1623_v35 = vadd.f32 %v1574_v32, %v1435_v2  ;;  %v1437_v32 = vadd.f32 %v3355_v20, %v1249_v26  ;;  %v1865_v58 = vpop.permute.xlu0 %1864 }
 0x215   : > { %v2620_v11 = vpop.f32.mrf.mxu1  ;;  %v2646_v49 = vpop.f32.mrf.mxu0 }
 0x216   : > { %v1907_v56 = vadd.f32 %v1840_v6, %v1809_v43  ;;  %v1250_v11 = vadd.f32 %v3349_v14, %v3317_v13 }
 0x217   : > { %v1577_v52 = vpop.f32.mrf.mxu1  ;;  %v1757_v28 = vpop.f32.mrf.mxu0 }
 0x218   : > { %v2316_v30 = vpack.c.bf16 %v1907_v56, %v1907_v56  ;;  %v1810_v59 = vadd.f32 %v1757_v28, %v1622_v19  ;;  %v1624_v27 = vadd.f32 %v1577_v52, %v1436_v16  ;;  %v1438_v19 = vadd.f32 %v3359_v63, %v1250_v11  ;;  %v1860_v52 = vpop.permute.xlu1 %1859 }
 0x219   : > { %v2621_v62 = vpop.f32.mrf.mxu1  ;;  %v2647_v1 = vpop.f32.mrf.mxu0 }
 0x21a   : > { %1978 = vst.msk [vmem:[%s3397_s6] sm:$0xf] %vm1977_vm3, %v2316_v30  ;;  %v1908_v4 = vadd.f32 %v1845_v47, %v1810_v59  ;;  %v1251_v30 = vadd.f32 %v3353_v3, %v3320_v18 }
 0x21b   : > { %v1582_v8 = vpop.f32.mrf.mxu1  ;;  %v1762_v34 = vpop.f32.mrf.mxu0 }
 0x21c   : > { %v2317_v40 = vpack.c.bf16 %v1908_v4, %v1908_v4  ;;  %v1811_v21 = vadd.f32 %v1762_v34, %v1623_v35  ;;  %v1625_v49 = vadd.f32 %v1582_v8, %v1437_v32  ;;  %v1439_v1 = vadd.f32 %v3363_v50, %v1251_v30  ;;  %v1875_v32 = vpop.permute.xlu0 %1874 }
 0x21d   : > { %v2624_v10 = vpop.f32.mrf.mxu1  ;;  %v2650_v22 = vpop.f32.mrf.mxu0  ;;  %v1252_v8 = vadd.f32 %v3357_v44, %v3323_v24 }
 0x21e   : > { %1979 = vst.msk [vmem:[%s3397_s6 + $0x4] sm:$0xf] %vm1977_vm3, %v2317_v40  ;;  %v1909_v0 = vadd.f32 %v1850_v42, %v1811_v21  ;;  %v1870_v21 = vpop.permute.xlu1 %1869 }
 0x21f   : > { %v1585_v5 = vpop.f32.mrf.mxu1  ;;  %v1765_v6 = vpop.f32.mrf.mxu0  ;;  %v1440_v40 = vadd.f32 %v3367_v37, %v1252_v8  ;;  %v1257_v8 = vadd.f32 %v3377_v55, %v3337_v57 }
 0x220   : > { %v2318_v54 = vpack.c.bf16 %v1909_v0, %v1909_v0  ;;  %v1812_v43 = vadd.f32 %v1765_v6, %v1624_v27  ;;  %v1626_v59 = vadd.f32 %v1585_v5, %v1438_v19  ;;  %v1253_v27 = vadd.f32 %v3361_v29, %v3326_v31 }
 0x221   : > { %v2625_v15 = vpop.f32.mrf.mxu1  ;;  %v2651_v47 = vpop.f32.mrf.mxu0 }
 0x222   : > { %1980 = vst.msk [vmem:[%s3397_s6 + $0x8] sm:$0xf] %vm1977_vm3, %v2318_v54  ;;  %v1910_v7 = vadd.f32 %v1855_v12, %v1812_v43  ;;  %v1441_v6 = vadd.f32 %v3371_v41, %v1253_v27  ;;  %v1254_v15 = vadd.f32 %v3365_v33, %v3329_v38 }
 0x223   : > { %v1590_v9 = vpop.f32.mrf.mxu1  ;;  %v1770_v45 = vpop.f32.mrf.mxu0 }
 0x224   : > { %v2319_v56 = vpack.c.bf16 %v1910_v7, %v1910_v7  ;;  %v1813_v20 = vadd.f32 %v1770_v45, %v1625_v49  ;;  %v1627_v34 = vadd.f32 %v1590_v9, %v1439_v1  ;;  %v1442_v49 = vadd.f32 %v3375_v48, %v1254_v15  ;;  %v1880_v7 = vpop.permute.xlu1 %1879 }
 0x225   : > { %v2628_v28 = vpop.f32.mrf.mxu1  ;;  %v2654_v2 = vpop.f32.mrf.mxu0 }
 0x226   : > { %1981 = vst.msk [vmem:[%s3397_s6 + $0xc] sm:$0xf] %vm1977_vm3, %v2319_v56  ;;  %v1911_v13 = vadd.f32 %v1860_v52, %v1813_v20  ;;  %v1255_v56 = vadd.f32 %v3369_v39, %v3332_v46  ;;  %v1885_v2 = vpop.permute.xlu0 %1884 }
 0x227   : > { %v1593_v14 = vpop.f32.mrf.mxu1  ;;  %v1773_v62 = vpop.f32.mrf.mxu0 }
 0x228   : > { %v2320_v35 = vpack.c.bf16 %v1911_v13, %v1911_v13  ;;  %v1814_v63 = vadd.f32 %v1773_v62, %v1626_v59  ;;  %v1628_v0 = vadd.f32 %v1593_v14, %v1440_v40  ;;  %v1443_v28 = vadd.f32 %v3379_v23, %v1255_v56 }
 0x229   : > { %v2629_v4 = vpop.f32.mrf.mxu1  ;;  %v2655_v42 = vpop.f32.mrf.mxu0  ;;  %v1256_v14 = vadd.f32 %v3373_v17, %v3335_v53 }
 0x22a   : > { %1982 = vst.msk [vmem:[%s3397_s6 + $0x10] sm:$0xf] %vm1977_vm3, %v2320_v35  ;;  %v1912_v18 = vadd.f32 %v1865_v58, %v1814_v63  ;;  %v1890_v35 = vpop.permute.xlu1 %1889 }
 0x22b   : > { %v1598_v3 = vpop.f32.mrf.mxu1  ;;  %v1778_v16 = vpop.f32.mrf.mxu0  ;;  %v1444_v58 = vadd.f32 %v3383_v60, %v1256_v14 }
 0x22c   : > { %v2321_v10 = vpack.c.bf16 %v1912_v18, %v1912_v18  ;;  %v1815_v50 = vadd.f32 %v1778_v16, %v1627_v34  ;;  %v1629_v47 = vadd.f32 %v1598_v3, %v1441_v6  ;;  %v1445_v3 = vadd.f32 %v3385_v36, %v1257_v8  ;;  %v1895_v16 = vpop.permute.xlu0 %1894 }
 0x22d   : > { %v2632_v22 = vpop.f32.mrf.mxu1  ;;  %v2658_v26 = vpop.f32.mrf.mxu0 }
 0x22e   : > { %1983 = vst.msk [vmem:[%s3397_s6 + $0x14] sm:$0xf] %vm1977_vm3, %v2321_v10  ;;  %v1913_v24 = vadd.f32 %v1870_v21, %v1815_v50  ;;  %v1258_v50 = vadd.f32 %v3381_v25, %v3339_v61 }
 0x22f   : > { %v1601_v44 = vpop.f32.mrf.mxu1  ;;  %v1781_v5 = vpop.f32.mrf.mxu0 }
 0x230   : > { %v2322_v54 = vpack.c.bf16 %v1913_v24, %v1913_v24  ;;  %v1816_v37 = vadd.f32 %v1781_v5, %v1628_v0  ;;  %v1630_v52 = vadd.f32 %v1601_v44, %v1442_v49  ;;  %v1446_v26 = vadd.f32 %v3388_v51, %v1258_v50  ;;  %v1900_v0 = vpop.permute.xlu1 %1899  ;;  %v1905_v25 = vpop.permute.xlu0 %1904 }
 0x231   : > { %v2633_v12 = vpop.f32.mrf.mxu1  ;;  %v2659_v43 = vpop.f32.mrf.mxu0 }
 0x232   : > { %1984 = vst.msk [vmem:[%s3397_s6 + $0x18] sm:$0xf] %vm1977_vm3, %v2322_v54  ;;  %v1914_v31 = vadd.f32 %v1875_v32, %v1816_v37 }
 0x233   : > { %v1606_v29 = vpop.f32.mrf.mxu1  ;;  %v1786_v11 = vpop.f32.mrf.mxu0 }
 0x234   : > { %v2323_v9 = vpack.c.bf16 %v1914_v31, %v1914_v31  ;;  %v1817_v41 = vadd.f32 %v1786_v11, %v1629_v47  ;;  %v1631_v62 = vadd.f32 %v1606_v29, %v1443_v28 }
 0x235   : > { %v2636_v45 = vpop.f32.mrf.mxu1  ;;  %v2662_v19 = vpop.f32.mrf.mxu0 }
 0x236   : > { %1985 = vst.msk [vmem:[%s3397_s6 + $0x1c] sm:$0xf] %vm1977_vm3, %v2323_v9  ;;  %v1915_v38 = vadd.f32 %v1880_v7, %v1817_v41 }
 0x237   : > { %v1609_v33 = vpop.f32.mrf.mxu1  ;;  %v1789_v20 = vpop.f32.mrf.mxu0 }
 0x238   : > { %v2324_v30 = vpack.c.bf16 %v1915_v38, %v1915_v38  ;;  %v1818_v48 = vadd.f32 %v1789_v20, %v1630_v52  ;;  %v1632_v34 = vadd.f32 %v1609_v33, %v1444_v58 }
 0x239   : > { %v2637_v59 = vpop.f32.mrf.mxu1  ;;  %v2663_v13 = vpop.f32.mrf.mxu0 }
 0x23a   : > { %1986 = vst.msk [vmem:[%s3397_s6 + $0x20] sm:$0xf] %vm1977_vm3, %v2324_v30  ;;  %v1916_v46 = vadd.f32 %v1885_v2, %v1818_v48 }
 0x23b   : > { %v1614_v39 = vpop.f32.mrf.mxu1  ;;  %v1794_v1 = vpop.f32.mrf.mxu0 }
 0x23c   : > { %v2325_v63 = vpack.c.bf16 %v1916_v46, %v1916_v46  ;;  %v1819_v23 = vadd.f32 %v1794_v1, %v1631_v62  ;;  %v1633_v22 = vadd.f32 %v1614_v39, %v1445_v3 }
 0x23d   : > { %v2640_v4 = vpop.f32.mrf.mxu1  ;;  %v2666_v42 = vpop.f32.mrf.mxu0 }
 0x23e   : > { %1987 = vst.msk [vmem:[%s3397_s6 + $0x24] sm:$0xf] %vm1977_vm3, %v2325_v63  ;;  %v1917_v53 = vadd.f32 %v1890_v35, %v1819_v23 }
 0x23f   : > { %v1617_v17 = vpop.f32.mrf.mxu1  ;;  %v1797_v18 = vpop.f32.mrf.mxu0 }
 0x240   : > { %v2326_v60 = vpack.c.bf16 %v1917_v53, %v1917_v53  ;;  %v1820_v40 = vadd.f32 %v1797_v18, %v1632_v34  ;;  %v1634_v44 = vadd.f32 %v1617_v17, %v1446_v26 }
 0x241   : > { %v2667_v21 = vpop.f32.mrf.mxu0  ;;  %v2641_v10 = vpop.f32.mrf.mxu1 }
 0x242   : > { %1988 = vst.msk [vmem:[%s3397_s6 + $0x28] sm:$0xf] %vm1977_vm3, %v2326_v60  ;;  %v1918_v57 = vadd.f32 %v1895_v16, %v1820_v40 }
 0x243   : > { %v1802_v55 = vpop.f32.mrf.mxu0 }
 0x244   : > { %v2327_v27 = vpack.c.bf16 %v1918_v57, %v1918_v57  ;;  %v1821_v36 = vadd.f32 %v1802_v55, %v1633_v22 }
 0x245   : > { %v2670_v24 = vpop.f32.mrf.mxu0 }
 0x246   : > { %1989 = vst.msk [vmem:[%s3397_s6 + $0x2c] sm:$0xf] %vm1977_vm3, %v2327_v27  ;;  %v1919_v5 = vadd.f32 %v1900_v0, %v1821_v36 }
 0x247   : > { %v1805_v6 = vpop.f32.mrf.mxu0 }
 0x248   : > { %v2328_v32 = vpack.c.bf16 %v1919_v5, %v1919_v5  ;;  %v1822_v61 = vadd.f32 %v1805_v6, %v1634_v44 }
 0x249   : > { %v2671_v54 = vpop.f32.mrf.mxu0 }
 0x24a   : > { %1990 = vst.msk [vmem:[%s3397_s6 + $0x30] sm:$0xf] %vm1977_vm3, %v2328_v32  ;;  %v1920_v37 = vadd.f32 %v1905_v25, %v1822_v61 }
 0x24c   : > { %v2329_v12 = vpack.c.bf16 %v1920_v37, %v1920_v37 }
 0x24e   : > { %1992 = vst.msk [vmem:[%s3397_s6 + $0x34] sm:$0x3] %vm1991_vm4, %v2329_v12 }
 0x24f PF: > { %s13_s12 = sadd.s32 1, %s2766_s12  }
 0x250   : > { %p10_p4 = scmp.ge.s32.totalorder %s13_s12, 4  }
 0x252   :  { %12 = sbr.rel (!%p10_p4) target bundleno = 1 (0x1), region = 70 }

// kernel: dsta_forward.20
= control target key start
LH: loop header
LB: loop body
LE: loop exit
PB: predicated region body
PF: predicated region fallthrough
CT: control target
= control target key end

     0   :  { %s464_s15 = smov 0   ;;  %s494_s0 = inlined_call_operand.vmem [shape: f32[2,36,9], index: 0, kind: input, shape index: {}]   ;;  %s495_s1 = inlined_call_operand.vmem [shape: f32[2,36,9], index: 1, kind: input, shape index: {}]   ;;  %s496_s2 = inlined_call_operand.vmem [shape: f32[4,36], index: 2, kind: input, shape index: {}]   ;;  %s497_s3 = inlined_call_operand.vmem [shape: f32[4,1], index: 3, kind: input, shape index: {}]   ;;  %s498_s4 = inlined_call_operand.vmem [shape: f32[2,4,9], index: 4, kind: output, shape index: {}]  }
   0x1 LB: > { %s384_s16 = sadd.s32 4294967295, %s434_s15   ;;  %p388_p0 = scmp.ge.s32.totalorder %s434_s15, 1  ;;  %s434_s15 = sphi %s464_s15, %s14_s15  }
   0x2   : > { %p172_p1 = scmp.lt.s32.totalorder %s434_s15, 3 }
   0x4   : > { %p173_p2 = pnand %p388_p0, %p172_p1 }
   0x5   : > { %p202_p3 = scmp.lt.s32.totalorder (!%p173_p2), %s384_s16, 1 }
   0x6   : > { %176 = sbr.rel (%p173_p2) target bundleno = 226 (0xe2), region = 36 }
   0xb   : > { %v436_v0 = vmov 0.0   ;;  %vm437_vm0 = vmmov 0   ;;  %v232_v1 = vld [vmem:[%s497_s3] sm:$0xf]  ;;  %s500_s16 = smov (!%p202_p3, %s384_s16), 1  ;;  %v438_v2 = vmov 0  }
   0xc   : > { %402 = vmatprep.subr.mxu0 %v436_v0  ;;  %412 = vmatprep.mubr.msk.f32.mxu0 %vm437_vm0, %v436_v0  ;;  %s415_s19 = smul.u32 40, %s500_s16  ;;  %vm242_vm1 = vcmask 1043456   ;;  %v231_v18 = vld [vmem:[%s496_s2] sm:$0xf]  ;;  %vm238_vm2 = vcmask 293888   ;;  %s391_s28 = sshll.u32 %s500_s16, 2 }
   0xd   : > { %427 = vset.pattern.permute.xlu0 %v438_v2  ;;  %s215_s5 = scalar_lea.vmem %s498_s4, %s391_s28  ;;  %vm317_vm3 = vcmask 68608  }
   0xe   : > { %235 = vperm.xlu0 %427, %v232_v1   ;;  %s206_s22 = scalar_lea.vmem %s494_s0, %s415_s19  ;;  %s211_s25 = scalar_lea.vmem %s495_s1, %s415_s19 }
   0xf   : > { %v220_v3 = vld [vmem:[%s206_s22 + $0x20] sm:$0xf]  ;;  %v219_v5 = vld [vmem:[%s206_s22 + $0x18] sm:$0xff]  ;;  %v218_v8 = vld [vmem:[%s206_s22 + $0x10] sm:$0xff] }
  0x10   : > { %v225_v4 = vld [vmem:[%s211_s25 + $0x20] sm:$0xf]  ;;  %v224_v7 = vld [vmem:[%s211_s25 + $0x18] sm:$0xff]  ;;  %v223_v9 = vld [vmem:[%s211_s25 + $0x10] sm:$0xff] }
  0x11   : > { %v230_v6 = vmul.f32 %v225_v4, %v220_v3  ;;  %v229_v10 = vmul.f32 %v224_v7, %v219_v5  ;;  %v217_v11 = vld [vmem:[%s206_s22 + $0x8] sm:$0xff]  ;;  %v228_v13 = vmul.f32 %v223_v9, %v218_v8  ;;  %v216_v14 = vld [vmem:[%s206_s22] sm:$0xff] }
  0x12   : > { %v222_v12 = vld [vmem:[%s211_s25 + $0x8] sm:$0xff]  ;;  %v221_v15 = vld [vmem:[%s211_s25] sm:$0xff] }
  0x13   : > { %403 = vmatpush3.msk.msra.mxu0 %vm242_vm1, %v230_v6  ;;  %v227_v16 = vmul.f32 %v222_v12, %v217_v11  ;;  %v226_v17 = vmul.f32 %v221_v15, %v216_v14 }
  0x14   : > { %404 = vmatprep.subr.mxu0 %v436_v0 }
  0x15   : > { %405 = vmatpush3.msra.mxu0 %v229_v10 }
  0x16   : > { %406 = vmatprep.subr.mxu0 %v436_v0 }
  0x17   : > { %407 = vmatpush3.msra.mxu0 %v228_v13 }
  0x18   : > { %408 = vmatprep.subr.mxu0 %v436_v0 }
  0x19   : > { %409 = vmatpush3.msra.mxu0 %v227_v16 }
  0x1a   : > { %410 = vmatprep.subr.mxu0 %v436_v0 }
  0x1b   : > { %411 = vmatpush3.msra.mxu0 %v226_v17 }
  0x1c   : > { %413 = vmatmul.mubr.msk.f32.vlgmr.msra.gmra.mxu0 %vm238_vm2, %v231_v18 }
  0x89   : > { %v236_v19 = vpop.permute.xlu0 %235 }
  0xdc   : > { %v312_v20 = vpop.f32.mrf.mxu0 }
  0xdd   : > { %v313_v21 = vadd.f32 %v312_v20, %v236_v19 }
  0xde   : > { %v414_v22 = vpop.f32.mrf.mxu0 }
  0xdf   : > { %v316_v23 = vmax.f32 %v313_v21, 0.0 }
  0xe1   : > { %318 = vst.msk [vmem:[%s215_s5] sm:$0xf] %vm317_vm3, %v316_v23 }
  0xe2 PF: > { %s14_s15 = sadd.s32 1, %s434_s15  }
  0xe3   : > { %p11_p4 = scmp.ge.s32.totalorder %s14_s15, 4  }
  0xe5   :  { %13 = sbr.rel (!%p11_p4) target bundleno = 1 (0x1), region = 69 }

// kernel: dsta_forward.21
= control target key start
LH: loop header
LB: loop body
LE: loop exit
PB: predicated region body
PF: predicated region fallthrough
CT: control target
= control target key end

     0   :  { %s690_s12 = smov 0   ;;  %s692_s13 = smov 0   ;;  %s754_s0 = inlined_call_operand.vmem [shape: bf16[2,4,1024], index: 0, kind: input, shape index: {}]   ;;  %s755_s1 = inlined_call_operand.vmem [shape: bf16[4,4], index: 1, kind: input, shape index: {}]   ;;  %s756_s2 = inlined_call_operand.vmem [shape: f32[4,1], index: 2, kind: input, shape index: {}]   ;;  %s757_s3 = inlined_call_operand.vmem [shape: bf16[2,4,1024], index: 3, kind: output, shape index: {}]  }
   0x1   :  { %s694_s14 = smov 0  }
   0x2 LB: > { %s25_s15 = sadd.s32 1, %s662_s13  ;;  %p594_p0 = scmp.ge.s32.totalorder %s666_s14, 1  ;;  %s666_s14 = sphi %s694_s14, %s13_s14   ;;  %s662_s13 = sphi %s692_s13, %s759_s13   ;;  %s658_s12 = sphi %s690_s12, %s758_s12  }
   0x3   : > { %p27_p1 = scmp.ge.s32.totalorder %s25_s15, 2  ;;  %p158_p2 = scmp.lt.s32.totalorder %s666_s14, 3 }
   0x5   : > { %s761_s15 = smov (%p27_p1, %s25_s15), 0  ;;  %p159_p3 = pnand %p594_p0, %p158_p2 }
   0x6   : > { %p191_p4 = scmp.lt.s32.totalorder (!%p159_p3), %s658_s12, 1 }
   0x7   : > { %162 = sbr.rel (%p159_p3) target bundleno = 239 (0xef), region = 32 }
   0xc   : > { %v226_v0 = vlaneseq  ;;  %v668_v1 = vmov 1983009808   ;;  %v669_v3 = vmov 0   ;;  %v214_v4 = vld [vmem:[%s756_s2] sm:$0xf]  ;;  %s763_s12 = smov (!%p191_p4, %s658_s12), 1 }
   0xd   : > { %v224_v2 = vunpack.c.l.s4 %v668_v1  ;;  %317 = vmatprep.mubr.bf16.mxu0 %v669_v3  ;;  %358 = vmatprep.mubr.bf16.mxu1 %v669_v3  ;;  %s613_s18 = sshll.u32 %s763_s12, 4  ;;  %vm260_vm0 = vcmask 1041408   ;;  %v211_v21 = vld [vmem:[%s755_s1] sm:$0x3]  ;;  %vm256_vm1 = vcmask 31744  }
   0xe   : > { %v227_v5 = vshrl.u32 %v226_v0, 7  ;;  %641 = vset.pattern.permute.xlu0 %v669_v3  ;;  %s198_s21 = scalar_lea.vmem %s754_s0, %s613_s18  ;;  %s208_s26 = scalar_lea.vmem %s757_s3, %s613_s18 }
   0xf   : > { %v225_v6 = vunpack.c.0.s8 %v224_v2  ;;  %217 = vperm.xlu0 %641, %v214_v4   ;;  %v212_v8 = vld [vmem:[%s198_s21] sm:$0xff]  ;;  %v213_v9 = vld [vmem:[%s198_s21 + $0x8] sm:$0xff] }
  0x10   : > { %v239_v11 = vcombine.high %v213_v9, %v213_v9  ;;  %v222_v13 = vcombine.high %v212_v8, %v212_v8 }
  0x11   : > { %v719_v7 = vsub.s32 %v225_v6, %v227_v5 }
  0x13   : > { %v229_v10 = vrot.slane %v212_v8, %v719_v7  ;;  %v246_v12 = vrot.slane %v213_v9, %v719_v7  ;;  %v236_v16 = vrot.slane %v222_v13, %v719_v7  ;;  %v253_v18 = vrot.slane %v239_v11, %v719_v7 }
  0x15   : > { %v237_v14 = vcombine.high %v229_v10, %v229_v10  ;;  %v262_v15 = vsel %vm260_vm0, %v229_v10, 0  ;;  %v254_v17 = vcombine.high %v246_v12, %v246_v12  ;;  %v238_v19 = vcombine.high %v236_v16, %v236_v16 }
  0x16   : > { %v268_v20 = vsel %vm260_vm0, %v236_v16, 0  ;;  %v255_v22 = vcombine.high %v253_v18, %v253_v18  ;;  %v274_v23 = vsel %vm260_vm0, %v246_v12, 0  ;;  %v280_v24 = vsel %vm260_vm0, %v253_v18, 0 }
  0x17   : > { %599 = vmatprep.subr.msk.bf16.mxu0 %vm260_vm0, %v237_v14  ;;  %601 = vmatprep.subr.msk.bf16.mxu1 %vm260_vm0, %v238_v19 }
  0x18   : > { %300 = vmatpush1.bf16.msra.mxu0 %v262_v15  ;;  %341 = vmatpush1.bf16.msra.mxu1 %v268_v20 }
  0x19   : > { %603 = vmatprep.subr.msk.bf16.mxu0 %vm260_vm0, %v254_v17  ;;  %605 = vmatprep.subr.msk.bf16.mxu1 %vm260_vm0, %v255_v22 }
  0x1b   : > { %600 = vmatmul.mubr.msk.bf16.vlgmr.msra.gmra.mxu0 %vm256_vm1, %v211_v21  ;;  %602 = vmatmul.mubr.msk.bf16.vlgmr.msra.gmra.mxu1 %vm256_vm1, %v211_v21 }
  0x1c   : > { %382 = vmatpush1.bf16.msra.mxu0 %v274_v23  ;;  %399 = vmatprep.mubr.bf16.mxu0 %v669_v3 }
  0x1d   : > { %423 = vmatpush1.bf16.msra.mxu1 %v280_v24  ;;  %440 = vmatprep.mubr.bf16.mxu1 %v669_v3 }
  0x23   : > { %604 = vmatmul.mubr.msk.bf16.vlgmr.msra.gmra.mxu0 %vm256_vm1, %v211_v21  ;;  %606 = vmatmul.mubr.msk.bf16.vlgmr.msra.gmra.mxu1 %vm256_vm1, %v211_v21 }
  0x8a   : > { %v218_v25 = vpop.permute.xlu0 %217 }
  0xdb   : > { %v319_v26 = vpop.f32.mrf.mxu0  ;;  %v360_v29 = vpop.f32.mrf.mxu1 }
  0xdc   : > { %v320_v27 = vadd.f32 %v319_v26, %v218_v25  ;;  %v361_v33 = vadd.f32 %v360_v29, %v218_v25 }
  0xdd   : > { %v321_v28 = vpop.f32.mrf.mxu0  ;;  %v362_v32 = vpop.f32.mrf.mxu1 }
  0xde   : > { %v322_v30 = vadd.f32 %v321_v28, %v218_v25  ;;  %v363_v34 = vadd.f32 %v362_v32, %v218_v25 }
  0xdf   : > { %v323_v31 = vpop.f32.mrf.mxu0  ;;  %v364_v37 = vpop.f32.mrf.mxu1 }
  0xe0   : > { %v607_v35 = vpack.c.bf16 %v322_v30, %v320_v27  ;;  %v608_v38 = vpack.c.bf16 %v363_v34, %v361_v33 }
  0xe1   : > { %v324_v36 = vpop.f32.mrf.mxu0  ;;  %v365_v39 = vpop.f32.mrf.mxu1 }
  0xe2   : > { %v473_v41 = vrot.slane %v607_v35, %v719_v7  ;;  %v480_v42 = vrot.slane %v608_v38, %v719_v7 }
  0xe3   : > { %v401_v40 = vpop.f32.mrf.mxu0  ;;  %v442_v45 = vpop.f32.mrf.mxu1 }
  0xe4   : > { %v402_v43 = vadd.f32 %v401_v40, %v218_v25  ;;  %v481_v46 = vcombine.low %v473_v41, %v480_v42  ;;  %v443_v51 = vadd.f32 %v442_v45, %v218_v25 }
  0xe5   : > { %v403_v44 = vpop.f32.mrf.mxu0  ;;  %v444_v49 = vpop.f32.mrf.mxu1 }
  0xe6   : > { %v404_v47 = vadd.f32 %v403_v44, %v218_v25  ;;  %501 = vst [vmem:[%s208_s26] sm:$0xff] %v481_v46  ;;  %v445_v52 = vadd.f32 %v444_v49, %v218_v25 }
  0xe7   : > { %v405_v48 = vpop.f32.mrf.mxu0  ;;  %v446_v54 = vpop.f32.mrf.mxu1 }
  0xe8   : > { %v609_v50 = vpack.c.bf16 %v404_v47, %v402_v43  ;;  %v610_v55 = vpack.c.bf16 %v445_v52, %v443_v51 }
  0xe9   : > { %v406_v53 = vpop.f32.mrf.mxu0  ;;  %v447_v56 = vpop.f32.mrf.mxu1 }
  0xea   : > { %v490_v57 = vrot.slane %v609_v50, %v719_v7  ;;  %v497_v58 = vrot.slane %v610_v55, %v719_v7 }
  0xec   : > { %v498_v59 = vcombine.low %v490_v57, %v497_v58 }
  0xee   : > { %502 = vst [vmem:[%s208_s26 + $0x8] sm:$0xff] %v498_v59 }
  0xef PF: > { %s13_s14 = sadd.s32 1, %s666_s14   ;;  %s758_s12 = smov %s662_s13 }
  0xf0   : > { %p10_p5 = scmp.ge.s32.totalorder %s13_s14, 4   ;;  %s759_s13 = smov %s761_s15 }
  0xf2   :  { %12 = sbr.rel (!%p10_p5) target bundleno = 2 (0x2), region = 62 }

// kernel: dsta_forward.22
= control target key start
LH: loop header
LB: loop body
LE: loop exit
PB: predicated region body
PF: predicated region fallthrough
CT: control target
= control target key end

     0   :  { %s726_s12 = smov 0   ;;  %s728_s13 = smov 0   ;;  %s790_s0 = inlined_call_operand.vmem [shape: bf16[2,4,1024], index: 0, kind: input, shape index: {}]   ;;  %s791_s1 = inlined_call_operand.vmem [shape: bf16[16,4], index: 1, kind: input, shape index: {}]   ;;  %s792_s2 = inlined_call_operand.vmem [shape: f32[16,1], index: 2, kind: input, shape index: {}]   ;;  %s793_s3 = inlined_call_operand.vmem [shape: bf16[2,16,1024], index: 3, kind: output, shape index: {}]  }
   0x1   :  { %s730_s14 = smov 0  }
   0x2 LB: > { %s25_s15 = sadd.s32 1, %s698_s13  ;;  %p616_p0 = scmp.ge.s32.totalorder %s702_s14, 1  ;;  %s702_s14 = sphi %s730_s14, %s13_s14   ;;  %s698_s13 = sphi %s728_s13, %s795_s13   ;;  %s694_s12 = sphi %s726_s12, %s794_s12  }
   0x3   : > { %p27_p1 = scmp.ge.s32.totalorder %s25_s15, 2  ;;  %p158_p2 = scmp.lt.s32.totalorder %s702_s14, 3 }
   0x5   : > { %s797_s15 = smov (%p27_p1, %s25_s15), 0  ;;  %p159_p3 = pnand %p616_p0, %p158_p2 }
   0x6   : > { %p191_p4 = scmp.lt.s32.totalorder (!%p159_p3), %s694_s12, 1 }
   0x7   : > { %162 = sbr.rel (%p159_p3) target bundleno = 239 (0xef), region = 32 }
   0xc   : > { %v238_v0 = vlaneseq  ;;  %v704_v1 = vmov 1983009808   ;;  %v705_v3 = vmov 0   ;;  %v215_v4 = vld [vmem:[%s792_s2] sm:$0xff]  ;;  %s799_s12 = smov (!%p191_p4, %s694_s12), 1  ;;  %v216_v7 = vld [vmem:[%s792_s2 + $0x8] sm:$0xff] }
   0xd   : > { %v236_v2 = vunpack.c.l.s4 %v704_v1  ;;  %329 = vmatprep.mubr.bf16.mxu0 %v705_v3  ;;  %372 = vmatprep.mubr.bf16.mxu1 %v705_v3  ;;  %s640_s18 = sshll.u32 %s799_s12, 4  ;;  %vm272_vm0 = vcmask 1041408   ;;  %v679_v22 = vld [vmem:[%s791_s1] sm:$0xff]   ;;  %vm268_vm1 = vcmask 31744   ;;  %s641_s26 = sshll.u32 %s799_s12, 6 }
   0xe   : > { %v239_v5 = vshrl.u32 %v238_v0, 7  ;;  %676 = vset.pattern.permute.xlu0 %v705_v3  ;;  %s198_s23 = scalar_lea.vmem %s790_s0, %s640_s18  ;;  %s771_s29 = scalar_lea.vmem %s793_s3, %s641_s26 }
   0xf   : > { %v237_v6 = vunpack.c.0.s8 %v236_v2  ;;  %219 = vperm.xlu0 %676, %v215_v4   ;;  %v213_v9 = vld [vmem:[%s198_s23] sm:$0xff]  ;;  %v214_v10 = vld [vmem:[%s198_s23 + $0x8] sm:$0xff] }
  0x10   : > { %v251_v12 = vcombine.high %v214_v10, %v214_v10  ;;  %v234_v14 = vcombine.high %v213_v9, %v213_v9 }
  0x11   : > { %v240_v8 = vsub.s32 %v237_v6, %v239_v5 }
  0x13   : > { %v241_v11 = vrot.slane %v213_v9, %v240_v8  ;;  %v258_v13 = vrot.slane %v214_v10, %v240_v8  ;;  %224 = vperm.xlu0 %676, %v216_v7   ;;  %v248_v17 = vrot.slane %v234_v14, %v240_v8  ;;  %v265_v19 = vrot.slane %v251_v12, %v240_v8 }
  0x15   : > { %v249_v15 = vcombine.high %v241_v11, %v241_v11  ;;  %v274_v16 = vsel %vm272_vm0, %v241_v11, 0  ;;  %v266_v18 = vcombine.high %v258_v13, %v258_v13  ;;  %v250_v20 = vcombine.high %v248_v17, %v248_v17 }
  0x16   : > { %v280_v21 = vsel %vm272_vm0, %v248_v17, 0  ;;  %v267_v23 = vcombine.high %v265_v19, %v265_v19  ;;  %v286_v24 = vsel %vm272_vm0, %v258_v13, 0  ;;  %v292_v25 = vsel %vm272_vm0, %v265_v19, 0 }
  0x17   : > { %622 = vmatprep.subr.msk.bf16.mxu0 %vm272_vm0, %v249_v15  ;;  %624 = vmatprep.subr.msk.bf16.mxu1 %vm272_vm0, %v250_v20 }
  0x18   : > { %312 = vmatpush1.bf16.msra.mxu0 %v274_v16  ;;  %355 = vmatpush1.bf16.msra.mxu1 %v280_v21 }
  0x19   : > { %626 = vmatprep.subr.msk.bf16.mxu0 %vm272_vm0, %v266_v18  ;;  %628 = vmatprep.subr.msk.bf16.mxu1 %vm272_vm0, %v267_v23 }
  0x1b   : > { %623 = vmatmul.mubr.msk.bf16.vlgmr.msra.gmra.mxu0 %vm268_vm1, %v679_v22  ;;  %625 = vmatmul.mubr.msk.bf16.vlgmr.msra.gmra.mxu1 %vm268_vm1, %v679_v22 }
  0x1c   : > { %398 = vmatpush1.bf16.msra.mxu0 %v286_v24  ;;  %415 = vmatprep.mubr.bf16.mxu0 %v705_v3 }
  0x1d   : > { %441 = vmatpush1.bf16.msra.mxu1 %v292_v25  ;;  %458 = vmatprep.mubr.bf16.mxu1 %v705_v3 }
  0x23   : > { %627 = vmatmul.mubr.msk.bf16.vlgmr.msra.gmra.mxu0 %vm268_vm1, %v679_v22  ;;  %629 = vmatmul.mubr.msk.bf16.vlgmr.msra.gmra.mxu1 %vm268_vm1, %v679_v22 }
  0x8a   : > { %v220_v26 = vpop.permute.xlu0 %219 }
  0x8e   : > { %v225_v32 = vpop.permute.xlu0 %224 }
  0xdb   : > { %v331_v27 = vpop.f32.mrf.mxu0  ;;  %v374_v30 = vpop.f32.mrf.mxu1 }
  0xdc   : > { %v332_v28 = vadd.f32 %v331_v27, %v220_v26  ;;  %v375_v36 = vadd.f32 %v374_v30, %v220_v26 }
  0xdd   : > { %v333_v29 = vpop.f32.mrf.mxu0  ;;  %v376_v34 = vpop.f32.mrf.mxu1 }
  0xde   : > { %v334_v31 = vadd.f32 %v333_v29, %v220_v26  ;;  %v377_v37 = vadd.f32 %v376_v34, %v220_v26 }
  0xdf   : > { %v335_v33 = vpop.f32.mrf.mxu0  ;;  %v378_v39 = vpop.f32.mrf.mxu1 }
  0xe0   : > { %v642_v35 = vpack.c.bf16 %v334_v31, %v332_v28  ;;  %v336_v40 = vadd.f32 %v335_v33, %v225_v32  ;;  %v643_v41 = vpack.c.bf16 %v377_v37, %v375_v36  ;;  %v379_v46 = vadd.f32 %v378_v39, %v225_v32 }
  0xe1   : > { %v337_v38 = vpop.f32.mrf.mxu0  ;;  %v380_v43 = vpop.f32.mrf.mxu1 }
  0xe2   : > { %517 = vst [vmem:[%s771_s29] sm:$0xff] %v642_v35  ;;  %v338_v42 = vadd.f32 %v337_v38, %v225_v32  ;;  %518 = vst [vmem:[%s771_s29 + $0x8] sm:$0xff] %v643_v41  ;;  %v381_v47 = vadd.f32 %v380_v43, %v225_v32 }
  0xe3   : > { %v417_v44 = vpop.f32.mrf.mxu0  ;;  %v460_v50 = vpop.f32.mrf.mxu1 }
  0xe4   : > { %v646_v45 = vpack.c.bf16 %v338_v42, %v336_v40  ;;  %v418_v48 = vadd.f32 %v417_v44, %v220_v26  ;;  %v647_v51 = vpack.c.bf16 %v381_v47, %v379_v46  ;;  %v461_v56 = vadd.f32 %v460_v50, %v220_v26 }
  0xe5   : > { %v419_v49 = vpop.f32.mrf.mxu0  ;;  %v462_v54 = vpop.f32.mrf.mxu1 }
  0xe6   : > { %521 = vst [vmem:[%s771_s29 + $0x20] sm:$0xff] %v646_v45  ;;  %v420_v52 = vadd.f32 %v419_v49, %v220_v26  ;;  %522 = vst [vmem:[%s771_s29 + $0x28] sm:$0xff] %v647_v51  ;;  %v463_v57 = vadd.f32 %v462_v54, %v220_v26 }
  0xe7   : > { %v421_v53 = vpop.f32.mrf.mxu0  ;;  %v464_v59 = vpop.f32.mrf.mxu1 }
  0xe8   : > { %v644_v55 = vpack.c.bf16 %v420_v52, %v418_v48  ;;  %v422_v60 = vadd.f32 %v421_v53, %v225_v32  ;;  %v645_v61 = vpack.c.bf16 %v463_v57, %v461_v56  ;;  %v465_v1 = vadd.f32 %v464_v59, %v225_v32 }
  0xe9   : > { %v423_v58 = vpop.f32.mrf.mxu0  ;;  %v466_v63 = vpop.f32.mrf.mxu1 }
  0xea   : > { %519 = vst [vmem:[%s771_s29 + $0x10] sm:$0xff] %v644_v55  ;;  %v424_v62 = vadd.f32 %v423_v58, %v225_v32  ;;  %520 = vst [vmem:[%s771_s29 + $0x18] sm:$0xff] %v645_v61  ;;  %v467_v2 = vadd.f32 %v466_v63, %v225_v32 }
  0xec   : > { %v648_v0 = vpack.c.bf16 %v424_v62, %v422_v60  ;;  %v649_v3 = vpack.c.bf16 %v467_v2, %v465_v1 }
  0xee   : > { %523 = vst [vmem:[%s771_s29 + $0x30] sm:$0xff] %v648_v0  ;;  %524 = vst [vmem:[%s771_s29 + $0x38] sm:$0xff] %v649_v3 }
  0xef PF: > { %s13_s14 = sadd.s32 1, %s702_s14   ;;  %s794_s12 = smov %s698_s13 }
  0xf0   : > { %p10_p5 = scmp.ge.s32.totalorder %s13_s14, 4   ;;  %s795_s13 = smov %s797_s15 }
  0xf2   :  { %12 = sbr.rel (!%p10_p5) target bundleno = 2 (0x2), region = 62 }

// kernel: dsta_forward.23
= control target key start
LH: loop header
LB: loop body
LE: loop exit
PB: predicated region body
PF: predicated region fallthrough
CT: control target
= control target key end

     0   :  { %s749_s12 = smov 0   ;;  %s751_s13 = smov 0   ;;  %s815_s0 = inlined_call_operand.vmem [shape: f32[2,16,1024], index: 0, kind: input, shape index: {}]   ;;  %s816_s1 = inlined_call_operand.vmem [shape: bf16[2,16,1024], index: 1, kind: input, shape index: {}]   ;;  %s817_s2 = inlined_call_operand.vmem [shape: f32[2,16,1], index: 2, kind: input, shape index: {}]   ;;  %s818_s3 = inlined_call_operand.vmem [shape: f32[2,16,1024], index: 3, kind: output, shape index: {}]  }
   0x1   :  { %s753_s14 = smov 0  }
   0x2 LB: > { %s25_s15 = sadd.s32 1, %s722_s13  ;;  %p583_p0 = scmp.ge.s32.totalorder %s726_s14, 1  ;;  %s726_s14 = sphi %s753_s14, %s13_s14   ;;  %s722_s13 = sphi %s751_s13, %s820_s13   ;;  %s718_s12 = sphi %s749_s12, %s819_s12  }
   0x3   : > { %p27_p1 = scmp.ge.s32.totalorder %s25_s15, 2  ;;  %p185_p2 = scmp.lt.s32.totalorder %s726_s14, 3 }
   0x5   : > { %s822_s15 = smov (%p27_p1, %s25_s15), 0  ;;  %p186_p3 = pnand %p583_p0, %p185_p2 }
   0x6   : > { %p232_p4 = scmp.lt.s32.totalorder (!%p186_p3), %s718_s12, 1 }
   0x7   : > { %189 = sbr.rel (%p186_p3) target bundleno = 150 (0x96), region = 32 }
   0xc   : > { %v728_v0 = vmov 0   ;;  %s824_s12 = smov (!%p232_p4, %s718_s12), 1 }
   0xd   : > { %639 = vset.pattern.permute.xlu0 %v728_v0  ;;  %s612_s16 = sshll.u32 %s824_s12, 4  ;;  %s611_s20 = sshll.u32 %s824_s12, 6 }
   0xe   : > { %s255_s19 = scalar_lea.vmem %s817_s2, %s612_s16  ;;  %s249_s23 = scalar_lea.vmem %s816_s1, %s611_s20 }
   0xf   : > { %v418_v1 = vld [vmem:[%s255_s19] sm:$0xff]  ;;  %v419_v2 = vld [vmem:[%s255_s19 + $0x8] sm:$0xff]  ;;  %v268_v6 = vld [vmem:[%s249_s23 + $0x10] sm:$0xff]  ;;  %s610_s24 = sshll.u32 %s824_s12, 7 }
  0x10   : > { %422 = vperm.xlu0 %639, %v418_v1   ;;  %v266_v3 = vld [vmem:[%s249_s23] sm:$0xff]  ;;  %v267_v4 = vld [vmem:[%s249_s23 + $0x8] sm:$0xff]  ;;  %v269_v9 = vld [vmem:[%s249_s23 + $0x18] sm:$0xff]  ;;  %v278_v11 = vunpack.c.l.bf16 %v268_v6  ;;  %v279_v14 = vunpack.c.h.bf16 %v268_v6  ;;  %s239_s27 = scalar_lea.vmem %s815_s0, %s610_s24  ;;  %s788_s30 = scalar_lea.vmem %s818_s3, %s610_s24 }
  0x11   : > { %v274_v5 = vunpack.c.l.bf16 %v266_v3  ;;  %v275_v7 = vunpack.c.h.bf16 %v266_v3  ;;  %v276_v8 = vunpack.c.l.bf16 %v267_v4  ;;  %v277_v10 = vunpack.c.h.bf16 %v267_v4  ;;  %v270_v13 = vld [vmem:[%s249_s23 + $0x20] sm:$0xff]  ;;  %v271_v18 = vld [vmem:[%s249_s23 + $0x28] sm:$0xff]  ;;  %v272_v23 = vld [vmem:[%s249_s23 + $0x30] sm:$0xff] }
  0x12   : > { %v280_v16 = vunpack.c.l.bf16 %v269_v9  ;;  %v281_v19 = vunpack.c.h.bf16 %v269_v9  ;;  %v282_v21 = vunpack.c.l.bf16 %v270_v13  ;;  %v596_v22 = vmul.f32 -1.442695, %v278_v11  ;;  %v273_v28 = vld [vmem:[%s249_s23 + $0x38] sm:$0xff] }
  0x13   : > { %v592_v12 = vmul.f32 -1.442695, %v274_v5  ;;  %v593_v15 = vmul.f32 -1.442695, %v275_v7  ;;  %v594_v17 = vmul.f32 -1.442695, %v276_v8  ;;  %v283_v24 = vunpack.c.h.bf16 %v270_v13 }
  0x14   : > { %427 = vperm.xlu0 %639, %v419_v2   ;;  %v595_v20 = vmul.f32 -1.442695, %v277_v10  ;;  %v597_v25 = vmul.f32 -1.442695, %v279_v14  ;;  %v284_v26 = vunpack.c.l.bf16 %v271_v18  ;;  %v598_v27 = vmul.f32 -1.442695, %v280_v16 }
  0x15   : > { %640 = vpow2.f32 %v592_v12  ;;  %v285_v29 = vunpack.c.h.bf16 %v271_v18  ;;  %v599_v30 = vmul.f32 -1.442695, %v281_v19  ;;  %v286_v31 = vunpack.c.l.bf16 %v272_v23 }
  0x16   : > { %642 = vpow2.f32 %v593_v15  ;;  %v600_v32 = vmul.f32 -1.442695, %v282_v21  ;;  %v287_v33 = vunpack.c.h.bf16 %v272_v23  ;;  %v601_v34 = vmul.f32 -1.442695, %v283_v24  ;;  %v387_v24 = vld [vmem:[%s239_s27 + $0x8] sm:$0xff] }
  0x17   : > { %644 = vpow2.f32 %v594_v17  ;;  %v288_v35 = vunpack.c.l.bf16 %v273_v28  ;;  %v602_v36 = vmul.f32 -1.442695, %v284_v26  ;;  %v289_v37 = vunpack.c.h.bf16 %v273_v28  ;;  %v389_v26 = vld [vmem:[%s239_s27 + $0x18] sm:$0xff]  ;;  %v390_v28 = vld [vmem:[%s239_s27 + $0x20] sm:$0xff] }
  0x18   : > { %646 = vpow2.f32 %v595_v20  ;;  %v603_v38 = vmul.f32 -1.442695, %v285_v29  ;;  %v604_v39 = vmul.f32 -1.442695, %v286_v31  ;;  %v605_v40 = vmul.f32 -1.442695, %v287_v33 }
  0x19   : > { %648 = vpow2.f32 %v596_v22  ;;  %v606_v41 = vmul.f32 -1.442695, %v288_v35  ;;  %v607_v42 = vmul.f32 -1.442695, %v289_v37  ;;  %v386_v22 = vld [vmem:[%s239_s27] sm:$0xff]  ;;  %v391_v29 = vld [vmem:[%s239_s27 + $0x28] sm:$0xff] }
  0x1a   : > { %650 = vpow2.f32 %v597_v25  ;;  %v388_v25 = vld [vmem:[%s239_s27 + $0x10] sm:$0xff]  ;;  %v394_v33 = vld [vmem:[%s239_s27 + $0x40] sm:$0xff]  ;;  %v397_v37 = vld [vmem:[%s239_s27 + $0x58] sm:$0xff] }
  0x1b   : > { %652 = vpow2.f32 %v598_v27 }
  0x1c   : > { %654 = vpow2.f32 %v599_v30  ;;  %v392_v30 = vld [vmem:[%s239_s27 + $0x30] sm:$0xff] }
  0x1d   : > { %656 = vpow2.f32 %v600_v32  ;;  %v393_v32 = vld [vmem:[%s239_s27 + $0x38] sm:$0xff] }
  0x1e   : > { %658 = vpow2.f32 %v601_v34  ;;  %v395_v34 = vld [vmem:[%s239_s27 + $0x48] sm:$0xff] }
  0x1f   : > { %660 = vpow2.f32 %v602_v36  ;;  %v396_v36 = vld [vmem:[%s239_s27 + $0x50] sm:$0xff] }
  0x20   : > { %662 = vpow2.f32 %v603_v38  ;;  %v398_v38 = vld [vmem:[%s239_s27 + $0x60] sm:$0xff] }
  0x21   : > { %664 = vpow2.f32 %v604_v39 }
  0x22   : > { %v641_v43 = vpop.eup %640  ;;  %666 = vpow2.f32 %v605_v40 }
  0x23   : > { %v643_v44 = vpop.eup %642  ;;  %668 = vpow2.f32 %v606_v41  ;;  %v338_v47 = vadd.f32 1.0, %v641_v43 }
  0x24   : > { %v645_v45 = vpop.eup %644  ;;  %670 = vpow2.f32 %v607_v42  ;;  %v339_v49 = vadd.f32 1.0, %v643_v44  ;;  %v399_v44 = vld [vmem:[%s239_s27 + $0x68] sm:$0xff] }
  0x25   : > { %v647_v46 = vpop.eup %646  ;;  %v340_v51 = vadd.f32 1.0, %v645_v45  ;;  %672 = vrcp.f32 %v338_v47  ;;  %v400_v45 = vld [vmem:[%s239_s27 + $0x70] sm:$0xff] }
  0x26   : > { %v649_v48 = vpop.eup %648  ;;  %v341_v53 = vadd.f32 1.0, %v647_v46  ;;  %674 = vrcp.f32 %v339_v49  ;;  %v401_v46 = vld [vmem:[%s239_s27 + $0x78] sm:$0xff] }
  0x27   : > { %v651_v50 = vpop.eup %650  ;;  %v342_v55 = vadd.f32 1.0, %v649_v48  ;;  %676 = vrcp.f32 %v340_v51 }
  0x28   : > { %v653_v52 = vpop.eup %652  ;;  %v343_v57 = vadd.f32 1.0, %v651_v50  ;;  %678 = vrcp.f32 %v341_v53 }
  0x29   : > { %v655_v54 = vpop.eup %654  ;;  %v344_v59 = vadd.f32 1.0, %v653_v52  ;;  %680 = vrcp.f32 %v342_v55 }
  0x2a   : > { %v657_v56 = vpop.eup %656  ;;  %v345_v61 = vadd.f32 1.0, %v655_v54  ;;  %682 = vrcp.f32 %v343_v57 }
  0x2b   : > { %v659_v58 = vpop.eup %658  ;;  %v346_v63 = vadd.f32 1.0, %v657_v56  ;;  %684 = vrcp.f32 %v344_v59 }
  0x2c   : > { %v661_v60 = vpop.eup %660  ;;  %v347_v1 = vadd.f32 1.0, %v659_v58  ;;  %686 = vrcp.f32 %v345_v61 }
  0x2d   : > { %v663_v62 = vpop.eup %662  ;;  %v348_v3 = vadd.f32 1.0, %v661_v60  ;;  %688 = vrcp.f32 %v346_v63 }
  0x2e   : > { %v665_v0 = vpop.eup %664  ;;  %v349_v5 = vadd.f32 1.0, %v663_v62  ;;  %690 = vrcp.f32 %v347_v1 }
  0x2f   : > { %v667_v2 = vpop.eup %666  ;;  %v350_v7 = vadd.f32 1.0, %v665_v0  ;;  %692 = vrcp.f32 %v348_v3 }
  0x30   : > { %v669_v4 = vpop.eup %668  ;;  %v351_v8 = vadd.f32 1.0, %v667_v2  ;;  %694 = vrcp.f32 %v349_v5 }
  0x31   : > { %v671_v6 = vpop.eup %670  ;;  %v352_v9 = vadd.f32 1.0, %v669_v4  ;;  %696 = vrcp.f32 %v350_v7 }
  0x32   : > { %v353_v10 = vadd.f32 1.0, %v671_v6  ;;  %v673_v11 = vpop.eup %672  ;;  %698 = vrcp.f32 %v351_v8 }
  0x33   : > { %v675_v12 = vpop.eup %674  ;;  %700 = vrcp.f32 %v352_v9  ;;  %v402_v40 = vmul.f32 %v673_v11, %v386_v22 }
  0x34   : > { %v677_v13 = vpop.eup %676  ;;  %702 = vrcp.f32 %v353_v10  ;;  %v403_v41 = vmul.f32 %v675_v12, %v387_v24 }
  0x35   : > { %v679_v14 = vpop.eup %678  ;;  %v404_v42 = vmul.f32 %v677_v13, %v388_v25 }
  0x36   : > { %v681_v15 = vpop.eup %680  ;;  %v405_v43 = vmul.f32 %v679_v14, %v389_v26 }
  0x37   : > { %v683_v16 = vpop.eup %682  ;;  %v406_v47 = vmul.f32 %v681_v15, %v390_v28 }
  0x38   : > { %v685_v17 = vpop.eup %684  ;;  %v407_v48 = vmul.f32 %v683_v16, %v391_v29 }
  0x39   : > { %v687_v18 = vpop.eup %686  ;;  %v408_v49 = vmul.f32 %v685_v17, %v392_v30 }
  0x3a   : > { %v689_v19 = vpop.eup %688  ;;  %v409_v50 = vmul.f32 %v687_v18, %v393_v32 }
  0x3b   : > { %v691_v20 = vpop.eup %690  ;;  %v410_v51 = vmul.f32 %v689_v19, %v394_v33 }
  0x3c   : > { %v693_v21 = vpop.eup %692  ;;  %v411_v52 = vmul.f32 %v691_v20, %v395_v34 }
  0x3d   : > { %v695_v23 = vpop.eup %694  ;;  %v412_v53 = vmul.f32 %v693_v21, %v396_v36 }
  0x3e   : > { %v697_v27 = vpop.eup %696  ;;  %v413_v54 = vmul.f32 %v695_v23, %v397_v37 }
  0x3f   : > { %v699_v31 = vpop.eup %698  ;;  %v414_v56 = vmul.f32 %v697_v27, %v398_v38 }
  0x40   : > { %v701_v35 = vpop.eup %700  ;;  %v415_v57 = vmul.f32 %v699_v31, %v399_v44 }
  0x41   : > { %v703_v39 = vpop.eup %702  ;;  %v416_v58 = vmul.f32 %v701_v35, %v400_v45 }
  0x42   : > { %v417_v59 = vmul.f32 %v703_v39, %v401_v46 }
  0x8b   : > { %v423_v55 = vpop.permute.xlu0 %422 }
  0x8c   : > { %v430_v60 = vmul.f32 %v423_v55, %v402_v40  ;;  %v431_v61 = vmul.f32 %v423_v55, %v403_v41  ;;  %v432_v62 = vmul.f32 %v423_v55, %v404_v42  ;;  %v433_v63 = vmul.f32 %v423_v55, %v405_v43 }
  0x8d   : > { %v434_v0 = vmul.f32 %v423_v55, %v406_v47  ;;  %v435_v1 = vmul.f32 %v423_v55, %v407_v48  ;;  %v436_v2 = vmul.f32 %v423_v55, %v408_v49  ;;  %v437_v3 = vmul.f32 %v423_v55, %v409_v50 }
  0x8e   : > { %446 = vst [vmem:[%s788_s30] sm:$0xff] %v430_v60  ;;  %447 = vst [vmem:[%s788_s30 + $0x8] sm:$0xff] %v431_v61 }
  0x8f   : > { %448 = vst [vmem:[%s788_s30 + $0x10] sm:$0xff] %v432_v62  ;;  %449 = vst [vmem:[%s788_s30 + $0x18] sm:$0xff] %v433_v63  ;;  %v428_v4 = vpop.permute.xlu0 %427 }
  0x90   : > { %450 = vst [vmem:[%s788_s30 + $0x20] sm:$0xff] %v434_v0  ;;  %451 = vst [vmem:[%s788_s30 + $0x28] sm:$0xff] %v435_v1  ;;  %v438_v5 = vmul.f32 %v428_v4, %v410_v51  ;;  %v439_v6 = vmul.f32 %v428_v4, %v411_v52  ;;  %v440_v7 = vmul.f32 %v428_v4, %v412_v53 }
  0x91   : > { %452 = vst [vmem:[%s788_s30 + $0x30] sm:$0xff] %v436_v2  ;;  %453 = vst [vmem:[%s788_s30 + $0x38] sm:$0xff] %v437_v3  ;;  %v441_v8 = vmul.f32 %v428_v4, %v413_v54  ;;  %v442_v9 = vmul.f32 %v428_v4, %v414_v56  ;;  %v443_v10 = vmul.f32 %v428_v4, %v415_v57 }
  0x92   : > { %v444_v11 = vmul.f32 %v428_v4, %v416_v58  ;;  %v445_v12 = vmul.f32 %v428_v4, %v417_v59  ;;  %454 = vst [vmem:[%s788_s30 + $0x40] sm:$0xff] %v438_v5  ;;  %455 = vst [vmem:[%s788_s30 + $0x48] sm:$0xff] %v439_v6 }
  0x93   : > { %456 = vst [vmem:[%s788_s30 + $0x50] sm:$0xff] %v440_v7  ;;  %457 = vst [vmem:[%s788_s30 + $0x58] sm:$0xff] %v441_v8 }
  0x94   : > { %458 = vst [vmem:[%s788_s30 + $0x60] sm:$0xff] %v442_v9  ;;  %459 = vst [vmem:[%s788_s30 + $0x68] sm:$0xff] %v443_v10 }
  0x95   : > { %460 = vst [vmem:[%s788_s30 + $0x70] sm:$0xff] %v444_v11  ;;  %461 = vst [vmem:[%s788_s30 + $0x78] sm:$0xff] %v445_v12 }
  0x96 PF: > { %s13_s14 = sadd.s32 1, %s726_s14   ;;  %s819_s12 = smov %s722_s13 }
  0x97   : > { %p10_p5 = scmp.ge.s32.totalorder %s13_s14, 4   ;;  %s820_s13 = smov %s822_s15 }
  0x99   :  { %12 = sbr.rel (!%p10_p5) target bundleno = 2 (0x2), region = 68 }

</bundles_post_ra>
